<compile_context>
chip_gen: v6e
topology: v6e:2x2x1
jax: 0.10.0
libtpu: 0.0.40
codegen_flags: <defaults>
</compile_context>

<pallas_src>
import math

import numpy as np

import jax
import jax.numpy as jnp
from jax.experimental import pallas as pl
from jax.experimental.pallas import tpu as pltpu


# ---------------------------------------------------------------------------
# Fused forward kernel
# ---------------------------------------------------------------------------
def _lenet5_kernel(x_ref, t1_ref, b1_ref, t2_ref, b2_ref,
                   m1_ref, fb1_ref, w2_ref, fb2_ref, w3_ref, fb3_ref,
                   o_ref, xpad_ref):
    bt = x_ref.shape[0]                 # batch rows handled by this grid step
    f32 = jnp.float32
    cdt = t1_ref.dtype                  # matmul operand dtype (bf16 by default)

    # ---- in-kernel H padding (the W pad is folded into t1's band rows) ------
    # Scratch rows [8:36) hold the raw 28 input rows; rows 6,7 and 36,37 act as
    # the "pad by 2" rows read by the band loop.  All three stores are 8-aligned.
    z8 = jnp.zeros((bt, 8, 28), f32)
    xpad_ref[:, 0:8, :] = z8
    xpad_ref[:, 32:40, :] = z8                      # must precede the x store (rows 32:36 overlap)
    xpad_ref[:, 8:36, :] = x_ref[...].astype(f32)

    # ---- conv1 (1->6, 5x5, pad=2) + bias + relu: 5 banded MXU matmuls -------
    # rows = (b, h); 256 output lanes = parity*128 + c*16 + wp, where w = 2*wp+parity.
    acc1 = None
    for i in range(5):
        xi = xpad_ref[:, 6 + i:34 + i, :].reshape(bt * 28, 28).astype(cdt)
        d = jnp.dot(xi, t1_ref[i], preferred_element_type=f32)
        acc1 = d if acc1 is None else acc1 + d
    y1 = jnp.maximum(acc1 + b1_ref[...], 0.0)                    # (bt*28, 256)

    # ---- 2x2 max-pool #1: H via row-pair max, W via aligned parity halves ---
    y1 = y1.reshape(bt, 14, 2, 256).max(axis=2)                  # (bt, 14, 256)
    p1 = jnp.maximum(y1[:, :, 0:128], y1[:, :, 128:256])         # (bt, 14, 128)

    # ---- conv2 (6->16, 5x5, valid) + bias + relu ----------------------------
    # 256 output lanes = parity*128 + o*8 + wq, where w2 = 2*wq+parity.
    acc2 = None
    for i in range(5):
        xi = p1[:, i:i + 10, :].reshape(bt * 10, 128).astype(cdt)
        d = jnp.dot(xi, t2_ref[i], preferred_element_type=f32)
        acc2 = d if acc2 is None else acc2 + d
    y2 = jnp.maximum(acc2 + b2_ref[...], 0.0)                    # (bt*10, 256)

    # ---- 2x2 max-pool #2 ----------------------------------------------------
    y2 = y2.reshape(bt, 5, 2, 256).max(axis=2)                   # (bt, 5, 256)
    p2 = jnp.maximum(y2[:, :, 0:128], y2[:, :, 128:256])         # (bt, 5, 128)

    # ---- fc1 as 5 banded dots over the pooled rows (no 800-lane concat) -----
    acc3 = None
    for r in range(5):
        d = jnp.dot(p2[:, r, :].astype(cdt), m1_ref[r], preferred_element_type=f32)
        acc3 = d if acc3 is None else acc3 + d
    h1 = jnp.maximum(acc3 + fb1_ref[...], 0.0)                   # (bt, 120)

    # ---- fc2 / fc3 (fc3 output zero-padded to 128 lanes) --------------------
    h2 = jnp.maximum(
        jnp.dot(h1.astype(cdt), w2_ref[...], preferred_element_type=f32)
        + fb2_ref[...], 0.0)                                     # (bt, 128)
    out = jnp.dot(h2.astype(cdt), w3_ref[...], preferred_element_type=f32) \
        + fb3_ref[...]
    o_ref[...] = out.astype(o_ref.dtype)                         # (bt, 128)


# ---------------------------------------------------------------------------
# One-time host-side weight preparation (banded, lane-aligned layouts)
# ---------------------------------------------------------------------------
def prepare_params(p, *, compute_dtype=jnp.bfloat16):
    """Pre-arrange the PyTorch-layout weights into banded, 128-aligned matrices.

    conv1 output lane = parity*128 + c*16 + wp   (w = 2*wp + parity, c < 6, wp < 14)
    conv2 output lane = parity*128 + o*8  + wq   (w = 2*wq + parity, o < 16, wq < 5)
    Unused/pad lanes carry zero weights and zero bias, so pooling over the two
    128-lane parity halves and the downstream matmuls are exact by construction.
    """
    w1 = np.asarray(p["w1"], np.float32)     # (6, 1, 5, 5)
    b1 = np.asarray(p["b1"], np.float32)
    w2 = np.asarray(p["w2"], np.float32)     # (16, 6, 5, 5)
    b2 = np.asarray(p["b2"], np.float32)
    fw1 = np.asarray(p["fw1"], np.float32)   # (120, 400)
    fb1 = np.asarray(p["fb1"], np.float32)
    fw2 = np.asarray(p["fw2"], np.float32)   # (84, 120)
    fb2 = np.asarray(p["fb2"], np.float32)
    fw3 = np.asarray(p["fw3"], np.float32)   # (nc, 84)
    fb3 = np.asarray(p["fb3"], np.float32)
    nc = fw3.shape[0]
    assert nc <= 128, "num_classes must fit one lane-dense 128-wide output tile"

    # conv1 band matrices t1[kh][w_in, lane_out]; W pad=2 folded in (out-of-range
    # input columns simply get no weight entry).
    t1 = np.zeros((5, 28, 256), np.float32)
    b1v = np.zeros((256,), np.float32)
    for c in range(6):
        for wout in range(28):
            lane = (wout % 2) * 128 + c * 16 + wout // 2
            b1v[lane] = b1[c]
            for kh in range(5):
                for kw in range(5):
                    win = wout + kw - 2
                    if 0 <= win < 28:
                        t1[kh, win, lane] = w1[c, 0, kh, kw]

    # conv2 band matrices t2[kh][lane_in, lane_out]; lane_in = cin*16 + wp.
    t2 = np.zeros((5, 128, 256), np.float32)
    b2v = np.zeros((256,), np.float32)
    for o in range(16):
        for w2o in range(10):
            lane_out = (w2o % 2) * 128 + o * 8 + w2o // 2
            b2v[lane_out] = b2[o]
            for cin in range(6):
                for kh in range(5):
                    for kw in range(5):
                        wp = w2o + kw                       # pooled input column, < 14
                        t2[kh, cin * 16 + wp, lane_out] = w2[o, cin, kh, kw]

    # fc1 band matrices over the 5 pooled rows; torch feature idx = o*25 + h5*5 + w5.
    m1 = np.zeros((5, 128, 120), np.float32)
    for h5 in range(5):
        for o in range(16):
            for w5 in range(5):
                m1[h5, o * 8 + w5, :] = fw1[:, o * 25 + h5 * 5 + w5]

    # fc2 / fc3, zero-padded to 128 output lanes (lane-dense writeback).
    w2f = np.zeros((120, 128), np.float32); w2f[:, :84] = fw2.T
    fb2v = np.zeros((128,), np.float32);    fb2v[:84] = fb2
    w3f = np.zeros((128, 128), np.float32); w3f[:84, :nc] = fw3.T
    fb3v = np.zeros((128,), np.float32);    fb3v[:nc] = fb3

    cd = compute_dtype
    return {
        "t1": jnp.asarray(t1, cd),   "b1": jnp.asarray(b1v[None, :], jnp.float32),
        "t2": jnp.asarray(t2, cd),   "b2": jnp.asarray(b2v[None, :], jnp.float32),
        "m1": jnp.asarray(m1, cd),   "fb1": jnp.asarray(fb1[None, :], jnp.float32),
        "w2f": jnp.asarray(w2f, cd), "fb2": jnp.asarray(fb2v[None, :], jnp.float32),
        "w3f": jnp.asarray(w3f, cd), "fb3": jnp.asarray(fb3v[None, :], jnp.float32),
        "num_classes": nc,
    }


# ---------------------------------------------------------------------------
# Forward wrapper: one pallas_call for the whole network
# ---------------------------------------------------------------------------
def lenet5_forward(x, prep, *, batch_tile=128):
    """x: (B, 1, 28, 28) or (B, 28, 28) float -> logits (B, num_classes).

    batch_tile: batch rows per grid step (default 128).  Keep <=128-192 on v7x and
    use B >= 2*batch_tile there so the "parallel" batch axis shards across both
    TensorCores.  Passing x already in bfloat16 halves the input DMA traffic.
    """
    if x.ndim == 4:
        x = x[:, 0, :, :]
    B = x.shape[0]
    nc = prep["num_classes"]
    bt = min(B, batch_tile)
    grid = (pl.cdiv(B, bt),)

    def whole(arr):                       # full-array block, fetched once
        nd = arr.ndim
        return pl.BlockSpec(arr.shape, lambda i, nd=nd: (0,) * nd)

    logits = pl.pallas_call(
        _lenet5_kernel,
        out_shape=jax.ShapeDtypeStruct((B, 128), jnp.float32),
        grid=grid,
        in_specs=[
            pl.BlockSpec((bt, 28, 28), lambda i: (i, 0, 0)),
            whole(prep["t1"]), whole(prep["b1"]),
            whole(prep["t2"]), whole(prep["b2"]),
            whole(prep["m1"]), whole(prep["fb1"]),
            whole(prep["w2f"]), whole(prep["fb2"]),
            whole(prep["w3f"]), whole(prep["fb3"]),
        ],
        out_specs=pl.BlockSpec((bt, 128), lambda i: (i, 0)),
        scratch_shapes=[pltpu.VMEM((bt, 40, 28), jnp.float32)],   # H-padded input
        compiler_params=pltpu.CompilerParams(
            dimension_semantics=("parallel",),
            vmem_limit_bytes=48 * 1024 * 1024),
    )(x, prep["t1"], prep["b1"], prep["t2"], prep["b2"],
      prep["m1"], prep["fb1"], prep["w2f"], prep["fb2"],
      prep["w3f"], prep["fb3"])
    return logits[:, :nc]


# ---------------------------------------------------------------------------
# Parameters (deterministic, PyTorch-default-style uniform init)
# ---------------------------------------------------------------------------
def init_params(key, num_classes=10):
    def u(k, shape, fan_in):
        bound = 1.0 / math.sqrt(fan_in)
        return jax.random.uniform(k, shape, jnp.float32, -bound, bound)

    ks = jax.random.split(key, 10)
    return {
        "w1": u(ks[0], (6, 1, 5, 5), 1 * 5 * 5),
        "b1": u(ks[1], (6,), 1 * 5 * 5),
        "w2": u(ks[2], (16, 6, 5, 5), 6 * 5 * 5),
        "b2": u(ks[3], (16,), 6 * 5 * 5),
        "fw1": u(ks[4], (120, 400), 400),
        "fb1": u(ks[5], (120,), 400),
        "fw2": u(ks[6], (84, 120), 120),
        "fb2": u(ks[7], (84,), 120),
        "fw3": u(ks[8], (num_classes, 84), 84),
        "fb3": u(ks[9], (num_classes,), 84),
    }


# ---------------------------------------------------------------------------
# Pure-JAX reference (matches PyTorch LeNet5.forward) for validation
# ---------------------------------------------------------------------------
def lenet5_reference(x, p):
    dn = ("NCHW", "OIHW", "NCHW")
    y = jax.lax.conv_general_dilated(x, p["w1"], (1, 1), ((2, 2), (2, 2)),
                                     dimension_numbers=dn)
    y = jax.nn.relu(y + p["b1"][None, :, None, None])
    y = jax.lax.reduce_window(y, -jnp.inf, jax.lax.max,
                              (1, 1, 2, 2), (1, 1, 2, 2), "VALID")
    y = jax.lax.conv_general_dilated(y, p["w2"], (1, 1), ((0, 0), (0, 0)),
                                     dimension_numbers=dn)
    y = jax.nn.relu(y + p["b2"][None, :, None, None])
    y = jax.lax.reduce_window(y, -jnp.inf, jax.lax.max,
                              (1, 1, 2, 2), (1, 1, 2, 2), "VALID")
    f = y.reshape(y.shape[0], -1)
    h = jax.nn.relu(f @ p["fw1"].T + p["fb1"])
    h = jax.nn.relu(h @ p["fw2"].T + p["fb2"])
    return h @ p["fw3"].T + p["fb3"]


if __name__ == "__main__":
    # LeNet5's fc1 (16*5*5) implies 28x28 inputs (MNIST-style); batch=2.
    x = jax.random.normal(jax.random.PRNGKey(0), (2, 1, 28, 28), jnp.float32)
    params = init_params(jax.random.PRNGKey(42))
    prep = prepare_params(params)        # bf16 matmul operands, f32 accumulation

    fwd = jax.jit(lambda xx: lenet5_forward(xx, prep))
    out = jax.block_until_ready(fwd(x))
    assert out.shape == (2, 10) and out.dtype == jnp.float32

    ref = lenet5_reference(x, params)
    # Tolerance sized for bf16 matmul operands with f32 accumulation (expected
    # max abs error ~1e-2 on logits of magnitude ~1); an f32-prep run matches to
    # ~1e-5 if exactness is needed (prepare_params(..., compute_dtype=jnp.float32)).
    if not jnp.allclose(out, ref, atol=5e-2, rtol=5e-2):
        raise RuntimeError("Pallas kernel mismatch vs reference: max abs err = "
                           f"{float(jnp.max(jnp.abs(out - ref)))}")
    print("KERNEL_OK")
</pallas_src>

<mosaic_0001>
module attributes {stable_mosaic.version = 11 : i64} {
  func.func @_lenet5_kernel(%arg0: i32, %arg1: memref<2x28x28xf32, #tpu.memory_space<vmem>>, %arg2: memref<5x28x256xbf16, #tpu.memory_space<vmem>>, %arg3: memref<1x256xf32, #tpu.memory_space<vmem>>, %arg4: memref<5x128x256xbf16, #tpu.memory_space<vmem>>, %arg5: memref<1x256xf32, #tpu.memory_space<vmem>>, %arg6: memref<5x128x120xbf16, #tpu.memory_space<vmem>>, %arg7: memref<1x120xf32, #tpu.memory_space<vmem>>, %arg8: memref<120x128xbf16, #tpu.memory_space<vmem>>, %arg9: memref<1x128xf32, #tpu.memory_space<vmem>>, %arg10: memref<128x128xbf16, #tpu.memory_space<vmem>>, %arg11: memref<1x128xf32, #tpu.memory_space<vmem>>, %arg12: memref<2x128xf32, #tpu.memory_space<vmem>>, %arg13: memref<2x40x28xf32, #tpu.memory_space<vmem>>) attributes {dimension_semantics = [#tpu.dimension_semantics<parallel>], iteration_bounds = array<i64: 1>, scalar_prefetch = 0 : i64, scratch_operands = 1 : i64, tpu.core_type = #tpu.core_type<tc>, window_params = [{transform_indices = @transform_0, window_bounds = array<i64: 2, 28, 28>}, {pipeline_mode = #tpu.pipeline_mode<synchronous>, transform_indices = @transform_1, window_bounds = array<i64: 5, 28, 256>}, {pipeline_mode = #tpu.pipeline_mode<synchronous>, transform_indices = @transform_2, window_bounds = array<i64: 1, 256>}, {pipeline_mode = #tpu.pipeline_mode<synchronous>, transform_indices = @transform_3, window_bounds = array<i64: 5, 128, 256>}, {pipeline_mode = #tpu.pipeline_mode<synchronous>, transform_indices = @transform_4, window_bounds = array<i64: 1, 256>}, {pipeline_mode = #tpu.pipeline_mode<synchronous>, transform_indices = @transform_5, window_bounds = array<i64: 5, 128, 120>}, {pipeline_mode = #tpu.pipeline_mode<synchronous>, transform_indices = @transform_6, window_bounds = array<i64: 1, 120>}, {pipeline_mode = #tpu.pipeline_mode<synchronous>, transform_indices = @transform_7, window_bounds = array<i64: 120, 128>}, {pipeline_mode = #tpu.pipeline_mode<synchronous>, transform_indices = @transform_8, window_bounds = array<i64: 1, 128>}, {pipeline_mode = #tpu.pipeline_mode<synchronous>, transform_indices = @transform_9, window_bounds = array<i64: 128, 128>}, {pipeline_mode = #tpu.pipeline_mode<synchronous>, transform_indices = @transform_10, window_bounds = array<i64: 1, 128>}, {transform_indices = @transform_11, window_bounds = array<i64: 2, 128>}]} {
    %cst = arith.constant 0.000000e+00 : f32
    %0 = vector.broadcast %cst : f32 to vector<2x8x28xf32>
    %c0 = arith.constant 0 : index
    %c0_0 = arith.constant 0 : index
    %c0_1 = arith.constant 0 : index
    %1 = vector.load %arg13[%c0, %c0_0, %c0_1] : memref<2x40x28xf32, #tpu.memory_space<vmem>>, vector<2x8x28xf32>
    tpu.vector_store %arg13[%c0, %c0_0, %c0_1], %0 {strides = array<i32>} : memref<2x40x28xf32, #tpu.memory_space<vmem>>, vector<2x8x28xf32>,
    %c0_2 = arith.constant 0 : index
    %c32 = arith.constant 32 : index
    %c0_3 = arith.constant 0 : index
    %2 = vector.load %arg13[%c0_2, %c32, %c0_3] : memref<2x40x28xf32, #tpu.memory_space<vmem>>, vector<2x8x28xf32>
    tpu.vector_store %arg13[%c0_2, %c32, %c0_3], %0 {strides = array<i32>} : memref<2x40x28xf32, #tpu.memory_space<vmem>>, vector<2x8x28xf32>,
    %c0_4 = arith.constant 0 : index
    %c0_5 = arith.constant 0 : index
    %c0_6 = arith.constant 0 : index
    %3 = vector.load %arg1[%c0_4, %c0_5, %c0_6] : memref<2x28x28xf32, #tpu.memory_space<vmem>>, vector<2x28x28xf32>
    %c0_7 = arith.constant 0 : index
    %c8 = arith.constant 8 : index
    %c0_8 = arith.constant 0 : index
    %4 = vector.load %arg13[%c0_7, %c8, %c0_8] : memref<2x40x28xf32, #tpu.memory_space<vmem>>, vector<2x28x28xf32>
    tpu.vector_store %arg13[%c0_7, %c8, %c0_8], %3 {strides = array<i32>} : memref<2x40x28xf32, #tpu.memory_space<vmem>>, vector<2x28x28xf32>,
    %c0_9 = arith.constant 0 : index
    %c6 = arith.constant 6 : index
    %c0_10 = arith.constant 0 : index
    %5 = vector.load %arg13[%c0_9, %c6, %c0_10] : memref<2x40x28xf32, #tpu.memory_space<vmem>>, vector<2x28x28xf32>
    %6 = vector.shape_cast %5 : vector<2x28x28xf32> to vector<56x28xf32>
    %7 = arith.truncf %6 : vector<56x28xf32> to vector<56x28xbf16>
    %c0_11 = arith.constant 0 : index
    %c0_12 = arith.constant 0 : index
    %c0_13 = arith.constant 0 : index
    %8 = vector.load %arg2[%c0_11, %c0_12, %c0_13] : memref<5x28x256xbf16, #tpu.memory_space<vmem>>, vector<1x28x256xbf16>
    %9 = vector.shape_cast %8 : vector<1x28x256xbf16> to vector<28x256xbf16>
    %cst_14 = arith.constant dense<0.000000e+00> : vector<56x256xf32>
    %10 = tpu.matmul %7, %9, %cst_14 {dimension_numbers = #tpu.dot_dimension_numbers<[1], [0], [0], [1], [0, 0, 1, 1], [], []>} : vector<56x28xbf16>, vector<28x256xbf16>, vector<56x256xf32> -> vector<56x256xf32>
    %c0_15 = arith.constant 0 : index
    %c7 = arith.constant 7 : index
    %c0_16 = arith.constant 0 : index
    %11 = vector.load %arg13[%c0_15, %c7, %c0_16] : memref<2x40x28xf32, #tpu.memory_space<vmem>>, vector<2x28x28xf32>
    %12 = vector.shape_cast %11 : vector<2x28x28xf32> to vector<56x28xf32>
    %13 = arith.truncf %12 : vector<56x28xf32> to vector<56x28xbf16>
    %c1 = arith.constant 1 : index
    %c0_17 = arith.constant 0 : index
    %c0_18 = arith.constant 0 : index
    %14 = vector.load %arg2[%c1, %c0_17, %c0_18] : memref<5x28x256xbf16, #tpu.memory_space<vmem>>, vector<1x28x256xbf16>
    %15 = vector.shape_cast %14 : vector<1x28x256xbf16> to vector<28x256xbf16>
    %cst_19 = arith.constant dense<0.000000e+00> : vector<56x256xf32>
    %16 = tpu.matmul %13, %15, %cst_19 {dimension_numbers = #tpu.dot_dimension_numbers<[1], [0], [0], [1], [0, 0, 1, 1], [], []>} : vector<56x28xbf16>, vector<28x256xbf16>, vector<56x256xf32> -> vector<56x256xf32>
    %17 = arith.addf %10, %16 : vector<56x256xf32>
    %c0_20 = arith.constant 0 : index
    %c8_21 = arith.constant 8 : index
    %c0_22 = arith.constant 0 : index
    %18 = vector.load %arg13[%c0_20, %c8_21, %c0_22] : memref<2x40x28xf32, #tpu.memory_space<vmem>>, vector<2x28x28xf32>
    %19 = vector.shape_cast %18 : vector<2x28x28xf32> to vector<56x28xf32>
    %20 = arith.truncf %19 : vector<56x28xf32> to vector<56x28xbf16>
    %c2 = arith.constant 2 : index
    %c0_23 = arith.constant 0 : index
    %c0_24 = arith.constant 0 : index
    %21 = vector.load %arg2[%c2, %c0_23, %c0_24] : memref<5x28x256xbf16, #tpu.memory_space<vmem>>, vector<1x28x256xbf16>
    %22 = vector.shape_cast %21 : vector<1x28x256xbf16> to vector<28x256xbf16>
    %cst_25 = arith.constant dense<0.000000e+00> : vector<56x256xf32>
    %23 = tpu.matmul %20, %22, %cst_25 {dimension_numbers = #tpu.dot_dimension_numbers<[1], [0], [0], [1], [0, 0, 1, 1], [], []>} : vector<56x28xbf16>, vector<28x256xbf16>, vector<56x256xf32> -> vector<56x256xf32>
    %24 = arith.addf %17, %23 : vector<56x256xf32>
    %c0_26 = arith.constant 0 : index
    %c9 = arith.constant 9 : index
    %c0_27 = arith.constant 0 : index
    %25 = vector.load %arg13[%c0_26, %c9, %c0_27] : memref<2x40x28xf32, #tpu.memory_space<vmem>>, vector<2x28x28xf32>
    %26 = vector.shape_cast %25 : vector<2x28x28xf32> to vector<56x28xf32>
    %27 = arith.truncf %26 : vector<56x28xf32> to vector<56x28xbf16>
    %c3 = arith.constant 3 : index
    %c0_28 = arith.constant 0 : index
    %c0_29 = arith.constant 0 : index
    %28 = vector.load %arg2[%c3, %c0_28, %c0_29] : memref<5x28x256xbf16, #tpu.memory_space<vmem>>, vector<1x28x256xbf16>
    %29 = vector.shape_cast %28 : vector<1x28x256xbf16> to vector<28x256xbf16>
    %cst_30 = arith.constant dense<0.000000e+00> : vector<56x256xf32>
    %30 = tpu.matmul %27, %29, %cst_30 {dimension_numbers = #tpu.dot_dimension_numbers<[1], [0], [0], [1], [0, 0, 1, 1], [], []>} : vector<56x28xbf16>, vector<28x256xbf16>, vector<56x256xf32> -> vector<56x256xf32>
    %31 = arith.addf %24, %30 : vector<56x256xf32>
    %c0_31 = arith.constant 0 : index
    %c10 = arith.constant 10 : index
    %c0_32 = arith.constant 0 : index
    %32 = vector.load %arg13[%c0_31, %c10, %c0_32] : memref<2x40x28xf32, #tpu.memory_space<vmem>>, vector<2x28x28xf32>
    %33 = vector.shape_cast %32 : vector<2x28x28xf32> to vector<56x28xf32>
    %34 = arith.truncf %33 : vector<56x28xf32> to vector<56x28xbf16>
    %c4 = arith.constant 4 : index
    %c0_33 = arith.constant 0 : index
    %c0_34 = arith.constant 0 : index
    %35 = vector.load %arg2[%c4, %c0_33, %c0_34] : memref<5x28x256xbf16, #tpu.memory_space<vmem>>, vector<1x28x256xbf16>
    %36 = vector.shape_cast %35 : vector<1x28x256xbf16> to vector<28x256xbf16>
    %cst_35 = arith.constant dense<0.000000e+00> : vector<56x256xf32>
    %37 = tpu.matmul %34, %36, %cst_35 {dimension_numbers = #tpu.dot_dimension_numbers<[1], [0], [0], [1], [0, 0, 1, 1], [], []>} : vector<56x28xbf16>, vector<28x256xbf16>, vector<56x256xf32> -> vector<56x256xf32>
    %38 = arith.addf %31, %37 : vector<56x256xf32>
    %c0_36 = arith.constant 0 : index
    %c0_37 = arith.constant 0 : index
    %39 = vector.load %arg3[%c0_36, %c0_37] : memref<1x256xf32, #tpu.memory_space<vmem>>, vector<1x256xf32>
    %40 = vector.broadcast %39 : vector<1x256xf32> to vector<56x256xf32>
    %41 = arith.addf %38, %40 : vector<56x256xf32>
    %cst_38 = arith.constant 0.000000e+00 : f32
    %42 = vector.broadcast %cst_38 : f32 to vector<56x256xf32>
    %43 = arith.maximumf %41, %42 : vector<56x256xf32>
    %44 = vector.shape_cast %43 : vector<56x256xf32> to vector<2x14x2x256xf32>
    %cst_39 = arith.constant dense<0xFF800000> : vector<2x14x256xf32>
    %45 = vector.multi_reduction <maximumf>, %44, %cst_39 [2] : vector<2x14x2x256xf32> to vector<2x14x256xf32>
    %46 = vector.extract_strided_slice %45 {offsets = [0, 0, 0], sizes = [2, 14, 128], strides = [1, 1, 1]} : vector<2x14x256xf32> to vector<2x14x128xf32>
    %47 = vector.extract_strided_slice %45 {offsets = [0, 0, 128], sizes = [2, 14, 128], strides = [1, 1, 1]} : vector<2x14x256xf32> to vector<2x14x128xf32>
    %48 = arith.maximumf %46, %47 : vector<2x14x128xf32>
    %49 = vector.extract_strided_slice %48 {offsets = [0, 0, 0], sizes = [2, 10, 128], strides = [1, 1, 1]} : vector<2x14x128xf32> to vector<2x10x128xf32>
    %50 = vector.shape_cast %49 : vector<2x10x128xf32> to vector<20x128xf32>
    %51 = arith.truncf %50 : vector<20x128xf32> to vector<20x128xbf16>
    %c0_40 = arith.constant 0 : index
    %c0_41 = arith.constant 0 : index
    %c0_42 = arith.constant 0 : index
    %52 = vector.load %arg4[%c0_40, %c0_41, %c0_42] : memref<5x128x256xbf16, #tpu.memory_space<vmem>>, vector<1x128x256xbf16>
    %53 = vector.shape_cast %52 : vector<1x128x256xbf16> to vector<128x256xbf16>
    %cst_43 = arith.constant dense<0.000000e+00> : vector<20x256xf32>
    %54 = tpu.matmul %51, %53, %cst_43 {dimension_numbers = #tpu.dot_dimension_numbers<[1], [0], [0], [1], [0, 0, 1, 1], [], []>} : vector<20x128xbf16>, vector<128x256xbf16>, vector<20x256xf32> -> vector<20x256xf32>
    %55 = vector.extract_strided_slice %48 {offsets = [0, 1, 0], sizes = [2, 10, 128], strides = [1, 1, 1]} : vector<2x14x128xf32> to vector<2x10x128xf32>
    %56 = vector.shape_cast %55 : vector<2x10x128xf32> to vector<20x128xf32>
    %57 = arith.truncf %56 : vector<20x128xf32> to vector<20x128xbf16>
    %c1_44 = arith.constant 1 : index
    %c0_45 = arith.constant 0 : index
    %c0_46 = arith.constant 0 : index
    %58 = vector.load %arg4[%c1_44, %c0_45, %c0_46] : memref<5x128x256xbf16, #tpu.memory_space<vmem>>, vector<1x128x256xbf16>
    %59 = vector.shape_cast %58 : vector<1x128x256xbf16> to vector<128x256xbf16>
    %cst_47 = arith.constant dense<0.000000e+00> : vector<20x256xf32>
    %60 = tpu.matmul %57, %59, %cst_47 {dimension_numbers = #tpu.dot_dimension_numbers<[1], [0], [0], [1], [0, 0, 1, 1], [], []>} : vector<20x128xbf16>, vector<128x256xbf16>, vector<20x256xf32> -> vector<20x256xf32>
    %61 = arith.addf %54, %60 : vector<20x256xf32>
    %62 = vector.extract_strided_slice %48 {offsets = [0, 2, 0], sizes = [2, 10, 128], strides = [1, 1, 1]} : vector<2x14x128xf32> to vector<2x10x128xf32>
    %63 = vector.shape_cast %62 : vector<2x10x128xf32> to vector<20x128xf32>
    %64 = arith.truncf %63 : vector<20x128xf32> to vector<20x128xbf16>
    %c2_48 = arith.constant 2 : index
    %c0_49 = arith.constant 0 : index
    %c0_50 = arith.constant 0 : index
    %65 = vector.load %arg4[%c2_48, %c0_49, %c0_50] : memref<5x128x256xbf16, #tpu.memory_space<vmem>>, vector<1x128x256xbf16>
    %66 = vector.shape_cast %65 : vector<1x128x256xbf16> to vector<128x256xbf16>
    %cst_51 = arith.constant dense<0.000000e+00> : vector<20x256xf32>
    %67 = tpu.matmul %64, %66, %cst_51 {dimension_numbers = #tpu.dot_dimension_numbers<[1], [0], [0], [1], [0, 0, 1, 1], [], []>} : vector<20x128xbf16>, vector<128x256xbf16>, vector<20x256xf32> -> vector<20x256xf32>
    %68 = arith.addf %61, %67 : vector<20x256xf32>
    %69 = vector.extract_strided_slice %48 {offsets = [0, 3, 0], sizes = [2, 10, 128], strides = [1, 1, 1]} : vector<2x14x128xf32> to vector<2x10x128xf32>
    %70 = vector.shape_cast %69 : vector<2x10x128xf32> to vector<20x128xf32>
    %71 = arith.truncf %70 : vector<20x128xf32> to vector<20x128xbf16>
    %c3_52 = arith.constant 3 : index
    %c0_53 = arith.constant 0 : index
    %c0_54 = arith.constant 0 : index
    %72 = vector.load %arg4[%c3_52, %c0_53, %c0_54] : memref<5x128x256xbf16, #tpu.memory_space<vmem>>, vector<1x128x256xbf16>
    %73 = vector.shape_cast %72 : vector<1x128x256xbf16> to vector<128x256xbf16>
    %cst_55 = arith.constant dense<0.000000e+00> : vector<20x256xf32>
    %74 = tpu.matmul %71, %73, %cst_55 {dimension_numbers = #tpu.dot_dimension_numbers<[1], [0], [0], [1], [0, 0, 1, 1], [], []>} : vector<20x128xbf16>, vector<128x256xbf16>, vector<20x256xf32> -> vector<20x256xf32>
    %75 = arith.addf %68, %74 : vector<20x256xf32>
    %76 = vector.extract_strided_slice %48 {offsets = [0, 4, 0], sizes = [2, 10, 128], strides = [1, 1, 1]} : vector<2x14x128xf32> to vector<2x10x128xf32>
    %77 = vector.shape_cast %76 : vector<2x10x128xf32> to vector<20x128xf32>
    %78 = arith.truncf %77 : vector<20x128xf32> to vector<20x128xbf16>
    %c4_56 = arith.constant 4 : index
    %c0_57 = arith.constant 0 : index
    %c0_58 = arith.constant 0 : index
    %79 = vector.load %arg4[%c4_56, %c0_57, %c0_58] : memref<5x128x256xbf16, #tpu.memory_space<vmem>>, vector<1x128x256xbf16>
    %80 = vector.shape_cast %79 : vector<1x128x256xbf16> to vector<128x256xbf16>
    %cst_59 = arith.constant dense<0.000000e+00> : vector<20x256xf32>
    %81 = tpu.matmul %78, %80, %cst_59 {dimension_numbers = #tpu.dot_dimension_numbers<[1], [0], [0], [1], [0, 0, 1, 1], [], []>} : vector<20x128xbf16>, vector<128x256xbf16>, vector<20x256xf32> -> vector<20x256xf32>
    %82 = arith.addf %75, %81 : vector<20x256xf32>
    %c0_60 = arith.constant 0 : index
    %c0_61 = arith.constant 0 : index
    %83 = vector.load %arg5[%c0_60, %c0_61] : memref<1x256xf32, #tpu.memory_space<vmem>>, vector<1x256xf32>
    %84 = vector.broadcast %83 : vector<1x256xf32> to vector<20x256xf32>
    %85 = arith.addf %82, %84 : vector<20x256xf32>
    %cst_62 = arith.constant 0.000000e+00 : f32
    %86 = vector.broadcast %cst_62 : f32 to vector<20x256xf32>
    %87 = arith.maximumf %85, %86 : vector<20x256xf32>
    %88 = vector.shape_cast %87 : vector<20x256xf32> to vector<2x5x2x256xf32>
    %cst_63 = arith.constant dense<0xFF800000> : vector<2x5x256xf32>
    %89 = vector.multi_reduction <maximumf>, %88, %cst_63 [2] : vector<2x5x2x256xf32> to vector<2x5x256xf32>
    %90 = vector.extract_strided_slice %89 {offsets = [0, 0, 0], sizes = [2, 5, 128], strides = [1, 1, 1]} : vector<2x5x256xf32> to vector<2x5x128xf32>
    %91 = vector.extract_strided_slice %89 {offsets = [0, 0, 128], sizes = [2, 5, 128], strides = [1, 1, 1]} : vector<2x5x256xf32> to vector<2x5x128xf32>
    %92 = arith.maximumf %90, %91 : vector<2x5x128xf32>
    %93 = vector.extract_strided_slice %92 {offsets = [0, 0, 0], sizes = [2, 1, 128], strides = [1, 1, 1]} : vector<2x5x128xf32> to vector<2x1x128xf32>
    %94 = vector.shape_cast %93 : vector<2x1x128xf32> to vector<2x128xf32>
    %95 = arith.truncf %94 : vector<2x128xf32> to vector<2x128xbf16>
    %c0_64 = arith.constant 0 : index
    %c0_65 = arith.constant 0 : index
    %c0_66 = arith.constant 0 : index
    %96 = vector.load %arg6[%c0_64, %c0_65, %c0_66] : memref<5x128x120xbf16, #tpu.memory_space<vmem>>, vector<1x128x120xbf16>
    %97 = vector.shape_cast %96 : vector<1x128x120xbf16> to vector<128x120xbf16>
    %cst_67 = arith.constant dense<0.000000e+00> : vector<2x120xf32>
    %98 = tpu.matmul %95, %97, %cst_67 {dimension_numbers = #tpu.dot_dimension_numbers<[1], [0], [0], [1], [0, 0, 1, 1], [], []>} : vector<2x128xbf16>, vector<128x120xbf16>, vector<2x120xf32> -> vector<2x120xf32>
    %99 = vector.extract_strided_slice %92 {offsets = [0, 1, 0], sizes = [2, 1, 128], strides = [1, 1, 1]} : vector<2x5x128xf32> to vector<2x1x128xf32>
    %100 = vector.shape_cast %99 : vector<2x1x128xf32> to vector<2x128xf32>
    %101 = arith.truncf %100 : vector<2x128xf32> to vector<2x128xbf16>
    %c1_68 = arith.constant 1 : index
    %c0_69 = arith.constant 0 : index
    %c0_70 = arith.constant 0 : index
    %102 = vector.load %arg6[%c1_68, %c0_69, %c0_70] : memref<5x128x120xbf16, #tpu.memory_space<vmem>>, vector<1x128x120xbf16>
    %103 = vector.shape_cast %102 : vector<1x128x120xbf16> to vector<128x120xbf16>
    %cst_71 = arith.constant dense<0.000000e+00> : vector<2x120xf32>
    %104 = tpu.matmul %101, %103, %cst_71 {dimension_numbers = #tpu.dot_dimension_numbers<[1], [0], [0], [1], [0, 0, 1, 1], [], []>} : vector<2x128xbf16>, vector<128x120xbf16>, vector<2x120xf32> -> vector<2x120xf32>
    %105 = arith.addf %98, %104 : vector<2x120xf32>
    %106 = vector.extract_strided_slice %92 {offsets = [0, 2, 0], sizes = [2, 1, 128], strides = [1, 1, 1]} : vector<2x5x128xf32> to vector<2x1x128xf32>
    %107 = vector.shape_cast %106 : vector<2x1x128xf32> to vector<2x128xf32>
    %108 = arith.truncf %107 : vector<2x128xf32> to vector<2x128xbf16>
    %c2_72 = arith.constant 2 : index
    %c0_73 = arith.constant 0 : index
    %c0_74 = arith.constant 0 : index
    %109 = vector.load %arg6[%c2_72, %c0_73, %c0_74] : memref<5x128x120xbf16, #tpu.memory_space<vmem>>, vector<1x128x120xbf16>
    %110 = vector.shape_cast %109 : vector<1x128x120xbf16> to vector<128x120xbf16>
    %cst_75 = arith.constant dense<0.000000e+00> : vector<2x120xf32>
    %111 = tpu.matmul %108, %110, %cst_75 {dimension_numbers = #tpu.dot_dimension_numbers<[1], [0], [0], [1], [0, 0, 1, 1], [], []>} : vector<2x128xbf16>, vector<128x120xbf16>, vector<2x120xf32> -> vector<2x120xf32>
    %112 = arith.addf %105, %111 : vector<2x120xf32>
    %113 = vector.extract_strided_slice %92 {offsets = [0, 3, 0], sizes = [2, 1, 128], strides = [1, 1, 1]} : vector<2x5x128xf32> to vector<2x1x128xf32>
    %114 = vector.shape_cast %113 : vector<2x1x128xf32> to vector<2x128xf32>
    %115 = arith.truncf %114 : vector<2x128xf32> to vector<2x128xbf16>
    %c3_76 = arith.constant 3 : index
    %c0_77 = arith.constant 0 : index
    %c0_78 = arith.constant 0 : index
    %116 = vector.load %arg6[%c3_76, %c0_77, %c0_78] : memref<5x128x120xbf16, #tpu.memory_space<vmem>>, vector<1x128x120xbf16>
    %117 = vector.shape_cast %116 : vector<1x128x120xbf16> to vector<128x120xbf16>
    %cst_79 = arith.constant dense<0.000000e+00> : vector<2x120xf32>
    %118 = tpu.matmul %115, %117, %cst_79 {dimension_numbers = #tpu.dot_dimension_numbers<[1], [0], [0], [1], [0, 0, 1, 1], [], []>} : vector<2x128xbf16>, vector<128x120xbf16>, vector<2x120xf32> -> vector<2x120xf32>
    %119 = arith.addf %112, %118 : vector<2x120xf32>
    %120 = vector.extract_strided_slice %92 {offsets = [0, 4, 0], sizes = [2, 1, 128], strides = [1, 1, 1]} : vector<2x5x128xf32> to vector<2x1x128xf32>
    %121 = vector.shape_cast %120 : vector<2x1x128xf32> to vector<2x128xf32>
    %122 = arith.truncf %121 : vector<2x128xf32> to vector<2x128xbf16>
    %c4_80 = arith.constant 4 : index
    %c0_81 = arith.constant 0 : index
    %c0_82 = arith.constant 0 : index
    %123 = vector.load %arg6[%c4_80, %c0_81, %c0_82] : memref<5x128x120xbf16, #tpu.memory_space<vmem>>, vector<1x128x120xbf16>
    %124 = vector.shape_cast %123 : vector<1x128x120xbf16> to vector<128x120xbf16>
    %cst_83 = arith.constant dense<0.000000e+00> : vector<2x120xf32>
    %125 = tpu.matmul %122, %124, %cst_83 {dimension_numbers = #tpu.dot_dimension_numbers<[1], [0], [0], [1], [0, 0, 1, 1], [], []>} : vector<2x128xbf16>, vector<128x120xbf16>, vector<2x120xf32> -> vector<2x120xf32>
    %126 = arith.addf %119, %125 : vector<2x120xf32>
    %c0_84 = arith.constant 0 : index
    %c0_85 = arith.constant 0 : index
    %127 = vector.load %arg7[%c0_84, %c0_85] : memref<1x120xf32, #tpu.memory_space<vmem>>, vector<1x120xf32>
    %128 = vector.broadcast %127 : vector<1x120xf32> to vector<2x120xf32>
    %129 = arith.addf %126, %128 : vector<2x120xf32>
    %cst_86 = arith.constant 0.000000e+00 : f32
    %130 = vector.broadcast %cst_86 : f32 to vector<2x120xf32>
    %131 = arith.maximumf %129, %130 : vector<2x120xf32>
    %132 = arith.truncf %131 : vector<2x120xf32> to vector<2x120xbf16>
    %c0_87 = arith.constant 0 : index
    %c0_88 = arith.constant 0 : index
    %133 = vector.load %arg8[%c0_87, %c0_88] : memref<120x128xbf16, #tpu.memory_space<vmem>>, vector<120x128xbf16>
    %cst_89 = arith.constant dense<0.000000e+00> : vector<2x128xf32>
    %134 = tpu.matmul %132, %133, %cst_89 {dimension_numbers = #tpu.dot_dimension_numbers<[1], [0], [0], [1], [0, 0, 1, 1], [], []>} : vector<2x120xbf16>, vector<120x128xbf16>, vector<2x128xf32> -> vector<2x128xf32>
    %c0_90 = arith.constant 0 : index
    %c0_91 = arith.constant 0 : index
    %135 = vector.load %arg9[%c0_90, %c0_91] : memref<1x128xf32, #tpu.memory_space<vmem>>, vector<1x128xf32>
    %136 = vector.broadcast %135 : vector<1x128xf32> to vector<2x128xf32>
    %137 = arith.addf %134, %136 : vector<2x128xf32>
    %cst_92 = arith.constant 0.000000e+00 : f32
    %138 = vector.broadcast %cst_92 : f32 to vector<2x128xf32>
    %139 = arith.maximumf %137, %138 : vector<2x128xf32>
    %140 = arith.truncf %139 : vector<2x128xf32> to vector<2x128xbf16>
    %c0_93 = arith.constant 0 : index
    %c0_94 = arith.constant 0 : index
    %141 = vector.load %arg10[%c0_93, %c0_94] : memref<128x128xbf16, #tpu.memory_space<vmem>>, vector<128x128xbf16>
    %cst_95 = arith.constant dense<0.000000e+00> : vector<2x128xf32>
    %142 = tpu.matmul %140, %141, %cst_95 {dimension_numbers = #tpu.dot_dimension_numbers<[1], [0], [0], [1], [0, 0, 1, 1], [], []>} : vector<2x128xbf16>, vector<128x128xbf16>, vector<2x128xf32> -> vector<2x128xf32>
    %c0_96 = arith.constant 0 : index
    %c0_97 = arith.constant 0 : index
    %143 = vector.load %arg11[%c0_96, %c0_97] : memref<1x128xf32, #tpu.memory_space<vmem>>, vector<1x128xf32>
    %144 = vector.broadcast %143 : vector<1x128xf32> to vector<2x128xf32>
    %145 = arith.addf %142, %144 : vector<2x128xf32>
    %c0_98 = arith.constant 0 : index
    %c0_99 = arith.constant 0 : index
    %146 = vector.load %arg12[%c0_98, %c0_99] : memref<2x128xf32, #tpu.memory_space<vmem>>, vector<2x128xf32>
    tpu.vector_store %arg12[%c0_98, %c0_99], %145 {strides = array<i32>} : memref<2x128xf32, #tpu.memory_space<vmem>>, vector<2x128xf32>,
    return
  }
  func.func @transform_0(%arg0: i32) -> (i32, i32, i32) {
    %c0_i32 = arith.constant 0 : i32
    %c0_i32_0 = arith.constant 0 : i32
    %c0_i32_1 = arith.constant 0 : i32
    return %arg0, %c0_i32, %c0_i32_0 : i32, i32, i32
  }
  func.func @transform_1(%arg0: i32) -> (i32, i32, i32) {
    %c0_i32 = arith.constant 0 : i32
    %c0_i32_0 = arith.constant 0 : i32
    %c0_i32_1 = arith.constant 0 : i32
    %c0_i32_2 = arith.constant 0 : i32
    return %c0_i32, %c0_i32_0, %c0_i32_1 : i32, i32, i32
  }
  func.func @transform_2(%arg0: i32) -> (i32, i32) {
    %c0_i32 = arith.constant 0 : i32
    %c0_i32_0 = arith.constant 0 : i32
    %c0_i32_1 = arith.constant 0 : i32
    return %c0_i32, %c0_i32_0 : i32, i32
  }
  func.func @transform_3(%arg0: i32) -> (i32, i32, i32) {
    %c0_i32 = arith.constant 0 : i32
    %c0_i32_0 = arith.constant 0 : i32
    %c0_i32_1 = arith.constant 0 : i32
    %c0_i32_2 = arith.constant 0 : i32
    return %c0_i32, %c0_i32_0, %c0_i32_1 : i32, i32, i32
  }
  func.func @transform_4(%arg0: i32) -> (i32, i32) {
    %c0_i32 = arith.constant 0 : i32
    %c0_i32_0 = arith.constant 0 : i32
    %c0_i32_1 = arith.constant 0 : i32
    return %c0_i32, %c0_i32_0 : i32, i32
  }
  func.func @transform_5(%arg0: i32) -> (i32, i32, i32) {
    %c0_i32 = arith.constant 0 : i32
    %c0_i32_0 = arith.constant 0 : i32
    %c0_i32_1 = arith.constant 0 : i32
    %c0_i32_2 = arith.constant 0 : i32
    return %c0_i32, %c0_i32_0, %c0_i32_1 : i32, i32, i32
  }
  func.func @transform_6(%arg0: i32) -> (i32, i32) {
    %c0_i32 = arith.constant 0 : i32
    %c0_i32_0 = arith.constant 0 : i32
    %c0_i32_1 = arith.constant 0 : i32
    return %c0_i32, %c0_i32_0 : i32, i32
  }
  func.func @transform_7(%arg0: i32) -> (i32, i32) {
    %c0_i32 = arith.constant 0 : i32
    %c0_i32_0 = arith.constant 0 : i32
    %c0_i32_1 = arith.constant 0 : i32
    return %c0_i32, %c0_i32_0 : i32, i32
  }
  func.func @transform_8(%arg0: i32) -> (i32, i32) {
    %c0_i32 = arith.constant 0 : i32
    %c0_i32_0 = arith.constant 0 : i32
    %c0_i32_1 = arith.constant 0 : i32
    return %c0_i32, %c0_i32_0 : i32, i32
  }
  func.func @transform_9(%arg0: i32) -> (i32, i32) {
    %c0_i32 = arith.constant 0 : i32
    %c0_i32_0 = arith.constant 0 : i32
    %c0_i32_1 = arith.constant 0 : i32
    return %c0_i32, %c0_i32_0 : i32, i32
  }
  func.func @transform_10(%arg0: i32) -> (i32, i32) {
    %c0_i32 = arith.constant 0 : i32
    %c0_i32_0 = arith.constant 0 : i32
    %c0_i32_1 = arith.constant 0 : i32
    return %c0_i32, %c0_i32_0 : i32, i32
  }
  func.func @transform_11(%arg0: i32) -> (i32, i32) {
    %c0_i32 = arith.constant 0 : i32
    %c0_i32_0 = arith.constant 0 : i32
    return %arg0, %c0_i32 : i32, i32
  }
}

</mosaic_0001>

<bundles_post_ra>
// kernel: _lambda_.1
= control target key start
LH: loop header
LB: loop body
LE: loop exit
PB: predicated region body
PF: predicated region fallthrough
CT: control target
= control target key end

     0   :  { %16 = vsyncpa [#allocation4], 0  ;;  %s5664_s0 = inlined_call_operand.vmem [shape: f32[2,28,28], index: 0, kind: input, shape index: {}]   ;;  %s5665_s1 = inlined_call_operand.vmem [shape: bf16[5,28,256], index: 1, kind: input, shape index: {}]   ;;  %s5666_s2 = inlined_call_operand.vmem [shape: f32[1,256], index: 2, kind: input, shape index: {}]   ;;  %s5667_s3 = inlined_call_operand.hbm [shape: bf16[5,128,256], index: 3, kind: input, shape index: {}]   ;;  %s5668_s4 = inlined_call_operand.vmem [shape: f32[1,256], index: 4, kind: input, shape index: {}]   ;;  %s5669_s5 = inlined_call_operand.hbm [shape: bf16[5,128,120], index: 5, kind: input, shape index: {}]   ;;  %s5670_s6 = inlined_call_operand.vmem [shape: f32[1,120], index: 6, kind: input, shape index: {}]   ;;  %s5671_s7 = inlined_call_operand.hbm [shape: bf16[120,128], index: 7, kind: input, shape index: {}]   ;;  %s5672_s8 = inlined_call_operand.vmem [shape: f32[1,128], index: 8, kind: input, shape index: {}]   ;;  %s5673_s9 = inlined_call_operand.vmem [shape: bf16[128,128], index: 9, kind: input, shape index: {}]   ;;  %s5674_s10 = inlined_call_operand.vmem [shape: f32[1,128], index: 10, kind: input, shape index: {}]   ;;  %s5675_s11 = inlined_call_operand.hbm [shape: f32[2,128], index: 11, kind: output, shape index: {}]  }
   0x1   :  { %17 = vsyncpa [#allocation7], 0 }
   0x2   :  { %18 = vsyncpa [#allocation5], 0  ;;  %s4635_s17 = smov [#allocation6]  }
   0x3   :  { %s44_s18 = sshll.u32 %s4635_s17, 4  ;;  %s45_s18 = int_to_ptr.vmem [resolvable:$true] %s44_s18 }
   0x4   :  { %s4557_s19 = scalar_lea.vmem %s45_s18, 5120  ;;  %p4562_p1 = scmp.lt.s32.totalorder %s45_s18, %s45_s18 }
   0x5   :  { %p4558_p0 = scmp.ne.s32.totalorder %s45_s18, %s4557_s19  ;;  %p4563_p2 = scmp.lt.s32.totalorder %s4557_s19, %s4557_s19 }
   0x7   :  { %p4564_p3 = por %p4563_p2, %p4562_p1 }
   0x9   :  { %p4565_p4 = pnand %p4564_p3, %p4558_p0 }
   0xb   :  { %4568 = shalt.err (!%p4565_p4)
}
   0xc   :  { %s4636_s20 = smov 64   ;;  %s4637_s21 = smov 4  }
   0xd   :  { %50 = dma.hbm_to_vmem [thread:$0]  %s5669_s5, 5120, %s45_s18, [#allocation7], %s4636_s20, %s4636_s20, %s4637_s21  }
   0xe   :  { %s4638_s24 = smov [#allocation3]  }
   0xf   :  { %s30_s25 = sshll.u32 %s4638_s24, 4  ;;  %s31_s25 = int_to_ptr.vmem [resolvable:$true] %s30_s25 }
  0x10   :  { %s4577_s26 = scalar_lea.vmem %s31_s25, 10240  ;;  %p4582_p6 = scmp.lt.s32.totalorder %s31_s25, %s31_s25 }
  0x11   :  { %p4578_p5 = scmp.ne.s32.totalorder %s31_s25, %s4577_s26  ;;  %p4583_p7 = scmp.lt.s32.totalorder %s4577_s26, %s4577_s26 }
  0x13   :  { %p4584_p8 = por %p4583_p7, %p4582_p6 }
  0x15   :  { %p4585_p9 = pnand %p4584_p8, %p4578_p5 }
  0x17   :  { %4588 = shalt.err (!%p4585_p9)
}
  0x18   :  { %s4639_s27 = smov 128   ;;  %s4640_s28 = smov 8  }
  0x19   :  { %36 = dma.hbm_to_vmem [thread:$0]  %s5667_s3, 10240, %s31_s25, [#allocation4], %s4639_s27, %s4639_s27, %s4640_s28  }
  0x1a   :  { %s4641_s12 = smov [#allocation8]  }
  0x1b   :  { %s58_s13 = sshll.u32 %s4641_s12, 4  ;;  %s59_s13 = int_to_ptr.vmem [resolvable:$true] %s58_s13 }
  0x1c   :  { %s4597_s5 = scalar_lea.vmem %s59_s13, 960  ;;  %p4602_p11 = scmp.lt.s32.totalorder %s59_s13, %s59_s13 }
  0x1d   :  { %p4598_p10 = scmp.ne.s32.totalorder %s59_s13, %s4597_s5  ;;  %p4603_p12 = scmp.lt.s32.totalorder %s4597_s5, %s4597_s5 }
  0x1f   :  { %p4604_p13 = por %p4603_p12, %p4602_p11 }
  0x21   :  { %p4605_p0 = pnand %p4604_p13, %p4598_p10 }
  0x23   :  { %4608 = shalt.err (!%p4605_p0)
}
  0x24   :  { %64 = dma.hbm_to_vmem [thread:$0]  %s5671_s7, 960, %s59_s13, [#allocation7], %s4636_s20, %s4636_s20, %s4637_s21  }
  0x25   :  { %4629 = dma.done.wait [#allocation4], 10240  }
  0x26   :  { %4630 = vsyncadd [#allocation4], 4294957056 }
  0x27   :  { %4631 = dma.done.wait [#allocation7], 6080  }
  0x28   :  { %4632 = vsyncadd [#allocation7], 4294961216  ;;  %vm81_vm0 = vcmask 228352   ;;  %v5680_v0 = vmov 0   ;;  %v5678_v1 = vmov 0.0   ;;  %vm222_vm1 = vcmask 1045504  }
  0x29   :  { %261 = vmatprep.mubr.bf16.mxu0 %v5680_v0  ;;  %281 = vmatprep.mubr.bf16.mxu1 %v5680_v0  ;;  %82 = vst.msk [vmem:[#allocation2] sm:$0xff] %vm81_vm0, %v5678_v1  ;;  %83 = vst.msk [vmem:[#allocation2 + $0x28] sm:$0xff] %vm81_vm0, %v5678_v1  ;;  %v4311_v2 = vld [vmem:[%s5665_s1 + $0x34] ss:$8 sps:$4 sm:$0x3f]   ;;  %v86_v8 = vld [vmem:[%s5664_s0] sm:$0xff] }
  0x2a   :  { %84 = vst.msk [vmem:[#allocation2 + $0x20] sm:$0xff] %vm81_vm0, %v5678_v1  ;;  %85 = vst.msk [vmem:[#allocation2 + $0x48] sm:$0xff] %vm81_vm0, %v5678_v1  ;;  %v4313_v3 = vld [vmem:[%s5665_s1 + $0x30] ss:$8 sps:$4 sm:$0x3f]   ;;  %4295 = vmatprep.subr.msk.bf16.mxu1 %vm222_vm1, %v4311_v2  ;;  %3899 = vmatprep.subr.msk.bf16.mxu0 %vm222_vm1, %v4311_v2  ;;  %v87_v9 = vld [vmem:[%s5664_s0 + $0x8] sm:$0xff] }
  0x2b   :  { %v4314_v4 = vld [vmem:[%s5665_s1 + $0x24] ss:$8 sps:$4 sm:$0xff]   ;;  %v224_v5 = vsel %vm222_vm1, %v4313_v3, 0  ;;  %v4316_v6 = vld [vmem:[%s5665_s1 + $0x20] ss:$8 sps:$4 sm:$0xff]   ;;  %94 = vst.msk [vmem:[#allocation2 + $0x8] sm:$0xff] %vm81_vm0, %v86_v8 }
  0x2c   :  { %v4317_v7 = vld [vmem:[%s5665_s1 + $0x14] ss:$8 sps:$4 sm:$0x3f]   ;;  %4297 = vmatpush1.bf16.msra.mxu1 %v224_v5  ;;  %242 = vmatpush1.bf16.msra.mxu0 %v224_v5  ;;  %v90_v10 = vld [vmem:[%s5664_s0 + $0x20] sm:$0xff]  ;;  %95 = vst.msk [vmem:[#allocation2 + $0x10] sm:$0xff] %vm81_vm0, %v87_v9  ;;  %v91_v11 = vld [vmem:[%s5664_s0 + $0x28] sm:$0xff] }
  0x2d   :  { %4296 = vmatprep.subr.bf16.mxu1 %v4314_v4  ;;  %243 = vmatprep.subr.bf16.mxu0 %v4314_v4  ;;  %v92_v12 = vld [vmem:[%s5664_s0 + $0x30] sm:$0xff]  ;;  %99 = vst.msk [vmem:[#allocation2 + $0x30] sm:$0xff] %vm81_vm0, %v90_v10  ;;  %100 = vst.msk [vmem:[#allocation2 + $0x38] sm:$0xff] %vm81_vm0, %v91_v11  ;;  %vm97_vm2 = vcmask 224256   ;;  %v89_v15 = vld [vmem:[%s5664_s0 + $0x18] sm:$0xf] }
  0x2e   :  { %101 = vst.msk [vmem:[#allocation2 + $0x40] sm:$0xff] %vm81_vm0, %v92_v12  ;;  %v4323_v13 = vld [vmem:[%s5665_s1 + $0x54] ss:$8 sps:$4 sm:$0x3f]   ;;  %v93_v16 = vld [vmem:[%s5664_s0 + $0x38] sm:$0xf] }
  0x2f   :  { %v88_v14 = vld [vmem:[%s5664_s0 + $0x10] sm:$0xff]  ;;  %98 = vst.msk [vmem:[#allocation2 + $0x20] sm:$0xf] %vm97_vm2, %v89_v15  ;;  %102 = vst.msk [vmem:[#allocation2 + $0x48] sm:$0xf] %vm97_vm2, %v93_v16  ;;  %vm1365_vm3 = vcmask 1041408  }
  0x30   :  { %4298 = vmatpush1.bf16.msra.mxu1 %v4316_v6  ;;  %244 = vmatpush1.bf16.msra.mxu0 %v4316_v6  ;;  %96 = vst.msk [vmem:[#allocation2 + $0x18] sm:$0xff] %vm81_vm0, %v88_v14  ;;  %v145_v17 = vld [vmem:[%s5665_s1 + $0x10] sm:$0xff]  ;;  %v146_v18 = vld [vmem:[%s5665_s1 + $0x18] sm:$0x33]  ;;  %v4328_v43 = vld [vmem:[%s5665_s1 + $0x4] ss:$8 sps:$4 sm:$0xff]  }
  0x31   :  { %3908 = vmatprep.subr.msk.bf16.mxu1 %vm222_vm1, %v4317_v7  ;;  %3921 = vmatprep.subr.msk.bf16.mxu0 %vm222_vm1, %v4323_v13  ;;  %v4325_v27 = vld [vmem:[%s5665_s1 + $0x50] ss:$8 sps:$4 sm:$0x3f]   ;;  %v3906_v29 = vcombine.low %v145_v17, %v146_v18  ;;  %v4326_v44 = vld [vmem:[%s5665_s1] ss:$8 sps:$4 sm:$0xff]   ;;  %vm1881_vm4 = vcmask 1041409  }
  0x32   :  { %v147_v19 = vld [vmem:[#allocation2 + $0x7] sm:$0xff]  ;;  %v483_v37 = vsel %vm222_vm1, %v4325_v27, 0  ;;  %v4340_v54 = vld [vmem:[%s5665_s1 + $0x94] ss:$8 sps:$4 sm:$0x3f]   ;;  %vm1883_vm5 = vcmask 1042434  }
  0x33   :  { %v148_v20 = vld [vmem:[#allocation2 + $0xf] sm:$0xff]  ;;  %v163_v22 = vcombine.high %v147_v19, %v147_v19  ;;  %v331_v42 = vsel %vm222_vm1, %v3906_v29, 0  ;;  %v4330_v47 = vld [vmem:[%s5665_s1 + $0x40] ss:$8 sps:$4 sm:$0xff]   ;;  %vm1885_vm6 = vcmask 1043459   ;;  %vm1887_vm7 = vcmask 1044484  }
  0x34   :  { %v151_v21 = vld [vmem:[#allocation2 + $0x2f] sm:$0xff]  ;;  %v164_v23 = vcombine.high %v148_v20, %v148_v20  ;;  %v152_v24 = vld [vmem:[#allocation2 + $0x37] sm:$0xff]  ;;  %v103_v52 = vld [vmem:[#allocation2 + $0x6] sm:$0xff]  ;;  %vm1889_vm8 = vcmask 1045509   ;;  %vm1891_vm9 = vcmask 1046534   ;;  %vm1893_vm10 = vcmask 1047559  }
  0x35   :  { %v153_v25 = vld [vmem:[#allocation2 + $0x3f] sm:$0xff]  ;;  %v166_v26 = vcombine.high %v151_v21, %v151_v21  ;;  %v167_v28 = vcombine.high %v152_v24, %v152_v24  ;;  %v169_v30 = vcombine.low %v147_v19, %v163_v22  ;;  %v407_v50 = vld [vmem:[#allocation2 + $0x8] sm:$0xff]  ;;  %v408_v51 = vld [vmem:[#allocation2 + $0x10] sm:$0xff]  ;;  %v119_v60 = vcombine.high %v103_v52, %v103_v52 }
  0x36   :  { %v170_v31 = vcombine.low %v148_v20, %v164_v23  ;;  %v168_v35 = vcombine.high %v153_v25, %v153_v25  ;;  %v154_v40 = vld [vmem:[#allocation2 + $0x47] sm:$0xf]  ;;  %v104_v53 = vld [vmem:[#allocation2 + $0xe] sm:$0xff]  ;;  %v423_v57 = vcombine.high %v407_v50, %v407_v50  ;;  %v424_v58 = vcombine.high %v408_v51, %v408_v51  ;;  %v410_v8 = vld [vmem:[#allocation2 + $0x20] sm:$0xf] }
  0x37   :  { %v173_v32 = vcombine.low %v166_v26, %v152_v24  ;;  %v174_v33 = vcombine.low %v167_v28, %v153_v25  ;;  %v149_v34 = vld [vmem:[#allocation2 + $0x17] sm:$0xff]  ;;  %v150_v38 = vld [vmem:[#allocation2 + $0x1f] sm:$0xf]  ;;  %v4332_v48 = vld [vmem:[%s5665_s1 + $0x44] ss:$8 sps:$4 sm:$0xff]   ;;  %v120_v61 = vcombine.high %v104_v53, %v104_v53  ;;  %v125_v2 = vcombine.low %v103_v52, %v119_v60 }
  0x38   :  { %v183_v36 = vpack.c.bf16 %v170_v31, %v169_v30  ;;  %v165_v39 = vcombine.high %v149_v34, %v149_v34  ;;  %v172_v46 = vcombine.low %v150_v38, %v151_v21  ;;  %v175_v49 = vcombine.low %v168_v35, %v154_v40  ;;  %v4333_v55 = vld [vmem:[%s5665_s1 + $0x74] ss:$8 sps:$4 sm:$0x3f]   ;;  %v4339_v4 = vld [vmem:[%s5665_s1 + $0x70] ss:$8 sps:$4 sm:$0x3f]  }
  0x39   :  { %v185_v41 = vpack.c.bf16 %v174_v33, %v173_v32  ;;  %v429_v62 = vcombine.low %v407_v50, %v423_v57  ;;  %v430_v63 = vcombine.low %v408_v51, %v424_v58  ;;  %v126_v3 = vcombine.low %v104_v53, %v120_v61  ;;  %v409_v5 = vld [vmem:[#allocation2 + $0x18] sm:$0xff]  ;;  %v411_v9 = vld [vmem:[#allocation2 + $0x30] sm:$0xff]  ;;  %v4349_v16 = vld [vmem:[%s5665_s1 + $0x64] ss:$8 sps:$4 sm:$0xff]  }
  0x3a   :  { %3900 = vmatmul.mubr.msk.bf16.vlgmr.msra.gmra.mxu0 %vm81_vm0, %v183_v36  ;;  %v171_v45 = vcombine.low %v149_v34, %v165_v39  ;;  %v186_v59 = vpack.c.bf16 %v175_v49, %v175_v49  ;;  %v4342_v6 = vld [vmem:[%s5665_s1 + $0x90] ss:$8 sps:$4 sm:$0x3f]   ;;  %v106_v11 = vld [vmem:[#allocation2 + $0x1e] sm:$0xf]  ;;  %v425_v13 = vcombine.high %v409_v5, %v409_v5  ;;  %v649_v19 = vsel %vm222_vm1, %v4339_v4, 0 }
  0x3b   :  { %3902 = vmatmul.mubr.msk.bf16.vlgmr.msra.gmra.mxu1 %vm81_vm0, %v185_v41  ;;  %501 = vmatpush1.bf16.msra.mxu0 %v483_v37  ;;  %v105_v7 = vld [vmem:[#allocation2 + $0x16] sm:$0xff]  ;;  %v443_v10 = vpack.c.bf16 %v430_v63, %v429_v62  ;;  %v107_v12 = vld [vmem:[#allocation2 + $0x2e] sm:$0xff]  ;;  %v139_v14 = vpack.c.bf16 %v126_v3, %v125_v2  ;;  %v815_v17 = vsel %vm222_vm1, %v4342_v6, 0  ;;  %v4354_v21 = vld [vmem:[%s5665_s1 + $0x80] ss:$8 sps:$4 sm:$0xff]   ;;  %v432_v23 = vcombine.low %v410_v8, %v411_v9 }
  0x3c   :  { %349 = vmatpush1.bf16.msra.mxu1 %v331_v42  ;;  %271 = vmatprep.mubr.bf16.mxu0 %v5680_v0  ;;  %v184_v56 = vpack.c.bf16 %v172_v46, %v171_v45  ;;  %v121_v15 = vcombine.high %v105_v7, %v105_v7  ;;  %v4356_v18 = vld [vmem:[%s5665_s1 + $0x84] ss:$8 sps:$4 sm:$0xff]   ;;  %v412_v20 = vld [vmem:[#allocation2 + $0x38] sm:$0xff]  ;;  %v431_v22 = vcombine.low %v409_v5, %v425_v13  ;;  %v4347_v24 = vld [vmem:[%s5665_s1 + $0x60] ss:$8 sps:$4 sm:$0xff]   ;;  %vm4645_vm11 = vmmov 0  }
  0x3d   :  { %291 = vmatprep.mubr.bf16.mxu1 %v5680_v0  ;;  %350 = vmatprep.subr.bf16.mxu1 %v4328_v43  ;;  %v108_v25 = vld [vmem:[#allocation2 + $0x36] sm:$0xff]  ;;  %v128_v27 = vcombine.low %v106_v11, %v107_v12  ;;  %v413_v28 = vld [vmem:[#allocation2 + $0x40] sm:$0xff]  ;;  %v426_v31 = vcombine.high %v411_v9, %v411_v9  ;;  %v427_v32 = vcombine.high %v412_v20, %v412_v20  ;;  %v414_v40 = vld [vmem:[#allocation2 + $0x48] sm:$0xf]  ;;  %vm3717_vm12 = vcmask 1043456  }
  0x3e   :  { %502 = vmatprep.subr.bf16.mxu0 %v4332_v48  ;;  %v127_v26 = vcombine.low %v105_v7, %v121_v15  ;;  %v444_v29 = vpack.c.bf16 %v432_v23, %v431_v22  ;;  %v109_v30 = vld [vmem:[#allocation2 + $0x3e] sm:$0xff]  ;;  %v122_v34 = vcombine.high %v107_v12, %v107_v12  ;;  %v123_v35 = vcombine.high %v108_v25, %v108_v25  ;;  %v110_v42 = vld [vmem:[#allocation2 + $0x46] sm:$0xf]  ;;  %v739_v46 = vld [vmem:[#allocation2 + $0xa] sm:$0xff] }
  0x3f   :  { %503 = vmatpush1.bf16.msra.mxu0 %v4330_v47  ;;  %v433_v36 = vcombine.low %v426_v31, %v412_v20  ;;  %v434_v37 = vcombine.low %v427_v32, %v413_v28  ;;  %v428_v43 = vcombine.high %v413_v28, %v413_v28  ;;  %v124_v45 = vcombine.high %v109_v30, %v109_v30  ;;  %v740_v47 = vld [vmem:[#allocation2 + $0x12] sm:$0xff]  ;;  %v573_v49 = vld [vmem:[#allocation2 + $0x9] sm:$0xff]  ;;  %v741_v58 = vld [vmem:[#allocation2 + $0x1a] sm:$0xff] }
  0x40   :  { %351 = vmatpush1.bf16.msra.mxu1 %v4326_v44  ;;  %3947 = vmatprep.subr.msk.bf16.mxu0 %vm222_vm1, %v4340_v54  ;;  %v140_v33 = vpack.c.bf16 %v128_v27, %v127_v26  ;;  %v129_v38 = vcombine.low %v122_v34, %v108_v25  ;;  %v130_v39 = vcombine.low %v123_v35, %v109_v30  ;;  %v574_v50 = vld [vmem:[#allocation2 + $0x11] sm:$0xff]  ;;  %v575_v61 = vld [vmem:[#allocation2 + $0x19] sm:$0xff]  ;;  %v742_v2 = vld [vmem:[#allocation2 + $0x22] sm:$0xf]  ;;  %vm3713_vm13 = vcmask 982016  }
  0x41   :  { %3934 = vmatprep.subr.msk.bf16.mxu1 %vm222_vm1, %v4333_v55  ;;  %v445_v41 = vpack.c.bf16 %v434_v37, %v433_v36  ;;  %v435_v48 = vcombine.low %v428_v43, %v414_v40  ;;  %v131_v51 = vcombine.low %v124_v45, %v110_v42  ;;  %v755_v53 = vcombine.high %v739_v46, %v739_v46  ;;  %v743_v3 = vld [vmem:[#allocation2 + $0x32] sm:$0xff]  ;;  %v576_v5 = vld [vmem:[#allocation2 + $0x21] sm:$0xf]  ;;  %v746_v28 = vld [vmem:[#allocation2 + $0x4a] sm:$0xf] }
  0x42   :  { %3901 = vmatmul.mubr.msk.bf16.gmra.mxu0 %vm81_vm0, %v184_v56  ;;  %v141_v44 = vpack.c.bf16 %v130_v39, %v129_v38  ;;  %v756_v54 = vcombine.high %v740_v47, %v740_v47  ;;  %v589_v56 = vcombine.high %v573_v49, %v573_v49  ;;  %v590_v57 = vcombine.high %v574_v50, %v574_v50  ;;  %v577_v6 = vld [vmem:[#allocation2 + $0x31] sm:$0xff]  ;;  %v578_v13 = vld [vmem:[#allocation2 + $0x39] sm:$0xff]  ;;  %v580_v30 = vld [vmem:[#allocation2 + $0x49] sm:$0xf] }
  0x43   :  { %3903 = vmatmul.mubr.msk.bf16.gmra.mxu1 %vm81_vm0, %v186_v59  ;;  %520 = vmatprep.mubr.bf16.mxu0 %v5680_v0  ;;  %v446_v52 = vpack.c.bf16 %v435_v48, %v435_v48  ;;  %v142_v55 = vpack.c.bf16 %v131_v51, %v131_v51  ;;  %v761_v59 = vcombine.low %v739_v46, %v755_v53 }
  0x44   :  { %368 = vmatprep.mubr.bf16.mxu1 %v5680_v0  ;;  %v762_v60 = vcombine.low %v740_v47, %v756_v54  ;;  %v595_v62 = vcombine.low %v573_v49, %v589_v56  ;;  %v596_v63 = vcombine.low %v574_v50, %v590_v57  ;;  %v757_v7 = vcombine.high %v741_v58, %v741_v58 }
  0x45   :  { %v591_v9 = vcombine.high %v575_v61, %v575_v61  ;;  %v764_v12 = vcombine.low %v742_v2, %v743_v3  ;;  %v598_v15 = vcombine.low %v576_v5, %v577_v6  ;;  %v592_v22 = vcombine.high %v577_v6, %v577_v6 }
  0x46   :  { %v775_v4 = vpack.c.bf16 %v762_v60, %v761_v59  ;;  %v609_v8 = vpack.c.bf16 %v596_v63, %v595_v62  ;;  %v763_v11 = vcombine.low %v741_v58, %v757_v7  ;;  %v593_v23 = vcombine.high %v578_v13, %v578_v13 }
  0x47   :  { %v599_v26 = vcombine.low %v592_v22, %v578_v13 }
  0x4a   :  { %3922 = vmatmul.mubr.msk.bf16.vlgmr.msra.gmra.mxu0 %vm81_vm0, %v443_v10  ;;  %v744_v10 = vld [vmem:[#allocation2 + $0x3a] sm:$0xff] }
  0x4b   :  { %3909 = vmatmul.mubr.msk.bf16.vlgmr.msra.gmra.mxu1 %vm81_vm0, %v139_v14  ;;  %833 = vmatpush1.bf16.msra.mxu0 %v815_v17  ;;  %v597_v14 = vcombine.low %v575_v61, %v591_v9  ;;  %v776_v17 = vpack.c.bf16 %v764_v12, %v763_v11  ;;  %v759_v20 = vcombine.high %v744_v10, %v744_v10 }
  0x4c   :  { %667 = vmatpush1.bf16.msra.mxu1 %v649_v19  ;;  %378 = vmatprep.mubr.bf16.mxu1 %v5680_v0  ;;  %v758_v19 = vcombine.high %v743_v3, %v743_v3 }
  0x4d   :  { %530 = vmatprep.mubr.bf16.mxu0 %v5680_v0  ;;  %668 = vmatprep.subr.bf16.mxu1 %v4349_v16  ;;  %v745_v16 = vld [vmem:[#allocation2 + $0x42] sm:$0xff] }
  0x4e   :  { %834 = vmatprep.subr.bf16.mxu0 %v4356_v18  ;;  %v579_v18 = vld [vmem:[#allocation2 + $0x41] sm:$0xff]  ;;  %v766_v25 = vcombine.low %v759_v20, %v745_v16  ;;  %v760_v31 = vcombine.high %v745_v16, %v745_v16 }
  0x4f   :  { %835 = vmatpush1.bf16.msra.mxu0 %v4354_v21  ;;  %v610_v21 = vpack.c.bf16 %v598_v15, %v597_v14  ;;  %v600_v27 = vcombine.low %v593_v23, %v579_v18 }
  0x50   :  { %669 = vmatpush1.bf16.msra.mxu1 %v4347_v24  ;;  %v765_v24 = vcombine.low %v758_v19, %v744_v10  ;;  %v767_v34 = vcombine.low %v760_v31, %v746_v28 }
  0x51   :  { %v611_v32 = vpack.c.bf16 %v600_v27, %v599_v26 }
  0x52   :  { %3923 = vmatmul.mubr.msk.bf16.gmra.mxu0 %vm81_vm0, %v444_v29  ;;  %v777_v29 = vpack.c.bf16 %v766_v25, %v765_v24  ;;  %v778_v36 = vpack.c.bf16 %v767_v34, %v767_v34 }
  0x53   :  { %3910 = vmatmul.mubr.msk.bf16.gmra.mxu1 %vm81_vm0, %v140_v33  ;;  %540 = vmatprep.mubr.bf16.mxu0 %v5680_v0  ;;  %v594_v33 = vcombine.high %v579_v18, %v579_v18 }
  0x54   :  { %388 = vmatprep.mubr.bf16.mxu1 %v5680_v0 }
  0x55   :  { %v601_v35 = vcombine.low %v594_v33, %v580_v30 }
  0x57   :  { %v612_v37 = vpack.c.bf16 %v601_v35, %v601_v35 }
  0x5a   :  { %3924 = vmatmul.mubr.msk.bf16.gmra.mxu0 %vm81_vm0, %v445_v41 }
  0x5b   :  { %3911 = vmatmul.mubr.msk.bf16.gmra.mxu1 %vm81_vm0, %v141_v44  ;;  %550 = vmatprep.mubr.bf16.mxu0 %v5680_v0 }
  0x5c   :  { %398 = vmatprep.mubr.bf16.mxu1 %v5680_v0 }
  0x62   :  { %3925 = vmatmul.mubr.msk.bf16.gmra.mxu0 %vm81_vm0, %v446_v52 }
  0x63   :  { %3912 = vmatmul.mubr.msk.bf16.gmra.mxu1 %vm81_vm0, %v142_v55  ;;  %852 = vmatprep.mubr.bf16.mxu0 %v5680_v0 }
  0x64   :  { %686 = vmatprep.mubr.bf16.mxu1 %v5680_v0 }
  0x6a   :  { %3948 = vmatmul.mubr.msk.bf16.vlgmr.msra.gmra.mxu0 %vm81_vm0, %v775_v4 }
  0x6b   :  { %3935 = vmatmul.mubr.msk.bf16.vlgmr.msra.gmra.mxu1 %vm81_vm0, %v609_v8  ;;  %862 = vmatprep.mubr.bf16.mxu0 %v5680_v0 }
  0x6c   :  { %696 = vmatprep.mubr.bf16.mxu1 %v5680_v0 }
  0x72   :  { %3949 = vmatmul.mubr.msk.bf16.gmra.mxu0 %vm81_vm0, %v776_v17 }
  0x73   :  { %3936 = vmatmul.mubr.msk.bf16.gmra.mxu1 %vm81_vm0, %v610_v21  ;;  %872 = vmatprep.mubr.bf16.mxu0 %v5680_v0 }
  0x74   :  { %706 = vmatprep.mubr.bf16.mxu1 %v5680_v0 }
  0x7a   :  { %3950 = vmatmul.mubr.msk.bf16.gmra.mxu0 %vm81_vm0, %v777_v29 }
  0x7b   :  { %3937 = vmatmul.mubr.msk.bf16.gmra.mxu1 %vm81_vm0, %v611_v32  ;;  %882 = vmatprep.mubr.bf16.mxu0 %v5680_v0 }
  0x7c   :  { %716 = vmatprep.mubr.bf16.mxu1 %v5680_v0 }
  0x82   :  { %3951 = vmatmul.mubr.msk.bf16.gmra.mxu0 %vm81_vm0, %v778_v36  ;;  %v907_v36 = vlaneseq }
  0x83   :  { %3938 = vmatmul.mubr.msk.bf16.gmra.mxu1 %vm81_vm0, %v612_v37  ;;  %2177 = vmatprep.mubr.bf16.mxu0 %v5680_v0 }
  0x84   :  { %2021 = vmatprep.mubr.bf16.mxu1 %v5680_v0 }
  0xfa   :  { %v263_v38 = vpop.f32.mrf.mxu0 }
  0xfb   :  { %v283_v39 = vpop.f32.mrf.mxu1 }
  0xfc   :  { %v265_v40 = vpop.f32.mrf.mxu0 }
  0xfd   :  { %v285_v41 = vpop.f32.mrf.mxu1 }
  0xfe   :  { %v267_v42 = vpop.f32.mrf.mxu0 }
  0xff   :  { %v287_v43 = vpop.f32.mrf.mxu1 }
 0x100   :  { %v269_v44 = vpop.f32.mrf.mxu0 }
 0x101   :  { %v289_v45 = vpop.f32.mrf.mxu1 }
 0x102   :  { %v273_v46 = vpop.f32.mrf.mxu0 }
 0x103   :  { %v293_v47 = vpop.f32.mrf.mxu1 }
 0x104   :  { %v275_v48 = vpop.f32.mrf.mxu0 }
 0x105   :  { %v295_v49 = vpop.f32.mrf.mxu1 }
 0x106   :  { %v277_v50 = vpop.f32.mrf.mxu0 }
 0x107   :  { %v297_v51 = vpop.f32.mrf.mxu1 }
 0x108   :  { %v279_v52 = vpop.f32.mrf.mxu0 }
 0x109   :  { %v298_v53 = vpop.f32.mrf.mxu1 }
 0x10a   :  { %v522_v54 = vpop.f32.mrf.mxu0 }
 0x10b   :  { %v370_v55 = vpop.f32.mrf.mxu1 }
 0x10c   :  { %v371_v56 = vadd.f32 %v370_v55, %v263_v38  ;;  %v524_v57 = vpop.f32.mrf.mxu0 }
 0x10d   :  { %v372_v58 = vpop.f32.mrf.mxu1 }
 0x10e   :  { %v4870_v59 = vadd.f32 %v522_v54, %v371_v56  ;;  %v373_v60 = vadd.f32 %v372_v58, %v265_v40  ;;  %v526_v61 = vpop.f32.mrf.mxu0 }
 0x10f   :  { %v374_v62 = vpop.f32.mrf.mxu1 }
 0x110   :  { %v4872_v63 = vadd.f32 %v524_v57, %v373_v60  ;;  %v375_v2 = vadd.f32 %v374_v62, %v267_v42  ;;  %v528_v3 = vpop.f32.mrf.mxu0  ;;  %v905_v57 = vld [vmem:[%s5666_s2] sm:$0x3] }
 0x111   :  { %v376_v4 = vpop.f32.mrf.mxu1 }
 0x112   :  { %v4874_v5 = vadd.f32 %v526_v61, %v375_v2  ;;  %v377_v6 = vadd.f32 %v376_v4, %v269_v44  ;;  %v532_v7 = vpop.f32.mrf.mxu0  ;;  %v4644_v61 = vmov 1983009808  }
 0x113   :  { %v380_v8 = vpop.f32.mrf.mxu1  ;;  %v962_v62 = vunpack.c.l.s4 %v4644_v61  ;;  %v4373_v61 = vld [vmem:[#allocation3 + $0x70] ss:$8 sps:$4 sm:$0xff]  }
 0x114   :  { %v4876_v9 = vadd.f32 %v528_v3, %v377_v6  ;;  %v381_v10 = vadd.f32 %v380_v8, %v273_v46  ;;  %v534_v11 = vpop.f32.mrf.mxu0 }
 0x115   :  { %v382_v12 = vpop.f32.mrf.mxu1 }
 0x116   :  { %v4878_v13 = vadd.f32 %v532_v7, %v381_v10  ;;  %v383_v14 = vadd.f32 %v382_v12, %v275_v48  ;;  %v536_v15 = vpop.f32.mrf.mxu0 }
 0x117   :  { %v384_v16 = vpop.f32.mrf.mxu1 }
 0x118   :  { %v4880_v17 = vadd.f32 %v534_v11, %v383_v14  ;;  %v385_v18 = vadd.f32 %v384_v16, %v277_v50  ;;  %v538_v19 = vpop.f32.mrf.mxu0  ;;  %v4894_v50 = vshrl.u32 %v907_v36, 7  ;;  %v963_v11 = vunpack.c.0.s8 %v962_v62  ;;  %v4378_v62 = vld [vmem:[#allocation3 + $0xf4] ss:$8 sps:$4 sm:$0xff]  }
 0x119   :  { %v386_v20 = vpop.f32.mrf.mxu1  ;;  %1989 = vmatprep.subr.bf16.mxu1 %v4378_v62 }
 0x11a   :  { %v4882_v21 = vadd.f32 %v536_v15, %v385_v18  ;;  %v387_v22 = vadd.f32 %v386_v20, %v279_v52  ;;  %v542_v23 = vpop.f32.mrf.mxu0  ;;  %5684 = vst [vmem:[#allocation13_spill] sm:$0xff] %v4894_v50  ;;  %v5677_v56 = vsub.s32 0, %v4894_v50  ;;  %v5676_v58 = vsub.s32 1, %v4894_v50 }
 0x11b   :  { %v390_v24 = vpop.f32.mrf.mxu1 }
 0x11c   :  { %v4884_v25 = vadd.f32 %v538_v19, %v387_v22  ;;  %v391_v26 = vadd.f32 %v390_v24, %v283_v39  ;;  %v544_v27 = vpop.f32.mrf.mxu0  ;;  %v4908_v2 = vrot.slane %v905_v57, %v5677_v56  ;;  %v4913_v8 = vrot.slane %v905_v57, %v5676_v58 }
 0x11d   :  { %v392_v28 = vpop.f32.mrf.mxu1 }
 0x11e   :  { %v4886_v29 = vadd.f32 %v542_v23, %v391_v26  ;;  %v393_v30 = vadd.f32 %v392_v28, %v285_v41  ;;  %v546_v31 = vpop.f32.mrf.mxu0  ;;  %v4920_v23 = vsub.s32 %v963_v11, %v4894_v50 }
 0x11f   :  { %v394_v32 = vpop.f32.mrf.mxu1 }
 0x120   :  { %v4888_v33 = vadd.f32 %v544_v27, %v393_v30  ;;  %v395_v34 = vadd.f32 %v394_v32, %v287_v43  ;;  %v548_v35 = vpop.f32.mrf.mxu0 }
 0x121   :  { %v396_v37 = vpop.f32.mrf.mxu1 }
 0x122   :  { %v4890_v38 = vadd.f32 %v546_v31, %v395_v34  ;;  %v397_v40 = vadd.f32 %v396_v37, %v289_v45  ;;  %v552_v42 = vpop.f32.mrf.mxu0 }
 0x123   :  { %v400_v44 = vpop.f32.mrf.mxu1 }
 0x124   :  { %v4892_v46 = vadd.f32 %v548_v35, %v397_v40  ;;  %v401_v39 = vadd.f32 %v400_v44, %v293_v47  ;;  %v554_v48 = vpop.f32.mrf.mxu0 }
 0x125   :  { %v402_v41 = vpop.f32.mrf.mxu1 }
 0x126   :  { %v4896_v51 = vadd.f32 %v552_v42, %v401_v39  ;;  %v403_v52 = vadd.f32 %v402_v41, %v295_v49  ;;  %v556_v53 = vpop.f32.mrf.mxu0 }
 0x127   :  { %v404_v43 = vpop.f32.mrf.mxu1 }
 0x128   :  { %v4898_v54 = vadd.f32 %v554_v48, %v403_v52  ;;  %v557_v55 = vpop.f32.mrf.mxu0 }
 0x129   :  { %v405_v45 = vpop.f32.mrf.mxu1 }
 0x12a   :  { %v854_v47 = vpop.f32.mrf.mxu0 }
 0x12b   :  { %v688_v60 = vpop.f32.mrf.mxu1 }
 0x12c   :  { %v725_v49 = vadd.f32 %v688_v60, %v4870_v59  ;;  %v856_v3 = vpop.f32.mrf.mxu0 }
 0x12d   :  { %v690_v4 = vpop.f32.mrf.mxu1 }
 0x12e   :  { %v891_v6 = vadd.f32 %v854_v47, %v725_v49  ;;  %v726_v7 = vadd.f32 %v690_v4, %v4872_v63  ;;  %v858_v10 = vpop.f32.mrf.mxu0 }
 0x12f   :  { %v692_v12 = vpop.f32.mrf.mxu1 }
 0x130   :  { %v917_v14 = vadd.f32 %v4908_v2, %v891_v6  ;;  %v892_v15 = vadd.f32 %v856_v3, %v726_v7  ;;  %v727_v59 = vadd.f32 %v692_v12, %v4874_v5  ;;  %v860_v16 = vpop.f32.mrf.mxu0  ;;  %v4376_v7 = vld [vmem:[#allocation3 + $0xf0] ss:$8 sps:$4 sm:$0xff]  }
 0x131   :  { %v694_v18 = vpop.f32.mrf.mxu1  ;;  %1990 = vmatpush1.bf16.msra.mxu1 %v4376_v7 }
 0x132   :  { %v918_v19 = vadd.f32 %v4913_v8, %v892_v15  ;;  %v893_v20 = vadd.f32 %v858_v10, %v727_v59  ;;  %v728_v22 = vadd.f32 %v694_v18, %v4876_v9  ;;  %v864_v63 = vpop.f32.mrf.mxu0  ;;  %v931_v26 = vmax.f32 %v917_v14, 0.0 }
 0x133   :  { %v698_v24 = vpop.f32.mrf.mxu1 }
 0x134   :  { %v932_v27 = vmax.f32 %v918_v19, 0.0  ;;  %v894_v28 = vadd.f32 %v860_v16, %v728_v22  ;;  %v729_v30 = vadd.f32 %v698_v24, %v4878_v13  ;;  %v866_v31 = vpop.f32.mrf.mxu0  ;;  %v919_v5 = vadd.f32 %v4908_v2, %v893_v20  ;;  %v4381_v22 = vld [vmem:[#allocation3 + $0x64] ss:$8 sps:$4 sm:$0xff]  }
 0x135   :  { %v700_v32 = vpop.f32.mrf.mxu1 }
 0x136   :  { %v959_v34 = vcombine.low %v931_v26, %v932_v27  ;;  %v960_v35 = vcombine.high %v931_v26, %v932_v27  ;;  %v920_v36 = vadd.f32 %v4913_v8, %v894_v28  ;;  %v4925_v37 = vpop.f32.mrf.mxu0  ;;  %v895_v9 = vadd.f32 %v864_v63, %v729_v30  ;;  %v4379_v30 = vld [vmem:[#allocation3 + $0x60] ss:$8 sps:$4 sm:$0xff]  }
 0x137   :  { %v730_v40 = vadd.f32 %v700_v32, %v4880_v17  ;;  %v702_v42 = vpop.f32.mrf.mxu1  ;;  %v933_v52 = vmax.f32 %v919_v5, 0.0  ;;  %v4375_v17 = vld [vmem:[#allocation3 + $0x74] ss:$8 sps:$4 sm:$0xff]  }
 0x138   :  { %v967_v44 = vrot.slane %v959_v34, %v4920_v23  ;;  %v974_v39 = vrot.slane %v960_v35, %v4920_v23  ;;  %v934_v48 = vmax.f32 %v920_v36, 0.0  ;;  %v4931_v13 = vadd.f32 %v702_v42, %v4882_v21  ;;  %v4933_v41 = vpop.f32.mrf.mxu0  ;;  %2145 = vmatprep.subr.bf16.mxu0 %v4375_v17 }
 0x139   :  { %v4936_v53 = vadd.f32 %v4908_v2, %v895_v9  ;;  %v4938_v43 = vadd.f32 %v866_v31, %v730_v40  ;;  %v4940_v55 = vpop.f32.mrf.mxu1  ;;  %2146 = vmatpush1.bf16.msra.mxu0 %v4373_v61  ;;  %v4384_v31 = vld [vmem:[#allocation3 + $0xe4] ss:$8 sps:$4 sm:$0xff]   ;;  %v4382_v9 = vld [vmem:[#allocation3 + $0xe0] ss:$8 sps:$4 sm:$0xff]  }
 0x13a   :  { %v975_v45 = vcombine.high %v967_v44, %v967_v44  ;;  %v976_v57 = vcombine.high %v974_v39, %v974_v39  ;;  %v1091_v47 = vrot.slane %v967_v44, %v4920_v23  ;;  %v1107_v60 = vrot.slane %v974_v39, %v4920_v23  ;;  %v4944_v21 = vpop.f32.mrf.mxu0  ;;  %2147 = vmatprep.subr.bf16.mxu0 %v4381_v22 }
 0x13b   :  { %v977_v49 = vcombine.low %v933_v52, %v934_v48  ;;  %v978_v3 = vcombine.high %v933_v52, %v934_v48  ;;  %v4947_v6 = vpop.f32.mrf.mxu1  ;;  %1991 = vmatprep.subr.bf16.mxu1 %v4384_v31 }
 0x13c   :  { %v1092_v10 = vcombine.high %v1091_v47, %v1091_v47  ;;  %v1099_v11 = vrot.slane %v975_v45, %v4920_v23  ;;  %v1108_v12 = vcombine.high %v1107_v60, %v1107_v60  ;;  %v1115_v14 = vrot.slane %v976_v57, %v4920_v23  ;;  %v4951_v15 = vpop.f32.mrf.mxu0  ;;  %1992 = vmatpush1.bf16.msra.mxu1 %v4382_v9 }
 0x13d   :  { %v1366_v59 = vsel %vm1365_vm3, %v1091_v47, -inf  ;;  %v1394_v16 = vsel %vm1365_vm3, %v1107_v60, -inf  ;;  %v4956_v18 = vrot.slane %v977_v49, %v4920_v23  ;;  %v4959_v19 = vrot.slane %v978_v3, %v4920_v23  ;;  %v4961_v20 = vpop.f32.mrf.mxu1  ;;  %2148 = vmatpush1.bf16.msra.mxu0 %v4379_v30  ;;  %v4387_v60 = vld [vmem:[#allocation3 + $0x54] ss:$8 sps:$4 sm:$0xff]  }
 0x13e   :  { %v1100_v63 = vcombine.high %v1099_v11, %v1099_v11  ;;  %v1116_v24 = vcombine.high %v1115_v14, %v1115_v14  ;;  %v1367_v26 = vrot.slane %v1366_v59, 4  ;;  %v1373_v27 = vsel %vm1365_vm3, %v1092_v10, -inf  ;;  %v4964_v28 = vpop.f32.mrf.mxu0  ;;  %v4385_v10 = vld [vmem:[#allocation3 + $0x50] ss:$8 sps:$4 sm:$0xff]   ;;  %2149 = vmatprep.subr.bf16.mxu0 %v4387_v60 }
 0x13f   :  { %v1374_v5 = vrot.slane %v1373_v27, 4  ;;  %v1380_v32 = vsel %vm1365_vm3, %v1099_v11, -inf  ;;  %v1395_v34 = vrot.slane %v1394_v16, 4  ;;  %v1401_v35 = vsel %vm1365_vm3, %v1108_v12, -inf  ;;  %v4968_v36 = vpop.f32.mrf.mxu1  ;;  %v4390_v11 = vld [vmem:[#allocation3 + $0xd4] ss:$8 sps:$4 sm:$0xff]  }
 0x140   :  { %v1368_v40 = vmax.f32 %v1366_v59, %v1367_v26  ;;  %v1381_v42 = vrot.slane %v1380_v32, 4  ;;  %v1387_v44 = vsel %vm1365_vm3, %v1100_v63, -inf  ;;  %v1402_v39 = vrot.slane %v1401_v35, 4  ;;  %v4971_v48 = vpop.f32.mrf.mxu0  ;;  %1993 = vmatprep.subr.bf16.mxu1 %v4390_v11 }
 0x141   :  { %v1375_v52 = vmax.f32 %v1373_v27, %v1374_v5  ;;  %v1388_v17 = vrot.slane %v1387_v44, 4  ;;  %v1396_v45 = vmax.f32 %v1394_v16, %v1395_v34  ;;  %v1408_v57 = vsel %vm1365_vm3, %v1115_v14, -inf  ;;  %v4974_v47 = vpop.f32.mrf.mxu1  ;;  %v4388_v14 = vld [vmem:[#allocation3 + $0xd0] ss:$8 sps:$4 sm:$0xff]   ;;  %2150 = vmatpush1.bf16.msra.mxu0 %v4385_v10 }
 0x142   :  { %v1369_v61 = vrot.slane %v1368_v40, 2  ;;  %v1382_v62 = vmax.f32 %v1380_v32, %v1381_v42  ;;  %v1403_v49 = vmax.f32 %v1401_v35, %v1402_v39  ;;  %v1409_v3 = vrot.slane %v1408_v57, 4  ;;  %v4976_v7 = vpop.f32.mrf.mxu0  ;;  %1994 = vmatpush1.bf16.msra.mxu1 %v4388_v14 }
 0x143   :  { %v1376_v12 = vrot.slane %v1375_v52, 2  ;;  %v1389_v59 = vmax.f32 %v1387_v44, %v1388_v17  ;;  %v1397_v22 = vrot.slane %v1396_v45, 2  ;;  %v1415_v16 = vsel %vm1365_vm3, %v1116_v24, -inf  ;;  %v4979_v63 = vpop.f32.mrf.mxu1  ;;  %v4393_v24 = vld [vmem:[#allocation3 + $0x44] ss:$8 sps:$4 sm:$0xff]  }
 0x144   :  { %v1370_v26 = vmax.f32 %v1368_v40, %v1369_v61  ;;  %v1383_v27 = vrot.slane %v1382_v62, 2  ;;  %v1404_v30 = vrot.slane %v1403_v49, 2  ;;  %v1410_v31 = vmax.f32 %v1408_v57, %v1409_v3  ;;  %v4981_v5 = vpop.f32.mrf.mxu0  ;;  %v4391_v40 = vld [vmem:[#allocation3 + $0x40] ss:$8 sps:$4 sm:$0xff]   ;;  %v4396_v61 = vld [vmem:[#allocation3 + $0xc4] ss:$8 sps:$4 sm:$0xff]   ;;  %2151 = vmatprep.subr.bf16.mxu0 %v4393_v24 }
 0x145   :  { %v1377_v32 = vmax.f32 %v1375_v52, %v1376_v12  ;;  %v1390_v34 = vrot.slane %v1389_v59, 2  ;;  %v1398_v35 = vmax.f32 %v1396_v45, %v1397_v22  ;;  %v1416_v9 = vrot.slane %v1415_v16, 4  ;;  %v4983_v42 = vpop.f32.mrf.mxu1  ;;  %v4394_v52 = vld [vmem:[#allocation3 + $0xc0] ss:$8 sps:$4 sm:$0xff]   ;;  %1995 = vmatprep.subr.bf16.mxu1 %v4396_v61  ;;  %2152 = vmatpush1.bf16.msra.mxu0 %v4391_v40  ;;  %v4397_v24 = vld [vmem:[#allocation3 + $0x30] ss:$8 sps:$4 sm:$0xff]  }
 0x146   :  { %v1371_v44 = vrot.slane %v1370_v26, 1  ;;  %v1384_v39 = vmax.f32 %v1382_v62, %v1383_v27  ;;  %v1405_v17 = vmax.f32 %v1403_v49, %v1404_v30  ;;  %v1411_v60 = vrot.slane %v1410_v31, 2  ;;  %v888_v58 = vpop.f32.mrf.mxu0  ;;  %1996 = vmatpush1.bf16.msra.mxu1 %v4394_v52  ;;  %v4405_v52 = vld [vmem:[#allocation3 + $0x24] ss:$8 sps:$4 sm:$0xff]  }
 0x147   :  { %v1378_v57 = vrot.slane %v1377_v32, 1  ;;  %v1391_v3 = vmax.f32 %v1389_v59, %v1390_v34  ;;  %v1399_v56 = vrot.slane %v1398_v35, 1  ;;  %v1417_v11 = vmax.f32 %v1415_v16, %v1416_v9  ;;  %v722_v45 = vpop.f32.mrf.mxu1  ;;  %v4399_v58 = vld [vmem:[#allocation3 + $0x34] ss:$8 sps:$4 sm:$0xff]  }
 0x148   :  { %v1372_v12 = vmax.f32 %v1370_v26, %v1371_v44  ;;  %v1385_v22 = vrot.slane %v1384_v39, 1  ;;  %v1406_v1 = vrot.slane %v1405_v17, 1  ;;  %v1412_v10 = vmax.f32 %v1410_v31, %v1411_v60  ;;  %v889_v14 = vpop.f32.mrf.mxu0  ;;  %v4402_v31 = vld [vmem:[#allocation3 + $0xb4] ss:$8 sps:$4 sm:$0xff]   ;;  %2153 = vmatprep.subr.bf16.mxu0 %v4399_v58  ;;  %v4406_v58 = vld [vmem:[#allocation3 + $0xa0] ss:$8 sps:$4 sm:$0xff]  }
 0x149   :  { %v1379_v62 = vmax.f32 %v1377_v32, %v1378_v57  ;;  %v1392_v49 = vrot.slane %v1391_v3, 1  ;;  %v1400_v27 = vmax.f32 %v1398_v35, %v1399_v56  ;;  %v1418_v30 = vrot.slane %v1417_v11, 2  ;;  %v723_v59 = vpop.f32.mrf.mxu1  ;;  %v4400_v32 = vld [vmem:[#allocation3 + $0xb0] ss:$8 sps:$4 sm:$0xff]   ;;  %1997 = vmatprep.subr.bf16.mxu1 %v4402_v31  ;;  %2154 = vmatpush1.bf16.msra.mxu0 %v4397_v24  ;;  %v4403_v14 = vld [vmem:[#allocation3 + $0x20] ss:$8 sps:$4 sm:$0xff]  }
 0x14a   :  { %v1386_v16 = vmax.f32 %v1384_v39, %v1385_v22  ;;  %v1407_v34 = vmax.f32 %v1405_v17, %v1406_v1  ;;  %v1413_v9 = vrot.slane %v1412_v10, 1  ;;  %v993_v26 = vcombine.high %v4956_v18, %v4956_v18  ;;  %1998 = vmatpush1.bf16.msra.mxu1 %v4400_v32  ;;  %2155 = vmatprep.subr.bf16.mxu0 %v4405_v52  ;;  %v4411_v59 = vld [vmem:[#allocation3 + $0x14] ss:$8 sps:$4 sm:$0xff]  }
 0x14b   :  { %v1393_v44 = vmax.f32 %v1391_v3, %v1392_v49  ;;  %v1419_v60 = vmax.f32 %v1417_v11, %v1418_v30  ;;  %v1758_v61 = vmax.f32 %v1372_v12, %v1379_v62  ;;  %v994_v56 = vcombine.high %v4959_v19, %v4959_v19  ;;  %v4408_v62 = vld [vmem:[#allocation3 + $0xa4] ss:$8 sps:$4 sm:$0xff]  }
 0x14c   :  { %v1760_v35 = vmax.f32 %v1400_v27, %v1407_v34  ;;  %v1123_v40 = vrot.slane %v4956_v18, %v4920_v23  ;;  %v1131_v1 = vrot.slane %v993_v26, %v4920_v23  ;;  %v4994_v39 = vadd.f32 %v4913_v8, %v4938_v43  ;;  %1999 = vmatprep.subr.bf16.mxu1 %v4408_v62 }
 0x14d   :  { %v1420_v17 = vrot.slane %v1419_v60, 1  ;;  %v1759_v57 = vmax.f32 %v1386_v16, %v1393_v44  ;;  %v1786_v3 = vpack.c.bf16 %v1758_v61, %v1758_v61  ;;  %v1139_v11 = vrot.slane %v4959_v19, %v4920_v23  ;;  %2156 = vmatpush1.bf16.msra.mxu0 %v4403_v14  ;;  %v4412_v61 = vld [vmem:[#allocation3 + $0x90] ss:$8 sps:$4 sm:$0xff]   ;;  %v4415_v14 = vld [vmem:[#allocation3] ss:$8 sps:$4 sm:$0xff]  }
 0x14e   :  { %v1414_v45 = vmax.f32 %v1412_v10, %v1413_v9  ;;  %v1788_v12 = vpack.c.bf16 %v1760_v35, %v1760_v35  ;;  %v1124_v22 = vcombine.high %v1123_v40, %v1123_v40  ;;  %v1132_v18 = vcombine.high %v1131_v1, %v1131_v1  ;;  %v4414_v9 = vld [vmem:[#allocation3 + $0x94] ss:$8 sps:$4 sm:$0xff]   ;;  %2000 = vmatpush1.bf16.msra.mxu1 %v4406_v58  ;;  %v4418_v58 = vld [vmem:[#allocation3 + $0x80] ss:$8 sps:$4 sm:$0xff]  }
 0x14f   :  { %v1421_v49 = vmax.f32 %v1419_v60, %v1420_v17  ;;  %v1787_v27 = vpack.c.bf16 %v1759_v57, %v1759_v57  ;;  %v1140_v43 = vcombine.high %v1139_v11, %v1139_v11  ;;  %v1147_v30 = vrot.slane %v994_v56, %v4920_v23  ;;  %v4409_v60 = vld [vmem:[#allocation3 + $0x10] ss:$8 sps:$4 sm:$0xff]   ;;  %2157 = vmatprep.subr.bf16.mxu0 %v4411_v59  ;;  %v4417_v17 = vld [vmem:[#allocation3 + $0x4] ss:$8 sps:$4 sm:$0xff]  }
 0x150   :  { %v4999_v16 = vunpack.c.l.b16 %v1788_v12  ;;  %v2042_v19 = vunpack.c.l.b16 %v1786_v3  ;;  %v1422_v34 = vsel %vm1365_vm3, %v1123_v40, -inf  ;;  %v1429_v10 = vsel %vm1365_vm3, %v1124_v22, -inf  ;;  %2001 = vmatprep.subr.bf16.mxu1 %v4414_v9  ;;  %v4420_v12 = vld [vmem:[#allocation3 + $0x84] ss:$8 sps:$4 sm:$0xff]  }
 0x151   :  { %v1761_v26 = vmax.f32 %v1414_v45, %v1421_v49  ;;  %v1861_v24 = vunpack.c.l.b16 %v1787_v27  ;;  %v1423_v31 = vrot.slane %v1422_v34, 4  ;;  %v1430_v44 = vrot.slane %v1429_v10, 4  ;;  %2158 = vmatpush1.bf16.msra.mxu0 %v4409_v60 }
 0x152   :  { %v1436_v56 = vsel %vm1365_vm3, %v1131_v1, -inf  ;;  %v1443_v32 = vsel %vm1365_vm3, %v1132_v18, -inf  ;;  %v1450_v35 = vsel %vm1365_vm3, %v1139_v11, -inf  ;;  %v1457_v40 = vsel %vm1365_vm3, %v1140_v43, -inf  ;;  %2002 = vmatpush1.bf16.msra.mxu1 %v4412_v61  ;;  %2159 = vmatprep.subr.bf16.mxu0 %v4417_v17 }
 0x153   :  { %v1789_v57 = vpack.c.bf16 %v1761_v26, %v1761_v26  ;;  %v5009_v3 = vsel %vm1881_vm4, %v4999_v16, %v1861_v24  ;;  %v2044_v52 = vsel %vm1881_vm4, %v1861_v24, %v2042_v19  ;;  %v1424_v45 = vmax.f32 %v1422_v34, %v1423_v31  ;;  %2003 = vmatprep.subr.bf16.mxu1 %v4420_v12  ;;  %v4423_v26 = vld [vmem:[#allocation3 + $0x1f4] ss:$8 sps:$4 sm:$0xff]  }
 0x154   :  { %5685 = vst [vmem:[#allocation14_spill] sm:$0xff] %v5009_v3  ;;  %v5014_v1 = vsel %vm1883_vm5, %v4999_v16, %v2044_v52  ;;  %v1431_v22 = vmax.f32 %v1429_v10, %v1430_v44  ;;  %v1437_v11 = vrot.slane %v1436_v56, 4  ;;  %v1444_v18 = vrot.slane %v1443_v32, 4  ;;  %v4426_v24 = vld [vmem:[#allocation3 + $0x174] ss:$8 sps:$4 sm:$0xff]  }
 0x155   :  { %5686 = vst [vmem:[#allocation15_spill] sm:$0xff] %v5014_v1  ;;  %v1148_v62 = vcombine.high %v1147_v30, %v1147_v30  ;;  %v1425_v49 = vrot.slane %v1424_v45, 2  ;;  %v1451_v27 = vrot.slane %v1450_v35, 4  ;;  %v1458_v43 = vrot.slane %v1457_v40, 4  ;;  %2160 = vmatpush1.bf16.msra.mxu0 %v4415_v14 }
 0x156   :  { %v1432_v59 = vrot.slane %v1431_v22, 2  ;;  %v1438_v9 = vmax.f32 %v1436_v56, %v1437_v11  ;;  %v1445_v19 = vmax.f32 %v1443_v32, %v1444_v18  ;;  %v1464_v34 = vsel %vm1365_vm3, %v1147_v30, -inf  ;;  %2004 = vmatpush1.bf16.msra.mxu1 %v4418_v58  ;;  %2501 = vmatprep.subr.bf16.mxu0 %v4423_v26 }
 0x157   :  { %v5017_v10 = vunpack.c.l.b16 %v1789_v57  ;;  %v1426_v31 = vmax.f32 %v1424_v45, %v1425_v49  ;;  %v1452_v44 = vmax.f32 %v1450_v35, %v1451_v27  ;;  %v1459_v52 = vmax.f32 %v1457_v40, %v1458_v43  ;;  %2320 = vmatprep.subr.bf16.mxu1 %v4426_v24 }
 0x158   :  { %v1433_v0 = vmax.f32 %v1431_v22, %v1432_v59  ;;  %v1439_v4 = vrot.slane %v1438_v9, 2  ;;  %v1446_v50 = vrot.slane %v1445_v19, 2  ;;  %v1465_v60 = vrot.slane %v1464_v34, 4 }
 0x159   :  { %v1427_v61 = vrot.slane %v1426_v31, 1  ;;  %v1453_v3 = vrot.slane %v1452_v44, 2  ;;  %v1460_v1 = vrot.slane %v1459_v52, 2  ;;  %v1471_v56 = vsel %vm1365_vm3, %v1148_v62, -inf }
 0x15a   :  { %v1434_v30 = vrot.slane %v1433_v0, 1  ;;  %v1440_v32 = vmax.f32 %v1438_v9, %v1439_v4  ;;  %v1447_v17 = vmax.f32 %v1445_v19, %v1446_v50  ;;  %v1466_v12 = vmax.f32 %v1464_v34, %v1465_v60 }
 0x15b   :  { %v1428_v57 = vmax.f32 %v1426_v31, %v1427_v61  ;;  %v1454_v35 = vmax.f32 %v1452_v44, %v1453_v3  ;;  %v1461_v40 = vmax.f32 %v1459_v52, %v1460_v1  ;;  %v1472_v45 = vrot.slane %v1471_v56, 4 }
 0x15c   :  { %v1435_v22 = vmax.f32 %v1433_v0, %v1434_v30  ;;  %v1441_v11 = vrot.slane %v1440_v32, 1  ;;  %v1448_v18 = vrot.slane %v1447_v17, 1  ;;  %v1467_v49 = vrot.slane %v1466_v12, 2 }
 0x15d   :  { %v1455_v27 = vrot.slane %v1454_v35, 1  ;;  %v1462_v43 = vrot.slane %v1461_v40, 1  ;;  %v1473_v59 = vmax.f32 %v1471_v56, %v1472_v45  ;;  %v936_v14 = vmax.f32 %v4994_v39, 0.0 }
 0x15e   :  { %v1442_v62 = vmax.f32 %v1440_v32, %v1441_v11  ;;  %v1449_v58 = vmax.f32 %v1447_v17, %v1448_v18  ;;  %v1468_v4 = vmax.f32 %v1466_v12, %v1467_v49  ;;  %v1762_v50 = vmax.f32 %v1428_v57, %v1435_v22 }
 0x15f   :  { %v1456_v9 = vmax.f32 %v1454_v35, %v1455_v27  ;;  %v1463_v19 = vmax.f32 %v1461_v40, %v1462_v43  ;;  %v1474_v34 = vrot.slane %v1473_v59, 2  ;;  %v5687_v3 = vmax.f32 %v4936_v53, 0.0 }
 0x160   :  { %v1469_v26 = vrot.slane %v1468_v4, 1  ;;  %v1763_v0 = vmax.f32 %v1442_v62, %v1449_v58  ;;  %v1790_v24 = vpack.c.bf16 %v1762_v50, %v1762_v50  ;;  %v897_v61 = vadd.f32 %v4925_v37, %v4931_v13 }
 0x161   :  { %v995_v1 = vcombine.low %v5687_v3, %v936_v14  ;;  %v5688_v31 = vmov %v5687_v3  ;;  %v1475_v52 = vmax.f32 %v1473_v59, %v1474_v34  ;;  %v1764_v60 = vmax.f32 %v1456_v9, %v1463_v19 }
 0x162   :  { %v996_v44 = vcombine.high %v5688_v31, %v936_v14  ;;  %v5031_v56 = vsel %vm1881_vm4, %v5017_v10, %v4999_v16  ;;  %v1791_v30 = vpack.c.bf16 %v1763_v0, %v1763_v0  ;;  %v1470_v17 = vmax.f32 %v1468_v4, %v1469_v26 }
 0x163   :  { %v1003_v39 = vrot.slane %v995_v1, %v4920_v23  ;;  %v1476_v12 = vrot.slane %v1475_v52, 1  ;;  %v1792_v35 = vpack.c.bf16 %v1764_v60, %v1764_v60  ;;  %v5035_v40 = vunpack.c.l.b16 %v1790_v24 }
 0x164   :  { %v1010_v32 = vrot.slane %v996_v44, %v4920_v23  ;;  %v5038_v37 = vunpack.c.l.b16 %v1791_v30  ;;  %v5042_v11 = vadd.f32 %v4908_v2, %v897_v61 }
 0x165   :  { %v1011_v57 = vcombine.high %v1003_v39, %v1003_v39  ;;  %v1155_v53 = vrot.slane %v1003_v39, %v4920_v23  ;;  %v1477_v59 = vmax.f32 %v1475_v52, %v1476_v12  ;;  %v5048_v4 = vunpack.c.l.b16 %v1792_v35 }
 0x166   :  { %v1012_v45 = vcombine.high %v1010_v32, %v1010_v32  ;;  %v1171_v22 = vrot.slane %v1010_v32, %v4920_v23 }
 0x167   :  { %v1156_v13 = vcombine.high %v1155_v53, %v1155_v53  ;;  %v1163_v16 = vrot.slane %v1011_v57, %v4920_v23  ;;  %v1478_v27 = vsel %vm1365_vm3, %v1155_v53, -inf  ;;  %v1765_v52 = vmax.f32 %v1470_v17, %v1477_v59 }
 0x168   :  { %v1172_v18 = vcombine.high %v1171_v22, %v1171_v22  ;;  %v1179_v49 = vrot.slane %v1012_v45, %v4920_v23  ;;  %v1506_v43 = vsel %vm1365_vm3, %v1171_v22, -inf  ;;  %v1479_v62 = vrot.slane %v1478_v27, 4 }
 0x169   :  { %v1164_v14 = vcombine.high %v1163_v16, %v1163_v16  ;;  %v1485_v58 = vsel %vm1365_vm3, %v1156_v13, -inf  ;;  %v1492_v9 = vsel %vm1365_vm3, %v1163_v16, -inf  ;;  %v1507_v19 = vrot.slane %v1506_v43, 4 }
 0x16a   :  { %v1486_v50 = vrot.slane %v1485_v58, 4  ;;  %v1180_v34 = vcombine.high %v1179_v49, %v1179_v49  ;;  %v1480_v3 = vmax.f32 %v1478_v27, %v1479_v62  ;;  %v1493_v1 = vrot.slane %v1492_v9, 4 }
 0x16b   :  { %v1499_v26 = vsel %vm1365_vm3, %v1164_v14, -inf  ;;  %v1508_v31 = vmax.f32 %v1506_v43, %v1507_v19  ;;  %v1513_v44 = vsel %vm1365_vm3, %v1172_v18, -inf  ;;  %v1520_v57 = vsel %vm1365_vm3, %v1179_v49, -inf }
 0x16c   :  { %v1487_v0 = vmax.f32 %v1485_v58, %v1486_v50  ;;  %v1500_v24 = vrot.slane %v1499_v26, 4  ;;  %v1481_v60 = vrot.slane %v1480_v3, 2  ;;  %v1494_v39 = vmax.f32 %v1492_v9, %v1493_v1 }
 0x16d   :  { %v1514_v61 = vrot.slane %v1513_v44, 4  ;;  %v1509_v12 = vrot.slane %v1508_v31, 2  ;;  %v1521_v22 = vrot.slane %v1520_v57, 4  ;;  %v1527_v43 = vsel %vm1365_vm3, %v1180_v34, -inf }
 0x16e   :  { %v1488_v30 = vrot.slane %v1487_v0, 2  ;;  %v1501_v32 = vmax.f32 %v1499_v26, %v1500_v24  ;;  %v1482_v53 = vmax.f32 %v1480_v3, %v1481_v60  ;;  %v1495_v35 = vrot.slane %v1494_v39, 2 }
 0x16f   :  { %v1515_v45 = vmax.f32 %v1513_v44, %v1514_v61  ;;  %v1510_v27 = vmax.f32 %v1508_v31, %v1509_v12  ;;  %v1522_v59 = vmax.f32 %v1520_v57, %v1521_v22  ;;  %v1528_v9 = vrot.slane %v1527_v43, 4 }
 0x170   :  { %v1489_v13 = vmax.f32 %v1487_v0, %v1488_v30  ;;  %v1502_v16 = vrot.slane %v1501_v32, 2  ;;  %v1483_v14 = vrot.slane %v1482_v53, 1  ;;  %v1496_v18 = vmax.f32 %v1494_v39, %v1495_v35 }
 0x171   :  { %v1516_v17 = vrot.slane %v1515_v45, 2  ;;  %v1511_v50 = vrot.slane %v1510_v27, 1  ;;  %v1793_v19 = vpack.c.bf16 %v1765_v52, %v1765_v52  ;;  %v1523_v3 = vrot.slane %v1522_v59, 2 }
 0x172   :  { %v1490_v62 = vrot.slane %v1489_v13, 1  ;;  %v1503_v58 = vmax.f32 %v1501_v32, %v1502_v16  ;;  %v1497_v1 = vrot.slane %v1496_v18, 1  ;;  %v1484_v26 = vmax.f32 %v1482_v53, %v1483_v14 }
 0x173   :  { %v1517_v49 = vmax.f32 %v1515_v45, %v1516_v17  ;;  %v1529_v0 = vmax.f32 %v1527_v43, %v1528_v9  ;;  %v1512_v31 = vmax.f32 %v1510_v27, %v1511_v50  ;;  %v1524_v34 = vmax.f32 %v1522_v59, %v1523_v3 }
 0x174   :  { %v1491_v24 = vmax.f32 %v1489_v13, %v1490_v62  ;;  %v1504_v44 = vrot.slane %v1503_v58, 1  ;;  %v1498_v60 = vmax.f32 %v1496_v18, %v1497_v1  ;;  %v732_v32 = vadd.f32 %v4940_v55, %v4884_v25 }
 0x175   :  { %v1518_v61 = vrot.slane %v1517_v49, 1  ;;  %v1530_v39 = vrot.slane %v1529_v0, 2  ;;  %v1525_v35 = vrot.slane %v1524_v34, 1  ;;  %v733_v52 = vadd.f32 %v4947_v6, %v4886_v29 }
 0x176   :  { %v1505_v30 = vmax.f32 %v1503_v58, %v1504_v44  ;;  %v1766_v12 = vmax.f32 %v1484_v26, %v1491_v24  ;;  %v734_v53 = vadd.f32 %v4961_v20, %v4888_v33  ;;  %v5061_v45 = vunpack.c.l.b16 %v1793_v19 }
 0x177   :  { %v1519_v57 = vmax.f32 %v1517_v49, %v1518_v61  ;;  %v1531_v22 = vmax.f32 %v1529_v0, %v1530_v39  ;;  %v898_v16 = vadd.f32 %v4933_v41, %v732_v32  ;;  %v937_v43 = vmax.f32 %v5042_v11, 0.0 }
 0x178   :  { %v1767_v13 = vmax.f32 %v1498_v60, %v1505_v30  ;;  %v899_v14 = vadd.f32 %v4944_v21, %v733_v52  ;;  %v900_v25 = vadd.f32 %v4951_v15, %v734_v53  ;;  %v1794_v18 = vpack.c.bf16 %v1766_v12, %v1766_v12 }
 0x179   :  { %v1768_v27 = vmax.f32 %v1512_v31, %v1519_v57  ;;  %v1532_v55 = vrot.slane %v1531_v22, 1  ;;  %v924_v29 = vadd.f32 %v4913_v8, %v898_v16  ;;  %v1526_v6 = vmax.f32 %v1524_v34, %v1525_v35 }
 0x17a   :  { %v1795_v17 = vpack.c.bf16 %v1767_v13, %v1767_v13  ;;  %v925_v33 = vadd.f32 %v4908_v2, %v899_v14  ;;  %v926_v20 = vadd.f32 %v4913_v8, %v900_v25  ;;  %v735_v41 = vadd.f32 %v4968_v36, %v4890_v38 }
 0x17b   :  { %v1533_v59 = vmax.f32 %v1531_v22, %v1532_v55  ;;  %v1822_v62 = vpack.c.bf16 %v1768_v27, %v1768_v27  ;;  %v938_v11 = vmax.f32 %v924_v29, 0.0  ;;  %v736_v21 = vadd.f32 %v4974_v47, %v4892_v46 }
 0x17c   :  { %v5074_v15 = vunpack.c.l.b16 %v1795_v17  ;;  %v939_v58 = vmax.f32 %v925_v33, 0.0  ;;  %v940_v50 = vmax.f32 %v926_v20, 0.0  ;;  %v901_v9 = vadd.f32 %v4964_v28, %v735_v41 }
 0x17d   :  { %v1769_v19 = vmax.f32 %v1526_v6, %v1533_v59  ;;  %v5077_v1 = vunpack.c.l.b16 %v1794_v18  ;;  %v1013_v49 = vcombine.low %v937_v43, %v938_v11  ;;  %v1014_v3 = vcombine.high %v937_v43, %v938_v11 }
 0x17e   :  { %v1031_v26 = vcombine.low %v939_v58, %v940_v50  ;;  %v1032_v24 = vcombine.high %v939_v58, %v940_v50  ;;  %v5080_v38 = vadd.f32 %v4908_v2, %v901_v9  ;;  %v902_v36 = vadd.f32 %v4971_v48, %v736_v21 }
 0x17f   :  { %v2196_v44 = vpack.c.bf16 %v1769_v19, %v1769_v19  ;;  %v1021_v46 = vrot.slane %v1013_v49, %v4920_v23  ;;  %v1028_v47 = vrot.slane %v1014_v3, %v4920_v23  ;;  %v5087_v28 = vadd.f32 %v4979_v63, %v4896_v51 }
 0x180   :  { %v5089_v0 = vunpack.c.l.b16 %v1822_v62  ;;  %v5094_v60 = vsel %vm1881_vm4, %v5074_v15, %v5077_v1  ;;  %v5097_v31 = vrot.slane %v1031_v26, %v4920_v23  ;;  %v5100_v48 = vrot.slane %v1032_v24, %v4920_v23 }
 0x181   :  { %v1029_v61 = vcombine.high %v1021_v46, %v1021_v46  ;;  %v1030_v34 = vcombine.high %v1028_v47, %v1028_v47  ;;  %v1187_v30 = vrot.slane %v1021_v46, %v4920_v23  ;;  %v941_v51 = vmax.f32 %v5080_v38, 0.0 }
 0x182   :  { %v5104_v63 = vunpack.c.l.b16 %v2196_v44  ;;  %v1203_v39 = vrot.slane %v1028_v47, %v4920_v23  ;;  %v1047_v12 = vcombine.high %v5097_v31, %v5097_v31  ;;  %v5110_v32 = vadd.f32 %v4913_v8, %v902_v36 }
 0x183   :  { %v1188_v57 = vcombine.high %v1187_v30, %v1187_v30  ;;  %v1195_v35 = vrot.slane %v1029_v61, %v4920_v23  ;;  %v1211_v52 = vrot.slane %v1030_v34, %v4920_v23  ;;  %v1048_v53 = vcombine.high %v5100_v48, %v5100_v48 }
 0x184   :  { %v1204_v22 = vcombine.high %v1203_v39, %v1203_v39  ;;  %v1534_v13 = vsel %vm1365_vm3, %v1187_v30, -inf  ;;  %v1562_v16 = vsel %vm1365_vm3, %v1203_v39, -inf  ;;  %v5120_v27 = vrot.slane %v5097_v31, %v4920_v23 }
 0x185   :  { %v1196_v43 = vcombine.high %v1195_v35, %v1195_v35  ;;  %v1212_v14 = vcombine.high %v1211_v52, %v1211_v52  ;;  %v1535_v25 = vrot.slane %v1534_v13, 4  ;;  %v1541_v55 = vsel %vm1365_vm3, %v1188_v57, -inf }
 0x186   :  { %v1542_v18 = vrot.slane %v1541_v55, 4  ;;  %v1548_v17 = vsel %vm1365_vm3, %v1195_v35, -inf  ;;  %v1563_v29 = vrot.slane %v1562_v16, 4  ;;  %v1569_v6 = vsel %vm1365_vm3, %v1204_v22, -inf }
 0x187   :  { %v1536_v33 = vmax.f32 %v1534_v13, %v1535_v25  ;;  %v1549_v20 = vrot.slane %v1548_v17, 4  ;;  %v1555_v41 = vsel %vm1365_vm3, %v1196_v43, -inf  ;;  %v1570_v59 = vrot.slane %v1569_v6, 4 }
 0x188   :  { %v1543_v62 = vmax.f32 %v1541_v55, %v1542_v18  ;;  %v1556_v11 = vrot.slane %v1555_v41, 4  ;;  %v1564_v21 = vmax.f32 %v1562_v16, %v1563_v29  ;;  %v1576_v58 = vsel %vm1365_vm3, %v1211_v52, -inf }
 0x189   :  { %v1537_v50 = vrot.slane %v1536_v33, 2  ;;  %v1550_v9 = vmax.f32 %v1548_v17, %v1549_v20  ;;  %v1571_v19 = vmax.f32 %v1569_v6, %v1570_v59  ;;  %v1577_v49 = vrot.slane %v1576_v58, 4 }
 0x18a   :  { %v1544_v3 = vrot.slane %v1543_v62, 2  ;;  %v1557_v26 = vmax.f32 %v1555_v41, %v1556_v11  ;;  %v1565_v24 = vrot.slane %v1564_v21, 2  ;;  %v1583_v36 = vsel %vm1365_vm3, %v1212_v14, -inf }
 0x18b   :  { %v1538_v44 = vmax.f32 %v1536_v33, %v1537_v50  ;;  %v1551_v46 = vrot.slane %v1550_v9, 2  ;;  %v1572_v47 = vrot.slane %v1571_v19, 2  ;;  %v1578_v31 = vmax.f32 %v1576_v58, %v1577_v49 }
 0x18c   :  { %v1545_v61 = vmax.f32 %v1543_v62, %v1544_v3  ;;  %v1558_v34 = vrot.slane %v1557_v26, 2  ;;  %v1566_v30 = vmax.f32 %v1564_v21, %v1565_v24  ;;  %v1584_v39 = vrot.slane %v1583_v36, 4 }
 0x18d   :  { %v1539_v57 = vrot.slane %v1538_v44, 1  ;;  %v1552_v35 = vmax.f32 %v1550_v9, %v1551_v46  ;;  %v1573_v52 = vmax.f32 %v1571_v19, %v1572_v47  ;;  %v1579_v22 = vrot.slane %v1578_v31, 2 }
 0x18e   :  { %v1546_v13 = vrot.slane %v1545_v61, 1  ;;  %v1559_v16 = vmax.f32 %v1557_v26, %v1558_v34  ;;  %v1567_v43 = vrot.slane %v1566_v30, 1  ;;  %v1585_v25 = vmax.f32 %v1583_v36, %v1584_v39 }
 0x18f   :  { %v1553_v55 = vrot.slane %v1552_v35, 1  ;;  %v1574_v18 = vrot.slane %v1573_v52, 1  ;;  %v1580_v17 = vmax.f32 %v1578_v31, %v1579_v22  ;;  %v1220_v14 = vcombine.high %v5120_v27, %v5120_v27 }
 0x190   :  { %v1540_v29 = vmax.f32 %v1538_v44, %v1539_v57  ;;  %v1547_v6 = vmax.f32 %v1545_v61, %v1546_v13  ;;  %v1560_v33 = vrot.slane %v1559_v16, 1  ;;  %v1586_v20 = vrot.slane %v1585_v25, 2 }
 0x191   :  { %v1568_v41 = vmax.f32 %v1566_v30, %v1567_v43  ;;  %v1575_v59 = vmax.f32 %v1573_v52, %v1574_v18  ;;  %v1581_v62 = vrot.slane %v1580_v17, 1  ;;  %v1227_v11 = vrot.slane %v1047_v12, %v4920_v23 }
 0x192   :  { %v1554_v21 = vmax.f32 %v1552_v35, %v1553_v55  ;;  %v1561_v58 = vmax.f32 %v1559_v16, %v1560_v33  ;;  %v1587_v50 = vmax.f32 %v1585_v25, %v1586_v20  ;;  %v1770_v9 = vmax.f32 %v1540_v29, %v1547_v6 }
 0x193   :  { %v5134_v19 = vsel %vm1881_vm4, %v5104_v63, %v5089_v0  ;;  %v1772_v49 = vmax.f32 %v1568_v41, %v1575_v59  ;;  %v1228_v3 = vcombine.high %v1227_v11, %v1227_v11  ;;  %v1235_v26 = vrot.slane %v5100_v48, %v4920_v23 }
 0x194   :  { %v1582_v24 = vmax.f32 %v1580_v17, %v1581_v62  ;;  %v1588_v36 = vrot.slane %v1587_v50, 1  ;;  %v1771_v44 = vmax.f32 %v1554_v21, %v1561_v58  ;;  %v2377_v46 = vpack.c.bf16 %v1770_v9, %v1770_v9 }
 0x195   :  { %v1796_v47 = vpack.c.bf16 %v1772_v49, %v1772_v49  ;;  %v1243_v12 = vrot.slane %v1048_v53, %v4920_v23  ;;  %v1590_v31 = vsel %vm1365_vm3, %v5120_v27, -inf  ;;  %v1597_v61 = vsel %vm1365_vm3, %v1220_v14, -inf }
 0x196   :  { %v1589_v34 = vmax.f32 %v1587_v50, %v1588_v36  ;;  %v2398_v30 = vunpack.c.l.b16 %v2377_v46  ;;  %v2558_v39 = vpack.c.bf16 %v1771_v44, %v1771_v44  ;;  %v1591_v57 = vrot.slane %v1590_v31, 4 }
 0x197   :  { %v2043_v35 = vunpack.c.l.b16 %v1796_v47  ;;  %v1598_v52 = vrot.slane %v1597_v61, 4  ;;  %v1604_v22 = vsel %vm1365_vm3, %v1227_v11, -inf  ;;  %v1611_v13 = vsel %vm1365_vm3, %v1228_v3, -inf }
 0x198   :  { %v1773_v16 = vmax.f32 %v1582_v24, %v1589_v34  ;;  %v5149_v48 = vsel %vm1881_vm4, %v2398_v30, %v5104_v63  ;;  %v1236_v53 = vcombine.high %v1235_v26, %v1235_v26  ;;  %v1592_v43 = vmax.f32 %v1590_v31, %v1591_v57 }
 0x199   :  { %v1244_v27 = vcombine.high %v1243_v12, %v1243_v12  ;;  %v1599_v25 = vmax.f32 %v1597_v61, %v1598_v52  ;;  %v1605_v55 = vrot.slane %v1604_v22, 4  ;;  %v1612_v18 = vrot.slane %v1611_v13, 4 }
 0x19a   :  { %v5153_v17 = vsel %vm1883_vm5, %v2043_v35, %v5094_v60  ;;  %v2579_v14 = vunpack.c.l.b16 %v2558_v39  ;;  %v1593_v29 = vrot.slane %v1592_v43, 2  ;;  %v1618_v6 = vsel %vm1365_vm3, %v1235_v26, -inf }
 0x19b   :  { %v1600_v33 = vrot.slane %v1599_v25, 2  ;;  %v1606_v20 = vmax.f32 %v1604_v22, %v1605_v55  ;;  %v1613_v41 = vmax.f32 %v1611_v13, %v1612_v18  ;;  %v1619_v59 = vrot.slane %v1618_v6, 4 }
 0x19c   :  { %v1797_v62 = vpack.c.bf16 %v1773_v16, %v1773_v16  ;;  %v1594_v11 = vmax.f32 %v1592_v43, %v1593_v29  ;;  %v1625_v21 = vsel %vm1365_vm3, %v1236_v53, -inf  ;;  %v1632_v58 = vsel %vm1365_vm3, %v1243_v12, -inf }
 0x19d   :  { %v1601_v50 = vmax.f32 %v1599_v25, %v1600_v33  ;;  %v1607_v9 = vrot.slane %v1606_v20, 2  ;;  %v1614_v49 = vrot.slane %v1613_v41, 2  ;;  %v1620_v3 = vmax.f32 %v1618_v6, %v1619_v59 }
 0x19e   :  { %v1595_v60 = vrot.slane %v1594_v11, 1  ;;  %v1626_v24 = vrot.slane %v1625_v21, 4  ;;  %v1633_v36 = vrot.slane %v1632_v58, 4  ;;  %v1639_v44 = vsel %vm1365_vm3, %v1244_v27, -inf }
 0x19f   :  { %v1602_v26 = vrot.slane %v1601_v50, 1  ;;  %v1608_v46 = vmax.f32 %v1606_v20, %v1607_v9  ;;  %v1615_v47 = vmax.f32 %v1613_v41, %v1614_v49  ;;  %v1621_v31 = vrot.slane %v1620_v3, 2 }
 0x1a0   :  { %v1596_v61 = vmax.f32 %v1594_v11, %v1595_v60  ;;  %v1627_v34 = vmax.f32 %v1625_v21, %v1626_v24  ;;  %v1634_v39 = vmax.f32 %v1632_v58, %v1633_v36  ;;  %v1640_v57 = vrot.slane %v1639_v44, 4 }
 0x1a1   :  { %v1603_v35 = vmax.f32 %v1601_v50, %v1602_v26  ;;  %v1609_v52 = vrot.slane %v1608_v46, 1  ;;  %v1616_v12 = vrot.slane %v1615_v47, 1  ;;  %v1622_v22 = vmax.f32 %v1620_v3, %v1621_v31 }
 0x1a2   :  { %v1628_v13 = vrot.slane %v1627_v34, 2  ;;  %v1635_v16 = vrot.slane %v1634_v39, 2  ;;  %v1641_v53 = vmax.f32 %v1639_v44, %v1640_v57  ;;  %v942_v43 = vmax.f32 %v5110_v32, 0.0 }
 0x1a3   :  { %v1610_v25 = vmax.f32 %v1608_v46, %v1609_v52  ;;  %v1617_v55 = vmax.f32 %v1615_v47, %v1616_v12  ;;  %v1623_v27 = vrot.slane %v1622_v22, 1  ;;  %v1774_v18 = vmax.f32 %v1596_v61, %v1603_v35 }
 0x1a4   :  { %v1629_v29 = vmax.f32 %v1627_v34, %v1628_v13  ;;  %v1636_v6 = vmax.f32 %v1634_v39, %v1635_v16  ;;  %v1642_v33 = vrot.slane %v1641_v53, 2  ;;  %v1049_v20 = vcombine.low %v941_v51, %v942_v43 }
 0x1a5   :  { %v5163_v41 = vsel %vm1881_vm4, %v2579_v14, %v2398_v30  ;;  %v1775_v59 = vmax.f32 %v1610_v25, %v1617_v55  ;;  %v1798_v11 = vpack.c.bf16 %v1774_v18, %v1774_v18  ;;  %v1050_v21 = vcombine.high %v941_v51, %v942_v43 }
 0x1a6   :  { %v1630_v58 = vrot.slane %v1629_v29, 1  ;;  %v1637_v32 = vrot.slane %v1636_v6, 1  ;;  %v1643_v50 = vmax.f32 %v1641_v53, %v1642_v33  ;;  %v1057_v9 = vrot.slane %v1049_v20, %v4920_v23 }
 0x1a7   :  { %v5168_v49 = vunpack.c.l.b16 %v1797_v62  ;;  %v1624_v3 = vmax.f32 %v1622_v22, %v1623_v27  ;;  %v5170_v60 = vunpack.c.l.b16 %v1798_v11  ;;  %v1064_v24 = vrot.slane %v1050_v21, %v4920_v23 }
 0x1a8   :  { %v1631_v36 = vmax.f32 %v1629_v29, %v1630_v58  ;;  %v1644_v30 = vrot.slane %v1643_v50, 1  ;;  %v1799_v14 = vpack.c.bf16 %v1775_v59, %v1775_v59  ;;  %v1065_v44 = vcombine.high %v1057_v9, %v1057_v9 }
 0x1a9   :  { %v1638_v26 = vmax.f32 %v1636_v6, %v1637_v32  ;;  %v5176_v38 = vsel %vm1883_vm5, %v5170_v60, %v5134_v19  ;;  %v1066_v51 = vcombine.high %v1064_v24, %v1064_v24  ;;  %v1251_v46 = vrot.slane %v1057_v9, %v4920_v23 }
 0x1aa   :  { %v1645_v62 = vmax.f32 %v1643_v50, %v1644_v30  ;;  %v5179_v47 = vmax.f32 %v1624_v3, %v1631_v36  ;;  %v1259_v31 = vrot.slane %v1065_v44, %v4920_v23  ;;  %v1267_v61 = vrot.slane %v1064_v24, %v4920_v23 }
 0x1ab   :  { %v1252_v34 = vcombine.high %v1251_v46, %v1251_v46  ;;  %v1275_v39 = vrot.slane %v1066_v51, %v4920_v23  ;;  %v1646_v57 = vsel %vm1365_vm3, %v1251_v46, -inf  ;;  %v738_v35 = vadd.f32 %v4983_v42, %v4898_v54 }
 0x1ac   :  { %v1777_v19 = vmax.f32 %v1638_v26, %v1645_v62  ;;  %v5187_v52 = vunpack.c.l.b16 %v1799_v14  ;;  %v1260_v12 = vcombine.high %v1259_v31, %v1259_v31  ;;  %v1268_v22 = vcombine.high %v1267_v61, %v1267_v61 }
 0x1ad   :  { %v1647_v13 = vrot.slane %v1646_v57, 4  ;;  %v1653_v16 = vsel %vm1365_vm3, %v1252_v34, -inf  ;;  %v1660_v53 = vsel %vm1365_vm3, %v1259_v31, -inf  ;;  %v903_v43 = vadd.f32 %v4976_v7, %v5087_v28 }
 0x1ae   :  { %v1800_v25 = vpack.c.bf16 %v5179_v47, %v5179_v47  ;;  %v1276_v55 = vcombine.high %v1275_v39, %v1275_v39  ;;  %v1654_v27 = vrot.slane %v1653_v16, 4  ;;  %v1661_v18 = vrot.slane %v1660_v53, 4 }
 0x1af   :  { %v1648_v54 = vmax.f32 %v1646_v57, %v1647_v13  ;;  %v1667_v42 = vsel %vm1365_vm3, %v1260_v12, -inf  ;;  %v1674_v29 = vsel %vm1365_vm3, %v1267_v61, -inf  ;;  %v1681_v6 = vsel %vm1365_vm3, %v1268_v22, -inf }
 0x1b0   :  { %v1801_v33 = vpack.c.bf16 %v1777_v19, %v1777_v19  ;;  %v1655_v20 = vmax.f32 %v1653_v16, %v1654_v27  ;;  %v1662_v59 = vmax.f32 %v1660_v53, %v1661_v18  ;;  %v1668_v11 = vrot.slane %v1667_v42, 4 }
 0x1b1   :  { %v1649_v21 = vrot.slane %v1648_v54, 2  ;;  %v1675_v58 = vrot.slane %v1674_v29, 4  ;;  %v1682_v7 = vrot.slane %v1681_v6, 4  ;;  %v1688_v28 = vsel %vm1365_vm3, %v1275_v39, -inf }
 0x1b2   :  { %v1656_v32 = vrot.slane %v1655_v20, 2  ;;  %v1663_v50 = vrot.slane %v1662_v59, 2  ;;  %v1669_v9 = vmax.f32 %v1667_v42, %v1668_v11  ;;  %v1689_v3 = vrot.slane %v1688_v28, 4 }
 0x1b3   :  { %v1650_v24 = vmax.f32 %v1648_v54, %v1649_v21  ;;  %v1676_v36 = vmax.f32 %v1674_v29, %v1675_v58  ;;  %v1683_v30 = vmax.f32 %v1681_v6, %v1682_v7  ;;  %v1695_v14 = vsel %vm1365_vm3, %v1276_v55, -inf }
 0x1b4   :  { %v1657_v44 = vmax.f32 %v1655_v20, %v1656_v32  ;;  %v1664_v26 = vmax.f32 %v1662_v59, %v1663_v50  ;;  %v1670_v51 = vrot.slane %v1669_v9, 2  ;;  %v1690_v46 = vmax.f32 %v1688_v28, %v1689_v3 }
 0x1b5   :  { %v1651_v62 = vrot.slane %v1650_v24, 1  ;;  %v1677_v47 = vrot.slane %v1676_v36, 2  ;;  %v1684_v31 = vrot.slane %v1683_v30, 2  ;;  %v1696_v61 = vrot.slane %v1695_v14, 4 }
 0x1b6   :  { %v1658_v34 = vrot.slane %v1657_v44, 1  ;;  %v1665_v57 = vrot.slane %v1664_v26, 1  ;;  %v1671_v39 = vmax.f32 %v1669_v9, %v1670_v51  ;;  %v1691_v19 = vrot.slane %v1690_v46, 2 }
 0x1b7   :  { %v1652_v12 = vmax.f32 %v1650_v24, %v1651_v62  ;;  %v1678_v22 = vmax.f32 %v1676_v36, %v1677_v47  ;;  %v1685_v13 = vmax.f32 %v1683_v30, %v1684_v31  ;;  %v1697_v16 = vmax.f32 %v1695_v14, %v1696_v61  ;;  %v5689_v30 = vld [vmem:[#allocation15_spill] sm:$0xff]  ;;  %v5690_v62 = vld [vmem:[#allocation14_spill] sm:$0xff] }
 0x1b8   :  { %v1659_v53 = vmax.f32 %v1657_v44, %v1658_v34  ;;  %v1666_v27 = vmax.f32 %v1664_v26, %v1665_v57  ;;  %v1672_v18 = vrot.slane %v1671_v39, 1  ;;  %v1692_v55 = vmax.f32 %v1690_v46, %v1691_v19 }
 0x1b9   :  { %v1679_v54 = vrot.slane %v1678_v22, 1  ;;  %v1686_v42 = vrot.slane %v1685_v13, 1  ;;  %v1698_v29 = vrot.slane %v1697_v16, 2  ;;  %v929_v6 = vadd.f32 %v4908_v2, %v903_v43 }
 0x1ba   :  { %v1673_v20 = vmax.f32 %v1671_v39, %v1672_v18  ;;  %v1693_v59 = vrot.slane %v1692_v55, 1  ;;  %v1778_v11 = vmax.f32 %v1652_v12, %v1659_v53  ;;  %v904_v21 = vadd.f32 %v4981_v5, %v738_v35 }
 0x1bb   :  { %v5202_v58 = vunpack.c.l.b16 %v1800_v25  ;;  %v5204_v7 = vunpack.c.l.b16 %v1801_v33  ;;  %v1687_v28 = vmax.f32 %v1685_v13, %v1686_v42  ;;  %v5206_v32 = vmax.f32 %v1697_v16, %v1698_v29 }
 0x1bc   :  { %v1680_v50 = vmax.f32 %v1678_v22, %v1679_v54  ;;  %v5208_v9 = vmax.f32 %v1666_v27, %v1673_v20  ;;  %v1802_v3 = vpack.c.bf16 %v1778_v11, %v1778_v11  ;;  %v930_v24 = vadd.f32 %v4913_v8, %v904_v21 }
 0x1bd   :  { %v5211_v36 = vmax.f32 %v1692_v55, %v1693_v59  ;;  %v943_v2 = vmax.f32 %v929_v6, 0.0  ;;  %v1700_v5 = vrot.slane %v5206_v32, 1  ;;  %v2046_v8 = vsel %vm1885_vm6, %v5017_v10, %v5689_v30 }
 0x1be   :  { %v5214_v35 = vmax.f32 %v1680_v50, %v1687_v28  ;;  %v944_v43 = vmax.f32 %v930_v24, 0.0  ;;  %v1803_v25 = vpack.c.bf16 %v5208_v9, %v5208_v9  ;;  %v5218_v33 = vunpack.c.l.b16 %v1802_v3 }
 0x1bf   :  { %v2047_v26 = vsel %vm1887_vm7, %v5035_v40, %v2046_v8  ;;  %v2053_v46 = vsel %vm1885_vm6, %v5168_v49, %v5153_v17  ;;  %v1884_v47 = vsel %vm1883_vm5, %v5017_v10, %v5690_v62  ;;  %v1895_v31 = vsel %vm1881_vm4, %v5089_v0, %v5074_v15 }
 0x1c0   :  { %v1067_v14 = vcombine.low %v943_v2, %v944_v43  ;;  %v1068_v44 = vcombine.high %v943_v2, %v944_v43  ;;  %v2048_v51 = vsel %vm1889_vm8, %v5038_v37, %v2047_v26  ;;  %v2054_v39 = vsel %vm1887_vm7, %v5170_v60, %v2053_v46 }
 0x1c1   :  { %v2049_v57 = vsel %vm1891_vm9, %v5048_v4, %v2048_v51  ;;  %v2055_v19 = vsel %vm1889_vm8, %v5187_v52, %v2054_v39  ;;  %v1886_v12 = vsel %vm1885_vm6, %v5035_v40, %v1884_v47  ;;  %v1896_v22 = vsel %vm1883_vm5, %v5168_v49, %v1895_v31 }
 0x1c2   :  { %v1075_v61 = vrot.slane %v1067_v14, %v4920_v23  ;;  %v1082_v34 = vrot.slane %v1068_v44, %v4920_v23  ;;  %v2050_v17 = vsel %vm1893_vm10, %v5061_v45, %v2049_v57  ;;  %v1804_v18 = vpack.c.bf16 %v5214_v35, %v5214_v35 }
 0x1c3   :  { %v2056_v55 = vsel %vm1891_vm9, %v5202_v58, %v2055_v19  ;;  %v1888_v54 = vsel %vm1887_vm7, %v5038_v37, %v1886_v12  ;;  %v1897_v42 = vsel %vm1885_vm6, %v5170_v60, %v1896_v22  ;;  %v5275_v47 = vunpack.c.l.b16 %v1803_v25  ;;  %v4421_v25 = vld [vmem:[#allocation3 + $0x1f0] ss:$8 sps:$4 sm:$0xff]  }
 0x1c4   :  { %v1083_v13 = vcombine.high %v1075_v61, %v1075_v61  ;;  %v1084_v16 = vcombine.high %v1082_v34, %v1082_v34  ;;  %v1283_v53 = vrot.slane %v1075_v61, %v4920_v23  ;;  %v1299_v27 = vrot.slane %v1082_v34, %v4920_v23 }
 0x1c5   :  { %v2057_v21 = vsel %vm1893_vm10, %v5204_v7, %v2056_v55  ;;  %v1890_v28 = vsel %vm1889_vm8, %v5048_v4, %v1888_v54  ;;  %v1701_v34 = vmax.f32 %v5206_v32, %v1700_v5  ;;  %v1898_v5 = vsel %vm1887_vm7, %v5187_v52, %v1897_v42  ;;  %v4429_v54 = vld [vmem:[#allocation3 + $0x1e4] ss:$8 sps:$4 sm:$0xff]  }
 0x1c6   :  { %v1284_v29 = vcombine.high %v1283_v53, %v1283_v53  ;;  %v1291_v49 = vrot.slane %v1083_v13, %v4920_v23  ;;  %v1300_v6 = vcombine.high %v1299_v27, %v1299_v27  ;;  %v1307_v20 = vrot.slane %v1084_v16, %v4920_v23 }
 0x1c7   :  { %v1702_v59 = vsel %vm1365_vm3, %v1283_v53, -inf  ;;  %v1730_v11 = vsel %vm1365_vm3, %v1299_v27, -inf  ;;  %v2061_v55 = vpack.c.b16 %v2057_v21, %v2050_v17  ;;  %v1892_v32 = vsel %vm1891_vm9, %v5061_v45, %v1890_v28  ;;  %v4424_v28 = vld [vmem:[#allocation3 + $0x170] ss:$8 sps:$4 sm:$0xff]  }
 0x1c8   :  { %v1292_v50 = vcombine.high %v1291_v49, %v1291_v49  ;;  %v1308_v9 = vcombine.high %v1307_v20, %v1307_v20  ;;  %v1703_v3 = vrot.slane %v1702_v59, 4  ;;  %v1709_v60 = vsel %vm1365_vm3, %v1284_v29, -inf }
 0x1c9   :  { %v1710_v24 = vrot.slane %v1709_v60, 4  ;;  %v1716_v2 = vsel %vm1365_vm3, %v1291_v49, -inf  ;;  %v1731_v35 = vrot.slane %v1730_v11, 4  ;;  %v1737_v43 = vsel %vm1365_vm3, %v1300_v6, -inf  ;;  %2178 = vmatmul.mubr.bf16.vlgmr.msra.gmra.mxu0 %v2061_v55 }
 0x1ca   :  { %v1704_v30 = vmax.f32 %v1702_v59, %v1703_v3  ;;  %v1717_v8 = vrot.slane %v1716_v2, 4  ;;  %v1723_v14 = vsel %vm1365_vm3, %v1292_v50, -inf  ;;  %v1738_v44 = vrot.slane %v1737_v43, 4  ;;  %2502 = vmatpush1.bf16.msra.mxu0 %v4421_v25 }
 0x1cb   :  { %v1711_v26 = vmax.f32 %v1709_v60, %v1710_v24  ;;  %v1724_v51 = vrot.slane %v1723_v14, 4  ;;  %v5272_v46 = vmax.f32 %v1730_v11, %v1731_v35  ;;  %v1744_v62 = vsel %vm1365_vm3, %v1307_v20, -inf  ;;  %2503 = vmatprep.subr.bf16.mxu0 %v4429_v54 }
 0x1cc   :  { %v1705_v31 = vrot.slane %v1704_v30, 2  ;;  %v1745_v61 = vrot.slane %v1744_v62, 4  ;;  %v5278_v39 = vmax.f32 %v1716_v2, %v1717_v8  ;;  %v5282_v12 = vmax.f32 %v1737_v43, %v1738_v44  ;;  %v4435_v2 = vld [vmem:[#allocation3 + $0x1d4] ss:$8 sps:$4 sm:$0xff]  }
 0x1cd   :  { %v1712_v57 = vrot.slane %v1711_v26, 2  ;;  %v5280_v19 = vmax.f32 %v1723_v14, %v1724_v51  ;;  %v1733_v13 = vrot.slane %v5272_v46, 2  ;;  %v5288_v53 = vsel %vm1365_vm3, %v1308_v9, -inf  ;;  %v4427_v9 = vld [vmem:[#allocation3 + $0x1e0] ss:$8 sps:$4 sm:$0xff]  }
 0x1ce   :  { %v1706_v22 = vmax.f32 %v1704_v30, %v1705_v31  ;;  %v5285_v16 = vmax.f32 %v1744_v62, %v1745_v61  ;;  %v1894_v49 = vsel %vm1893_vm10, %v5077_v1, %v1892_v32  ;;  %v1899_v6 = vsel %vm1889_vm8, %v5202_v58, %v1898_v5  ;;  %2504 = vmatpush1.bf16.msra.mxu0 %v4427_v9  ;;  %v4441_v32 = vld [vmem:[#allocation3 + $0x1c4] ss:$8 sps:$4 sm:$0xff]   ;;  %v4439_v9 = vld [vmem:[#allocation3 + $0x1c0] ss:$8 sps:$4 sm:$0xff]  }
 0x1cf   :  { %v1713_v27 = vmax.f32 %v1711_v26, %v1712_v57  ;;  %v1781_v20 = vmax.f32 %v5211_v36, %v1701_v34  ;;  %v1900_v17 = vsel %vm1891_vm9, %v5204_v7, %v1899_v6  ;;  %v5301_v59 = vunpack.c.l.b16 %v1804_v18  ;;  %v4432_v18 = vld [vmem:[#allocation3 + $0x164] ss:$8 sps:$4 sm:$0xff]   ;;  %v4433_v34 = vld [vmem:[#allocation3 + $0x1d0] ss:$8 sps:$4 sm:$0xff]   ;;  %2505 = vmatprep.subr.bf16.mxu0 %v4435_v2 }
 0x1d0   :  { %v1707_v29 = vrot.slane %v1706_v22, 1  ;;  %v2058_v42 = vsel %vm1881_vm4, %v5275_v47, %v5218_v33  ;;  %v1719_v21 = vrot.slane %v5278_v39, 2  ;;  %v1901_v50 = vsel %vm1893_vm10, %v5218_v33, %v1900_v17 }
 0x1d1   :  { %v1714_v11 = vrot.slane %v1713_v27, 1  ;;  %v5691_v36 = vmov 0   ;;  %v1805_v3 = vpack.c.bf16 %v1781_v20, %v1781_v20  ;;  %v1905_v24 = vpack.c.b16 %v1901_v50, %v1894_v49 }
 0x1d2   :  { %2187 = vmatprep.mubr.bf16.mxu0 %v5691_v36  ;;  %v1708_v60 = vmax.f32 %v1706_v22, %v1707_v29  ;;  %v2059_v35 = vsel %vm1883_vm5, %v5301_v59, %v2058_v42  ;;  %v1902_v30 = vsel %vm1881_vm4, %v5301_v59, %v5275_v47  ;;  %v2400_v14 = vsel %vm1881_vm4, %v5035_v40, %v5017_v10  ;;  %v4430_v10 = vld [vmem:[#allocation3 + $0x160] ss:$8 sps:$4 sm:$0xff]  }
 0x1d3   :  { %v1715_v43 = vmax.f32 %v1713_v27, %v1714_v11  ;;  %v5315_v8 = vunpack.c.l.b16 %v1805_v3  ;;  %v2408_v44 = vsel %vm1883_vm5, %v5187_v52, %v5149_v48  ;;  %v2220_v26 = vsel %vm1883_vm5, %v5035_v40, %v5031_v56  ;;  %2022 = vmatmul.mubr.bf16.vlgmr.msra.gmra.mxu1 %v1905_v24  ;;  %v4438_v27 = vld [vmem:[#allocation3 + $0x154] ss:$8 sps:$4 sm:$0xff]   ;;  %2506 = vmatpush1.bf16.msra.mxu0 %v4433_v34  ;;  %v4442_v34 = vld [vmem:[#allocation3 + $0x140] ss:$8 sps:$4 sm:$0xff]  }
 0x1d4   :  { %v2401_v62 = vsel %vm1883_vm5, %v5038_v37, %v2400_v14  ;;  %v2409_v31 = vsel %vm1885_vm6, %v5202_v58, %v2408_v44  ;;  %v2221_v61 = vsel %vm1885_vm6, %v5038_v37, %v2220_v26  ;;  %2321 = vmatpush1.bf16.msra.mxu1 %v4424_v28  ;;  %v1726_v22 = vrot.slane %v5280_v19, 2  ;;  %2031 = vmatprep.mubr.bf16.mxu1 %v5691_v36  ;;  %v4444_v14 = vld [vmem:[#allocation3 + $0x144] ss:$8 sps:$4 sm:$0xff]  }
 0x1d5   :  { %v1782_v51 = vmax.f32 %v1708_v60, %v1715_v43  ;;  %v2060_v48 = vsel %vm1885_vm6, %v5315_v8, %v2059_v35  ;;  %v1903_v56 = vsel %vm1883_vm5, %v5315_v8, %v1902_v30  ;;  %v2402_v57 = vsel %vm1885_vm6, %v5048_v4, %v2401_v62  ;;  %2322 = vmatprep.subr.bf16.mxu1 %v4432_v18  ;;  %v4436_v60 = vld [vmem:[#allocation3 + $0x150] ss:$8 sps:$4 sm:$0xff]   ;;  %v4447_v18 = vld [vmem:[#allocation3 + $0x1b4] ss:$8 sps:$4 sm:$0xff]  }
 0x1d6   :  { %v2062_v25 = vpack.c.b16 %v2060_v48, %v2060_v48  ;;  %v2403_v5 = vsel %vm1887_vm7, %v5061_v45, %v2402_v57  ;;  %v1740_v54 = vrot.slane %v5282_v12, 2  ;;  %v2410_v49 = vsel %vm1887_vm7, %v5204_v7, %v2409_v31  ;;  %2507 = vmatprep.subr.bf16.mxu0 %v4441_v32  ;;  %v4445_v48 = vld [vmem:[#allocation3 + $0x1b0] ss:$8 sps:$4 sm:$0xff]  }
 0x1d7   :  { %v1823_v55 = vpack.c.bf16 %v1782_v51, %v1782_v51  ;;  %v2404_v29 = vsel %vm1889_vm8, %v5077_v1, %v2403_v5  ;;  %v2222_v6 = vsel %vm1887_vm7, %v5048_v4, %v2221_v61  ;;  %v2228_v20 = vsel %vm1885_vm6, %v5187_v52, %v5176_v38  ;;  %2508 = vmatpush1.bf16.msra.mxu0 %v4439_v9  ;;  %v4448_v9 = vld [vmem:[#allocation3 + $0x130] ss:$8 sps:$4 sm:$0xff]  }
 0x1d8   :  { %2188 = vmatmul.mubr.bf16.gmra.mxu0 %v2062_v25  ;;  %v2405_v42 = vsel %vm1891_vm9, %v5074_v15, %v2404_v29  ;;  %v2411_v11 = vsel %vm1889_vm8, %v5218_v33, %v2410_v49  ;;  %v2223_v28 = vsel %vm1889_vm8, %v5061_v45, %v2222_v6  ;;  %v1752_v50 = vrot.slane %v5288_v53, 4  ;;  %2323 = vmatpush1.bf16.msra.mxu1 %v4430_v10  ;;  %v4450_v25 = vld [vmem:[#allocation3 + $0x134] ss:$8 sps:$4 sm:$0xff]   ;;  %v4451_v6 = vld [vmem:[#allocation3 + $0x1a0] ss:$8 sps:$4 sm:$0xff]  }
 0x1d9   :  { %v5352_v17 = vunpack.c.l.b16 %v1823_v55  ;;  %v5363_v38 = vsel %vm1893_vm10, %v5089_v0, %v2405_v42  ;;  %v2412_v52 = vsel %vm1891_vm9, %v5275_v47, %v2411_v11  ;;  %v2224_v3 = vsel %vm1891_vm9, %v5077_v1, %v2223_v28  ;;  %2324 = vmatprep.subr.bf16.mxu1 %v4438_v27  ;;  %2533 = vmatprep.mubr.bf16.mxu0 %v5691_v36 }
 0x1da   :  { %v5373_v2 = vsel %vm1893_vm10, %v5301_v59, %v2412_v52  ;;  %v5377_v35 = vsel %vm1893_vm10, %v5074_v15, %v2224_v3  ;;  %v1747_v43 = vrot.slane %v5285_v16, 2  ;;  %v2229_v26 = vsel %vm1887_vm7, %v5202_v58, %v2228_v20  ;;  %2509 = vmatprep.subr.bf16.mxu0 %v4447_v18  ;;  %v4459_v52 = vld [vmem:[#allocation3 + $0x194] ss:$8 sps:$4 sm:$0xff]   ;;  %v4457_v18 = vld [vmem:[#allocation3 + $0x190] ss:$8 sps:$4 sm:$0xff]  }
 0x1db   :  { %v1904_v24 = vsel %vm1885_vm6, %v5352_v17, %v1903_v56  ;;  %v2417_v44 = vpack.c.b16 %v5373_v2, %v5363_v38  ;;  %v1720_v51 = vmax.f32 %v5278_v39, %v1719_v21  ;;  %v2230_v62 = vsel %vm1889_vm8, %v5204_v7, %v2229_v26  ;;  %2510 = vmatpush1.bf16.msra.mxu0 %v4445_v48  ;;  %v4477_v38 = vld [vmem:[#allocation3 + $0x254] ss:$8 sps:$4 sm:$0xff]   ;;  %v4475_v2 = vld [vmem:[#allocation3 + $0x250] ss:$8 sps:$4 sm:$0xff]  }
 0x1dc   :  { %v1906_v30 = vpack.c.b16 %v1904_v24, %v1904_v24  ;;  %v1727_v31 = vmax.f32 %v5280_v19, %v1726_v22  ;;  %v1734_v61 = vmax.f32 %v5272_v46, %v1733_v13  ;;  %v1741_v10 = vmax.f32 %v5282_v12, %v1740_v54  ;;  %2325 = vmatpush1.bf16.msra.mxu1 %v4436_v60  ;;  %v4453_v46 = vld [vmem:[#allocation3 + $0x1a4] ss:$8 sps:$4 sm:$0xff]  }
 0x1dd   :  { %v2231_v56 = vsel %vm1891_vm9, %v5218_v33, %v2230_v62  ;;  %v1721_v57 = vrot.slane %v1720_v51, 1  ;;  %v2414_v39 = vsel %vm1881_vm4, %v5352_v17, %v5315_v8  ;;  %v2233_v19 = vsel %vm1881_vm4, %v5315_v8, %v5301_v59  ;;  %2326 = vmatprep.subr.bf16.mxu1 %v4444_v14  ;;  %2511 = vmatprep.subr.bf16.mxu0 %v4453_v46  ;;  %v4465_v14 = vld [vmem:[#allocation3 + $0x184] ss:$8 sps:$4 sm:$0xff]  }
 0x1de   :  { %2032 = vmatmul.mubr.bf16.gmra.mxu1 %v1906_v30  ;;  %v5405_v12 = vsel %vm1893_vm10, %v5275_v47, %v2231_v56  ;;  %v1728_v13 = vrot.slane %v1727_v31, 1  ;;  %v1735_v21 = vrot.slane %v1734_v61, 1  ;;  %v1742_v22 = vrot.slane %v1741_v10, 1 }
 0x1df   :  { %2352 = vmatprep.mubr.bf16.mxu1 %v5691_v36  ;;  %v2236_v27 = vpack.c.b16 %v5405_v12, %v5377_v35  ;;  %v1722_v55 = vmax.f32 %v1720_v51, %v1721_v57  ;;  %v2234_v32 = vsel %vm1883_vm5, %v5352_v17, %v2233_v19  ;;  %v2581_v49 = vsel %vm1881_vm4, %v5038_v37, %v5035_v40  ;;  %v4456_v37 = vld [vmem:[#allocation3 + $0x124] ss:$8 sps:$4 sm:$0xff]   ;;  %v4462_v51 = vld [vmem:[#allocation3 + $0x114] ss:$8 sps:$4 sm:$0xff]   ;;  %v4460_v57 = vld [vmem:[#allocation3 + $0x110] ss:$8 sps:$4 sm:$0xff]  }
 0x1e0   :  { %v1729_v5 = vmax.f32 %v1727_v31, %v1728_v13  ;;  %v1736_v54 = vmax.f32 %v1734_v61, %v1735_v21  ;;  %v1743_v29 = vmax.f32 %v1741_v10, %v1742_v22  ;;  %v2582_v20 = vsel %vm1883_vm5, %v5048_v4, %v2581_v49  ;;  %2327 = vmatpush1.bf16.msra.mxu1 %v4442_v34  ;;  %v4466_v13 = vld [vmem:[#allocation3 + $0x100] ss:$8 sps:$4 sm:$0xff]   ;;  %v4483_v35 = vld [vmem:[#allocation3 + $0x234] ss:$8 sps:$4 sm:$0xff]   ;;  %v4481_v12 = vld [vmem:[#allocation3 + $0x230] ss:$8 sps:$4 sm:$0xff]  }
 0x1e1   :  { %v2589_v42 = vsel %vm1883_vm5, %v5202_v58, %v5163_v41  ;;  %v1748_v11 = vmax.f32 %v5285_v16, %v1747_v43  ;;  %v1753_v28 = vmax.f32 %v5288_v53, %v1752_v50  ;;  %v2583_v40 = vsel %vm1885_vm6, %v5061_v45, %v2582_v20  ;;  %2328 = vmatprep.subr.bf16.mxu1 %v4450_v25  ;;  %v4478_v49 = vld [vmem:[#allocation3 + $0x240] ss:$8 sps:$4 sm:$0xff]   ;;  %v4489_v20 = vld [vmem:[#allocation3 + $0x214] ss:$8 sps:$4 sm:$0xff]  }
 0x1e2   :  { %v1783_v3 = vmax.f32 %v1722_v55, %v1729_v5  ;;  %v1784_v60 = vmax.f32 %v1736_v54, %v1743_v29  ;;  %v2584_v4 = vsel %vm1887_vm7, %v5077_v1, %v2583_v40  ;;  %v2590_v41 = vsel %vm1885_vm6, %v5204_v7, %v2589_v42  ;;  %2512 = vmatpush1.bf16.msra.mxu0 %v4451_v6  ;;  %v4454_v7 = vld [vmem:[#allocation3 + $0x120] ss:$8 sps:$4 sm:$0xff]   ;;  %v4469_v55 = vld [vmem:[#allocation3 + $0x270] ss:$8 sps:$4 sm:$0xff]   ;;  %v4480_v29 = vld [vmem:[#allocation3 + $0x244] ss:$8 sps:$4 sm:$0xff]  }
 0x1e3   :  { %v1754_v58 = vrot.slane %v1753_v28, 2  ;;  %v2585_v50 = vsel %vm1889_vm8, %v5074_v15, %v2584_v4  ;;  %v2591_v24 = vsel %vm1887_vm7, %v5218_v33, %v2590_v41  ;;  %v1749_v43 = vrot.slane %v1748_v11, 1  ;;  %2513 = vmatprep.subr.bf16.mxu0 %v4459_v52  ;;  %v4472_v5 = vld [vmem:[#allocation3 + $0x260] ss:$8 sps:$4 sm:$0xff]   ;;  %v4487_v42 = vld [vmem:[#allocation3 + $0x210] ss:$8 sps:$4 sm:$0xff]  }
 0x1e4   :  { %v2197_v16 = vpack.c.bf16 %v1783_v3, %v1783_v3  ;;  %v2378_v53 = vpack.c.bf16 %v1784_v60, %v1784_v60  ;;  %v2586_v45 = vsel %vm1891_vm9, %v5089_v0, %v2585_v50  ;;  %v2592_v1 = vsel %vm1889_vm8, %v5275_v47, %v2591_v24  ;;  %2329 = vmatpush1.bf16.msra.mxu1 %v4448_v9  ;;  %v4484_v6 = vld [vmem:[#allocation3 + $0x220] ss:$8 sps:$4 sm:$0xff]   ;;  %v4493_v52 = vld [vmem:[#allocation6 + $0x78] sm:$0xff]   ;;  %v4495_v60 = vld [vmem:[#allocation6 + $0x70] sm:$0xff]  }
 0x1e5   :  { %v1755_v30 = vmax.f32 %v1753_v28, %v1754_v58  ;;  %v5438_v15 = vsel %vm1893_vm10, %v5104_v63, %v2586_v45  ;;  %v2593_v33 = vsel %vm1891_vm9, %v5301_v59, %v2592_v1  ;;  %2330 = vmatprep.subr.bf16.mxu1 %v4456_v37  ;;  %v4463_v59 = vld [vmem:[#allocation3 + $0x180] ss:$8 sps:$4 sm:$0xff]   ;;  %v1750_v48 = vmax.f32 %v1748_v11, %v1749_v43  ;;  %v4492_v11 = vld [vmem:[#allocation3 + $0x204] ss:$8 sps:$4 sm:$0xff]   ;;  %v4494_v3 = vld [vmem:[#allocation6 + $0x38] sm:$0xff]  }
 0x1e6   :  { %v2218_v26 = vunpack.c.l.b16 %v2197_v16  ;;  %v2399_v0 = vunpack.c.l.b16 %v2378_v53  ;;  %v5444_v47 = vsel %vm1893_vm10, %v5315_v8, %v2593_v33  ;;  %2514 = vmatpush1.bf16.msra.mxu0 %v4457_v18  ;;  %v5692_v21 = vmov 0.0   ;;  %v4490_v28 = vld [vmem:[#allocation3 + $0x200] ss:$8 sps:$4 sm:$0xff]   ;;  %v4496_v40 = vld [vmem:[#allocation6 + $0x30] sm:$0xff]   ;;  %v4501_v58 = vld [vmem:[#allocation6 + $0x58] sm:$0xff]  }
 0x1e7   :  { %v1756_v62 = vrot.slane %v1755_v30, 1  ;;  %v2598_v10 = vpack.c.b16 %v5444_v47, %v5438_v15  ;;  %2515 = vmatprep.subr.bf16.mxu0 %v4465_v14  ;;  %v4497_v37 = vld [vmem:[#allocation6 + $0x68] sm:$0xff]   ;;  %v4499_v4 = vld [vmem:[#allocation6 + $0x60] sm:$0xff]   ;;  %v4502_v16 = vld [vmem:[#allocation6 + $0x18] sm:$0xff]  }
 0x1e8   :  { %v2415_v31 = vsel %vm1883_vm5, %v2218_v26, %v2414_v39  ;;  %v2235_v61 = vsel %vm1885_vm6, %v2218_v26, %v2234_v32  ;;  %v2595_v63 = vsel %vm1881_vm4, %v2218_v26, %v5352_v17  ;;  %2331 = vmatpush1.bf16.msra.mxu1 %v4454_v7  ;;  %v4468_v39 = vld [vmem:[#allocation3 + $0x104] ss:$8 sps:$4 sm:$0xff]   ;;  %v4471_v17 = vld [vmem:[#allocation3 + $0x274] ss:$8 sps:$4 sm:$0xff]  }
 0x1e9   :  { %v2416_v34 = vsel %vm1885_vm6, %v2399_v0, %v2415_v31  ;;  %v1757_v56 = vmax.f32 %v1755_v30, %v1756_v62  ;;  %v2596_v8 = vsel %vm1883_vm5, %v2399_v0, %v2595_v63  ;;  %2332 = vmatprep.subr.bf16.mxu1 %v4462_v51  ;;  %v4474_v32 = vld [vmem:[#allocation3 + $0x264] ss:$8 sps:$4 sm:$0xff]   ;;  %v4503_v53 = vld [vmem:[#allocation6 + $0x50] sm:$0xff]  }
 0x1ea   :  { %2516 = vmatpush1.bf16.msra.mxu0 %v4463_v59  ;;  %v2418_v54 = vpack.c.b16 %v2416_v34, %v2416_v34  ;;  %v4500_v41 = vld [vmem:[#allocation6 + $0x20] sm:$0xff]   ;;  %v4504_v50 = vld [vmem:[#allocation6 + $0x10] sm:$0xff]   ;;  %v4505_v18 = vld [vmem:[#allocation6 + $0x48] sm:$0xff]  }
 0x1eb   :  { %v1785_v19 = vmax.f32 %v1750_v48, %v1757_v56  ;;  %4155 = vmatprep.subr.bf16.mxu0 %v5692_v21  ;;  %v4506_v1 = vld [vmem:[#allocation6 + $0x8] sm:$0xff]   ;;  %v4507_v7 = vld [vmem:[#allocation6 + $0x40] sm:$0xff]  }
 0x1ec   :  { %2333 = vmatpush1.bf16.msra.mxu1 %v4460_v57  ;;  %v4508_v33 = vld [vmem:[#allocation6] sm:$0xff]  }
 0x1ed   :  { %v2559_v46 = vpack.c.bf16 %v1785_v19, %v1785_v19  ;;  %2334 = vmatprep.subr.bf16.mxu1 %v4468_v39  ;;  %2534 = vmatmul.mubr.bf16.vlgmr.msra.gmra.mxu0 %v2417_v44  ;;  %v2237_v44 = vpack.c.b16 %v2235_v61, %v2235_v61 }
 0x1ee   :  { %2543 = vmatprep.mubr.bf16.mxu0 %v5691_v36  ;;  %4156 = vmatpush3.bf16.msra.mxu0 %v4493_v52 }
 0x1ef   :  { %v2580_v22 = vunpack.c.l.b16 %v2559_v46  ;;  %4157 = vmatprep.subr.bf16.mxu0 %v5692_v21 }
 0x1f0   :  { %2335 = vmatpush1.bf16.msra.mxu1 %v4466_v13 }
 0x1f1   :  { %v2597_v25 = vsel %vm1885_vm6, %v2580_v22, %v2596_v8  ;;  %2682 = vmatprep.subr.bf16.mxu1 %v4471_v17 }
 0x1f2   :  { %v2599_v9 = vpack.c.b16 %v2597_v25, %v2597_v25  ;;  %4158 = vmatpush3.bf16.msra.mxu0 %v4495_v60 }
 0x1f3   :  { %2353 = vmatmul.mubr.bf16.vlgmr.msra.gmra.mxu1 %v2236_v27  ;;  %v4486_v27 = vld [vmem:[#allocation3 + $0x224] ss:$8 sps:$4 sm:$0xff]   ;;  %4159 = vmatprep.subr.bf16.mxu0 %v5692_v21 }
 0x1f4   :  { %2683 = vmatpush1.bf16.msra.mxu1 %v4469_v55  ;;  %2362 = vmatprep.mubr.bf16.mxu1 %v5691_v36 }
 0x1f5   :  { %2684 = vmatprep.subr.bf16.mxu1 %v4474_v32  ;;  %2544 = vmatmul.mubr.bf16.gmra.mxu0 %v2418_v54 }
 0x1f6   :  { %4160 = vmatpush3.bf16.msra.mxu0 %v4497_v37  ;;  %4171 = vmatprep.mubr.msk.bf16.mxu0 %vm4645_vm11, %v5692_v21 }
 0x1f7   :  { %4161 = vmatprep.subr.bf16.mxu0 %v5692_v21 }
 0x1f8   :  { %2685 = vmatpush1.bf16.msra.mxu1 %v4472_v5 }
 0x1f9   :  { %2686 = vmatprep.subr.bf16.mxu1 %v4477_v38 }
 0x1fa   :  { %4162 = vmatpush3.bf16.msra.mxu0 %v4499_v4 }
 0x1fb   :  { %2363 = vmatmul.mubr.bf16.gmra.mxu1 %v2237_v44  ;;  %4163 = vmatprep.subr.bf16.mxu0 %v5692_v21 }
 0x1fc   :  { %2687 = vmatpush1.bf16.msra.mxu1 %v4475_v2  ;;  %2714 = vmatprep.mubr.bf16.mxu1 %v5691_v36 }
 0x1fd   :  { %2688 = vmatprep.subr.bf16.mxu1 %v4480_v29 }
 0x1fe   :  { %4164 = vmatpush3.bf16.msra.mxu0 %v4501_v58 }
 0x1ff   :  { %4165 = vmatprep.subr.bf16.mxu0 %v5692_v21 }
 0x200   :  { %2689 = vmatpush1.bf16.msra.mxu1 %v4478_v49 }
 0x201   :  { %2690 = vmatprep.subr.bf16.mxu1 %v4483_v35 }
 0x202   :  { %4166 = vmatpush3.bf16.msra.mxu0 %v4503_v53 }
 0x203   :  { %4167 = vmatprep.subr.bf16.mxu0 %v5692_v21 }
 0x204   :  { %2691 = vmatpush1.bf16.msra.mxu1 %v4481_v12 }
 0x205   :  { %2692 = vmatprep.subr.bf16.mxu1 %v4486_v27 }
 0x206   :  { %4168 = vmatpush3.bf16.msra.mxu0 %v4505_v18 }
 0x207   :  { %4169 = vmatprep.subr.bf16.mxu0 %v5692_v21 }
 0x208   :  { %2693 = vmatpush1.bf16.msra.mxu1 %v4484_v6 }
 0x209   :  { %2694 = vmatprep.subr.bf16.mxu1 %v4489_v20 }
 0x20a   :  { %4170 = vmatpush3.bf16.msra.mxu0 %v4507_v7 }
 0x20b   :  { %4195 = vmatprep.subr.bf16.mxu0 %v5692_v21 }
 0x20c   :  { %2695 = vmatpush1.bf16.msra.mxu1 %v4487_v42 }
 0x20d   :  { %2696 = vmatprep.subr.bf16.mxu1 %v4492_v11  ;;  %v2739_v11 = vld [vmem:[%s5668_s4] sm:$0x3] }
 0x210   :  { %2697 = vmatpush1.bf16.msra.mxu1 %v4490_v28 }
 0x211   :  { %4175 = vmatprep.subr.bf16.mxu1 %v5692_v21 }
 0x213   :  { %2715 = vmatmul.mubr.bf16.vlgmr.msra.gmra.mxu1 %v2598_v10 }
 0x214   :  { %2724 = vmatprep.mubr.bf16.mxu1 %v5691_v36  ;;  %4176 = vmatpush3.bf16.msra.mxu1 %v4494_v3  ;;  %v4498_v36 = vld [vmem:[#allocation6 + $0x28] sm:$0xff]   ;;  %v5693_v3 = vld [vmem:[#allocation13_spill] sm:$0xff] }
 0x215   :  { %4177 = vmatprep.subr.bf16.mxu1 %v5692_v21  ;;  %v5694_v60 = vsub.s32 0, %v5693_v3  ;;  %v5695_v58 = vsub.s32 1, %v5693_v3 }
 0x218   :  { %4178 = vmatpush3.bf16.msra.mxu1 %v4496_v40  ;;  %v2744_v40 = vrot.slane %v2739_v11, %v5694_v60 }
 0x219   :  { %4179 = vmatprep.subr.bf16.mxu1 %v5692_v21 }
 0x21b   :  { %2725 = vmatmul.mubr.bf16.gmra.mxu1 %v2599_v9 }
 0x21c   :  { %4180 = vmatpush3.bf16.msra.mxu1 %v4498_v36  ;;  %4191 = vmatprep.mubr.msk.bf16.mxu1 %vm4645_vm11, %v5692_v21 }
 0x21d   :  { %4181 = vmatprep.subr.bf16.mxu1 %v5692_v21 }
 0x220   :  { %4182 = vmatpush3.bf16.msra.mxu1 %v4500_v41 }
 0x221   :  { %4183 = vmatprep.subr.bf16.mxu1 %v5692_v21 }
 0x224   :  { %4184 = vmatpush3.bf16.msra.mxu1 %v4502_v16  ;;  %v5497_v16 = vrot.slane %v2739_v11, %v5695_v58 }
 0x225   :  { %4185 = vmatprep.subr.bf16.mxu1 %v5692_v21 }
 0x228   :  { %4186 = vmatpush3.bf16.msra.mxu1 %v4504_v50 }
 0x229   :  { %4187 = vmatprep.subr.bf16.mxu1 %v5692_v21 }
 0x22c   :  { %4188 = vmatpush3.bf16.msra.mxu1 %v4506_v1 }
 0x22d   :  { %4189 = vmatprep.subr.bf16.mxu1 %v5692_v21 }
 0x230   :  { %4190 = vmatpush3.bf16.msra.mxu1 %v4508_v33 }
 0x231   :  { %4215 = vmatprep.subr.bf16.mxu1 %v5692_v21 }
 0x289   :  { %v2179_v24 = vpop.f32.mrf.mxu0 }
 0x28b   :  { %v2181_v45 = vpop.f32.mrf.mxu0 }
 0x28d   :  { %v2183_v30 = vpop.f32.mrf.mxu0 }
 0x28f   :  { %v2185_v15 = vpop.f32.mrf.mxu0 }
 0x293   :  { %v2023_v43 = vpop.f32.mrf.mxu1 }
 0x294   :  { %v2180_v14 = vadd.f32 %v2179_v24, %v2023_v43 }
 0x295   :  { %v2025_v26 = vpop.f32.mrf.mxu1 }
 0x296   :  { %v2182_v51 = vadd.f32 %v2181_v45, %v2025_v26 }
 0x297   :  { %v2027_v0 = vpop.f32.mrf.mxu1 }
 0x298   :  { %v2189_v47 = vpop.f32.mrf.mxu0  ;;  %v2184_v62 = vadd.f32 %v2183_v30, %v2027_v0 }
 0x299   :  { %v2029_v31 = vpop.f32.mrf.mxu1 }
 0x29a   :  { %v2191_v61 = vpop.f32.mrf.mxu0  ;;  %v2186_v10 = vadd.f32 %v2185_v15, %v2029_v31 }
 0x29c   :  { %v2193_v63 = vpop.f32.mrf.mxu0 }
 0x29e   :  { %v2033_v59 = vpop.f32.mrf.mxu1  ;;  %v2194_v48 = vpop.f32.mrf.mxu0 }
 0x29f   :  { %v2190_v34 = vadd.f32 %v2189_v47, %v2033_v59 }
 0x2a0   :  { %v2035_v56 = vpop.f32.mrf.mxu1 }
 0x2a1   :  { %v2192_v8 = vadd.f32 %v2191_v61, %v2035_v56 }
 0x2a2   :  { %v2037_v57 = vpop.f32.mrf.mxu1 }
 0x2a4   :  { %v2038_v39 = vpop.f32.mrf.mxu1 }
 0x2ad   :  { %v2535_v19 = vpop.f32.mrf.mxu0 }
 0x2af   :  { %v2537_v46 = vpop.f32.mrf.mxu0 }
 0x2b1   :  { %v2539_v13 = vpop.f32.mrf.mxu0 }
 0x2b3   :  { %v2354_v17 = vpop.f32.mrf.mxu1  ;;  %v2541_v22 = vpop.f32.mrf.mxu0 }
 0x2b4   :  { %v2371_v42 = vadd.f32 %v2354_v17, %v2180_v14 }
 0x2b5   :  { %v2356_v25 = vpop.f32.mrf.mxu1  ;;  %v2545_v55 = vpop.f32.mrf.mxu0 }
 0x2b6   :  { %v2372_v28 = vadd.f32 %v2356_v25, %v2182_v51  ;;  %v2552_v52 = vadd.f32 %v2535_v19, %v2371_v42 }
 0x2b7   :  { %v2358_v32 = vpop.f32.mrf.mxu1  ;;  %v2547_v5 = vpop.f32.mrf.mxu0 }
 0x2b8   :  { %v2373_v9 = vadd.f32 %v2358_v32, %v2184_v62  ;;  %v2553_v41 = vadd.f32 %v2537_v46, %v2372_v28 }
 0x2b9   :  { %v2360_v54 = vpop.f32.mrf.mxu1  ;;  %v2549_v38 = vpop.f32.mrf.mxu0 }
 0x2ba   :  { %v2374_v36 = vadd.f32 %v2360_v54, %v2186_v10  ;;  %v2554_v18 = vadd.f32 %v2539_v13, %v2373_v9 }
 0x2bb   :  { %v2364_v2 = vpop.f32.mrf.mxu1  ;;  %v2550_v29 = vpop.f32.mrf.mxu0 }
 0x2bc   :  { %v2375_v44 = vadd.f32 %v2364_v2, %v2190_v34  ;;  %v2555_v30 = vadd.f32 %v2541_v22, %v2374_v36 }
 0x2bd   :  { %v2366_v49 = vpop.f32.mrf.mxu1 }
 0x2be   :  { %v2376_v35 = vadd.f32 %v2366_v49, %v2192_v8  ;;  %v2556_v12 = vadd.f32 %v2545_v55, %v2375_v44 }
 0x2bf   :  { %v2368_v27 = vpop.f32.mrf.mxu1 }
 0x2c0   :  { %v2557_v6 = vadd.f32 %v2547_v5, %v2376_v35 }
 0x2c1   :  { %v2369_v20 = vpop.f32.mrf.mxu1 }
 0x2d3   :  { %v2716_v37 = vpop.f32.mrf.mxu1 }
 0x2d4   :  { %v2733_v4 = vadd.f32 %v2716_v37, %v2552_v52 }
 0x2d5   :  { %v2718_v53 = vpop.f32.mrf.mxu1 }
 0x2d6   :  { %v2751_v50 = vadd.f32 %v2744_v40, %v2733_v4  ;;  %v2734_v24 = vadd.f32 %v2718_v53, %v2553_v41 }
 0x2d7   :  { %v2720_v45 = vpop.f32.mrf.mxu1 }
 0x2d8   :  { %v2752_v1 = vadd.f32 %v5497_v16, %v2734_v24  ;;  %v2735_v43 = vadd.f32 %v2720_v45, %v2554_v18  ;;  %v2757_v14 = vmax.f32 %v2751_v50, 0.0 }
 0x2d9   :  { %v2722_v7 = vpop.f32.mrf.mxu1 }
 0x2da   :  { %v2758_v26 = vmax.f32 %v2752_v1, 0.0  ;;  %v2736_v15 = vadd.f32 %v2722_v7, %v2555_v30  ;;  %v2753_v33 = vadd.f32 %v2744_v40, %v2735_v43 }
 0x2db   :  { %v2726_v51 = vpop.f32.mrf.mxu1 }
 0x2dc   :  { %v2769_v0 = vcombine.low %v2757_v14, %v2758_v26  ;;  %v2770_v47 = vcombine.high %v2757_v14, %v2758_v26  ;;  %v2754_v62 = vadd.f32 %v5497_v16, %v2736_v15  ;;  %v2737_v31 = vadd.f32 %v2726_v51, %v2556_v12 }
 0x2dd   :  { %v2728_v61 = vpop.f32.mrf.mxu1  ;;  %v2759_v34 = vmax.f32 %v2753_v33, 0.0 }
 0x2de   :  { %v2777_v10 = vrot.slane %v2769_v0, %v4920_v23  ;;  %v2784_v63 = vrot.slane %v2770_v47, %v4920_v23  ;;  %v2760_v59 = vmax.f32 %v2754_v62, 0.0  ;;  %v5503_v48 = vadd.f32 %v2744_v40, %v2737_v31 }
 0x2df   :  { %v2730_v56 = vpop.f32.mrf.mxu1  ;;  %v2738_v22 = vadd.f32 %v2728_v61, %v2557_v6 }
 0x2e0   :  { %v2785_v8 = vcombine.high %v2777_v10, %v2777_v10  ;;  %v2786_v57 = vcombine.high %v2784_v63, %v2784_v63  ;;  %v2820_v39 = vrot.slane %v2777_v10, %v4920_v23  ;;  %v2836_v19 = vrot.slane %v2784_v63, %v4920_v23 }
 0x2e1   :  { %v2787_v46 = vcombine.low %v2759_v34, %v2760_v59  ;;  %v2788_v13 = vcombine.high %v2759_v34, %v2760_v59  ;;  %v2761_v17 = vmax.f32 %v5503_v48, 0.0  ;;  %v2731_v25 = vpop.f32.mrf.mxu1  ;;  %v5523_v62 = vadd.f32 %v5497_v16, %v2738_v22 }
 0x2e2   :  { %v2821_v55 = vcombine.high %v2820_v39, %v2820_v39  ;;  %v2828_v32 = vrot.slane %v2785_v8, %v4920_v23  ;;  %v2837_v5 = vcombine.high %v2836_v19, %v2836_v19  ;;  %v2844_v54 = vrot.slane %v2786_v57, %v4920_v23 }
 0x2e3   :  { %v2914_v38 = vsel %vm1365_vm3, %v2820_v39, -inf  ;;  %v2942_v2 = vsel %vm1365_vm3, %v2836_v19, -inf  ;;  %v2795_v44 = vrot.slane %v2787_v46, %v4920_v23  ;;  %v2802_v29 = vrot.slane %v2788_v13, %v4920_v23 }
 0x2e4   :  { %v2829_v49 = vcombine.high %v2828_v32, %v2828_v32  ;;  %v2845_v35 = vcombine.high %v2844_v54, %v2844_v54  ;;  %v2915_v12 = vrot.slane %v2914_v38, 4  ;;  %v2921_v27 = vsel %vm1365_vm3, %v2821_v55, -inf }
 0x2e5   :  { %v2922_v6 = vrot.slane %v2921_v27, 4  ;;  %v2928_v20 = vsel %vm1365_vm3, %v2828_v32, -inf  ;;  %v2943_v42 = vrot.slane %v2942_v2, 4  ;;  %v2949_v11 = vsel %vm1365_vm3, %v2837_v5, -inf }
 0x2e6   :  { %v2916_v28 = vmax.f32 %v2914_v38, %v2915_v12  ;;  %v2929_v9 = vrot.slane %v2928_v20, 4  ;;  %v2935_v52 = vsel %vm1365_vm3, %v2829_v49, -inf  ;;  %v2950_v3 = vrot.slane %v2949_v11, 4 }
 0x2e7   :  { %v2923_v60 = vmax.f32 %v2921_v27, %v2922_v6  ;;  %v2936_v40 = vrot.slane %v2935_v52, 4  ;;  %v2944_v37 = vmax.f32 %v2942_v2, %v2943_v42  ;;  %v2956_v36 = vsel %vm1365_vm3, %v2844_v54, -inf }
 0x2e8   :  { %v2917_v4 = vrot.slane %v2916_v28, 2  ;;  %v2930_v41 = vmax.f32 %v2928_v20, %v2929_v9  ;;  %v2951_v58 = vmax.f32 %v2949_v11, %v2950_v3  ;;  %v2957_v53 = vrot.slane %v2956_v36, 4 }
 0x2e9   :  { %v2924_v50 = vrot.slane %v2923_v60, 2  ;;  %v2937_v24 = vmax.f32 %v2935_v52, %v2936_v40  ;;  %v2945_v18 = vrot.slane %v2944_v37, 2  ;;  %v2963_v45 = vsel %vm1365_vm3, %v2845_v35, -inf }
 0x2ea   :  { %v2918_v1 = vmax.f32 %v2916_v28, %v2917_v4  ;;  %v2931_v43 = vrot.slane %v2930_v41, 2  ;;  %v2952_v30 = vrot.slane %v2951_v58, 2  ;;  %v2958_v7 = vmax.f32 %v2956_v36, %v2957_v53 }
 0x2eb   :  { %v2925_v14 = vmax.f32 %v2923_v60, %v2924_v50  ;;  %v2938_v26 = vrot.slane %v2937_v24, 2  ;;  %v5520_v15 = vmax.f32 %v2944_v37, %v2945_v18  ;;  %v2964_v33 = vrot.slane %v2963_v45, 4 }
 0x2ec   :  { %v2919_v51 = vrot.slane %v2918_v1, 1  ;;  %v2932_v0 = vmax.f32 %v2930_v41, %v2931_v43  ;;  %v2959_v47 = vrot.slane %v2958_v7, 2  ;;  %v5525_v10 = vmax.f32 %v2951_v58, %v2952_v30 }
 0x2ed   :  { %v2926_v31 = vrot.slane %v2925_v14, 1  ;;  %v2939_v61 = vmax.f32 %v2937_v24, %v2938_v26  ;;  %v5527_v63 = vmax.f32 %v2963_v45, %v2964_v33  ;;  %v2947_v56 = vrot.slane %v5520_v15, 1 }
 0x2ee   :  { %v2920_v59 = vmax.f32 %v2918_v1, %v2919_v51  ;;  %v2933_v34 = vrot.slane %v2932_v0, 1  ;;  %v2803_v8 = vcombine.high %v2795_v44, %v2795_v44  ;;  %v5530_v19 = vmax.f32 %v2958_v7, %v2959_v47 }
 0x2ef   :  { %v2927_v57 = vmax.f32 %v2925_v14, %v2926_v31  ;;  %v2940_v39 = vrot.slane %v2939_v61, 1  ;;  %v2804_v46 = vcombine.high %v2802_v29, %v2802_v29  ;;  %v2966_v13 = vrot.slane %v5527_v63, 2 }
 0x2f0   :  { %v2852_v16 = vrot.slane %v2795_v44, %v4920_v23  ;;  %v2860_v22 = vrot.slane %v2803_v8, %v4920_v23  ;;  %v2868_v25 = vrot.slane %v2802_v29, %v4920_v23  ;;  %v2934_v55 = vmax.f32 %v2932_v0, %v2933_v34 }
 0x2f1   :  { %v2876_v32 = vrot.slane %v2804_v46, %v4920_v23  ;;  %v2762_v5 = vmax.f32 %v5523_v62, 0.0  ;;  %v2941_v54 = vmax.f32 %v2939_v61, %v2940_v39  ;;  %v3054_v31 = vmax.f32 %v2920_v59, %v2927_v57 }
 0x2f2   :  { %v2853_v38 = vcombine.high %v2852_v16, %v2852_v16  ;;  %v2861_v2 = vcombine.high %v2860_v22, %v2860_v22  ;;  %v2869_v49 = vcombine.high %v2868_v25, %v2868_v25  ;;  %v2970_v35 = vsel %vm1365_vm3, %v2852_v16, -inf }
 0x2f3   :  { %v2877_v12 = vcombine.high %v2876_v32, %v2876_v32  ;;  %v2971_v27 = vrot.slane %v2970_v35, 4  ;;  %v2984_v6 = vsel %vm1365_vm3, %v2860_v22, -inf  ;;  %v2998_v44 = vsel %vm1365_vm3, %v2868_v25, -inf }
 0x2f4   :  { %v2977_v20 = vsel %vm1365_vm3, %v2853_v38, -inf  ;;  %v2985_v29 = vrot.slane %v2984_v6, 4  ;;  %v2991_v42 = vsel %vm1365_vm3, %v2861_v2, -inf  ;;  %v2999_v11 = vrot.slane %v2998_v44, 4 }
 0x2f5   :  { %v2972_v28 = vmax.f32 %v2970_v35, %v2971_v27  ;;  %v2978_v9 = vrot.slane %v2977_v20, 4  ;;  %v2992_v52 = vrot.slane %v2991_v42, 4  ;;  %v3005_v3 = vsel %vm1365_vm3, %v2869_v49, -inf }
 0x2f6   :  { %v2986_v60 = vmax.f32 %v2984_v6, %v2985_v29  ;;  %v3000_v40 = vmax.f32 %v2998_v44, %v2999_v11  ;;  %v3006_v37 = vrot.slane %v3005_v3, 4  ;;  %v3012_v36 = vsel %vm1365_vm3, %v2876_v32, -inf }
 0x2f7   :  { %v2973_v4 = vrot.slane %v2972_v28, 2  ;;  %v2979_v41 = vmax.f32 %v2977_v20, %v2978_v9  ;;  %v2993_v58 = vmax.f32 %v2991_v42, %v2992_v52  ;;  %v3013_v53 = vrot.slane %v3012_v36, 4 }
 0x2f8   :  { %v2987_v50 = vrot.slane %v2986_v60, 2  ;;  %v3001_v24 = vrot.slane %v3000_v40, 2  ;;  %v3007_v18 = vmax.f32 %v3005_v3, %v3006_v37  ;;  %v3019_v45 = vsel %vm1365_vm3, %v2877_v12, -inf }
 0x2f9   :  { %v5546_v1 = vmax.f32 %v2972_v28, %v2973_v4  ;;  %v2980_v43 = vrot.slane %v2979_v41, 2  ;;  %v2994_v30 = vrot.slane %v2993_v58, 2  ;;  %v3014_v7 = vmax.f32 %v3012_v36, %v3013_v53 }
 0x2fa   :  { %v2988_v14 = vmax.f32 %v2986_v60, %v2987_v50  ;;  %v3002_v26 = vmax.f32 %v3000_v40, %v3001_v24  ;;  %v3008_v33 = vrot.slane %v3007_v18, 2  ;;  %v3020_v51 = vrot.slane %v3019_v45, 4 }
 0x2fb   :  { %v2975_v0 = vrot.slane %v5546_v1, 1  ;;  %v2995_v47 = vmax.f32 %v2993_v58, %v2994_v30  ;;  %v3015_v62 = vrot.slane %v3014_v7, 2  ;;  %v2805_v22 = vcombine.low %v2761_v17, %v2762_v5 }
 0x2fc   :  { %v2989_v61 = vrot.slane %v2988_v14, 1  ;;  %v3003_v34 = vrot.slane %v3002_v26, 1  ;;  %v3009_v8 = vmax.f32 %v3007_v18, %v3008_v33  ;;  %v3021_v39 = vmax.f32 %v3019_v45, %v3020_v51 }
 0x2fd   :  { %v2996_v46 = vrot.slane %v2995_v47, 1  ;;  %v3016_v16 = vmax.f32 %v3014_v7, %v3015_v62  ;;  %v3055_v25 = vmax.f32 %v2934_v55, %v2941_v54  ;;  %v5551_v32 = vmax.f32 %v2979_v41, %v2980_v43 }
 0x2fe   :  { %v2990_v38 = vmax.f32 %v2988_v14, %v2989_v61  ;;  %v3004_v2 = vmax.f32 %v3002_v26, %v3003_v34  ;;  %v3010_v49 = vrot.slane %v3009_v8, 1  ;;  %v2812_v35 = vrot.slane %v2805_v22, %v4920_v23  ;;  %v4510_v26 = vld [vmem:[#allocation6 + $0xf8] sm:$0xff]  }
 0x2ff   :  { %v3082_v12 = vpack.c.bf16 %v3055_v25, %v3055_v25  ;;  %v2997_v27 = vmax.f32 %v2995_v47, %v2996_v46  ;;  %v3064_v59 = vpack.c.bf16 %v3054_v31, %v3054_v31  ;;  %v3022_v6 = vrot.slane %v3021_v39, 2 }
 0x300   :  { %v3011_v57 = vmax.f32 %v3009_v8, %v3010_v49  ;;  %v2948_v44 = vmax.f32 %v5520_v15, %v2947_v56  ;;  %v2954_v48 = vrot.slane %v5525_v10, 1  ;;  %v2813_v17 = vcombine.high %v2812_v35, %v2812_v35 }
 0x301   :  { %v2884_v55 = vrot.slane %v2812_v35, %v4920_v23  ;;  %v3059_v5 = vmax.f32 %v2990_v38, %v2997_v27  ;;  %v3017_v54 = vrot.slane %v3016_v16, 1  ;;  %v3103_v29 = vunpack.c.l.b16 %v3082_v12  ;;  %v4512_v12 = vld [vmem:[#allocation6 + $0xf0] sm:$0xff]  }
 0x302   :  { %v3060_v20 = vmax.f32 %v3004_v2, %v3011_v57  ;;  %v3198_v42 = vunpack.c.l.b16 %v3064_v59  ;;  %v2955_v11 = vmax.f32 %v5525_v10, %v2954_v48  ;;  %v2892_v9 = vrot.slane %v2813_v17, %v4920_v23  ;;  %v4511_v57 = vld [vmem:[#allocation6 + $0xb0] sm:$0xff]  }
 0x303   :  { %v2885_v28 = vcombine.high %v2884_v55, %v2884_v55  ;;  %v3026_v52 = vsel %vm1365_vm3, %v2884_v55, -inf  ;;  %v3065_v3 = vpack.c.bf16 %v3059_v5, %v3059_v5  ;;  %v3023_v56 = vmax.f32 %v3021_v39, %v3022_v6  ;;  %v4509_v39 = vld [vmem:[#allocation6 + $0xb8] sm:$0xff]  }
 0x304   :  { %v3027_v60 = vrot.slane %v3026_v52, 4  ;;  %v3083_v15 = vpack.c.bf16 %v3060_v20, %v3060_v20  ;;  %v3056_v40 = vmax.f32 %v2948_v44, %v2955_v11  ;;  %v2893_v37 = vcombine.high %v2892_v9, %v2892_v9 }
 0x305   :  { %v3033_v36 = vsel %vm1365_vm3, %v2885_v28, -inf  ;;  %v3040_v4 = vsel %vm1365_vm3, %v2892_v9, -inf  ;;  %v3199_v41 = vunpack.c.l.b16 %v3065_v3  ;;  %v3018_v18 = vmax.f32 %v3016_v16, %v3017_v54  ;;  %v4514_v54 = vld [vmem:[#allocation6 + $0xe8] sm:$0xff]  }
 0x306   :  { %v3028_v58 = vmax.f32 %v3026_v52, %v3027_v60  ;;  %v3034_v53 = vrot.slane %v3033_v36, 4  ;;  %v3041_v50 = vrot.slane %v3040_v4, 4  ;;  %v3104_v10 = vunpack.c.l.b16 %v3083_v15  ;;  %v4513_v52 = vld [vmem:[#allocation6 + $0xa8] sm:$0xff]  }
 0x307   :  { %v3047_v24 = vsel %vm1365_vm3, %v2893_v37, -inf  ;;  %v3200_v23 = vsel %vm1881_vm4, %v3199_v41, %v3198_v42  ;;  %v3024_v45 = vrot.slane %v3023_v56, 1  ;;  %v3291_v62 = vpack.c.bf16 %v3056_v40, %v3056_v40  ;;  %v4516_v37 = vld [vmem:[#allocation6 + $0xe0] sm:$0xff]  }
 0x308   :  { %v3029_v43 = vrot.slane %v3028_v58, 2  ;;  %v3035_v30 = vmax.f32 %v3033_v36, %v3034_v53  ;;  %v3042_v7 = vmax.f32 %v3040_v4, %v3041_v50  ;;  %v3048_v14 = vrot.slane %v3047_v24, 4  ;;  %v4515_v36 = vld [vmem:[#allocation6 + $0xa0] sm:$0xff]   ;;  %v4518_v53 = vld [vmem:[#allocation6 + $0xd8] sm:$0xff]  }
 0x309   :  { %v3105_v33 = vsel %vm1881_vm4, %v3104_v10, %v3103_v29  ;;  %v3201_v51 = vpack.c.b16 %v3200_v23, %v3200_v23  ;;  %v3025_v47 = vmax.f32 %v3023_v56, %v3024_v45  ;;  %v2961_v16 = vrot.slane %v5530_v19, 1  ;;  %v4517_v23 = vld [vmem:[#allocation6 + $0x98] sm:$0xff]   ;;  %v4520_v45 = vld [vmem:[#allocation6 + $0xd0] sm:$0xff]  }
 0x30a   :  { %v3030_v31 = vmax.f32 %v3028_v58, %v3029_v43  ;;  %v3036_v61 = vrot.slane %v3035_v30, 2  ;;  %v3043_v34 = vrot.slane %v3042_v7, 2  ;;  %v3049_v8 = vmax.f32 %v3047_v24, %v3048_v14  ;;  %v4519_v43 = vld [vmem:[#allocation6 + $0x90] sm:$0xff]   ;;  %v4524_v14 = vld [vmem:[#allocation6 + $0xc0] sm:$0xff]  }
 0x30b   :  { %v3106_v46 = vpack.c.b16 %v3105_v33, %v3105_v33  ;;  %4192 = vmatmul.mubr.bf16.vlgmr.msra.gmra.mxu1 %v3201_v51  ;;  %v3061_v22 = vmax.f32 %v3018_v18, %v3025_v47  ;;  %v2967_v25 = vmax.f32 %v5527_v63, %v2966_v13  ;;  %v3312_v63 = vunpack.c.l.b16 %v3291_v62  ;;  %v4525_v51 = vld [vmem:[#allocation6 + $0x138] sm:$0xff]   ;;  %v4526_v62 = vld [vmem:[#allocation6 + $0x130] sm:$0xff]  }
 0x30c   :  { %v3031_v38 = vrot.slane %v3030_v31, 1  ;;  %v3037_v2 = vmax.f32 %v3035_v30, %v3036_v61  ;;  %v3044_v49 = vmax.f32 %v3042_v7, %v3043_v34  ;;  %v3050_v35 = vrot.slane %v3049_v8, 2  ;;  %4216 = vmatpush3.bf16.msra.mxu1 %v4510_v26  ;;  %4231 = vmatprep.mubr.msk.bf16.mxu1 %vm4645_vm11, %v5692_v21  ;;  %v4522_v30 = vld [vmem:[#allocation6 + $0xc8] sm:$0xff]   ;;  %v4523_v26 = vld [vmem:[#allocation6 + $0x80] sm:$0xff]   ;;  %v4529_v34 = vld [vmem:[#allocation6 + $0x118] sm:$0xff]  }
 0x30d   :  { %4172 = vmatmul.mubr.bf16.vlgmr.msra.gmra.mxu0 %v3106_v46  ;;  %4217 = vmatprep.subr.bf16.mxu1 %v5692_v21  ;;  %v3292_v27 = vpack.c.bf16 %v3061_v22, %v3061_v22  ;;  %v2968_v59 = vrot.slane %v2967_v25, 1  ;;  %v2962_v13 = vmax.f32 %v5530_v19, %v2961_v16  ;;  %v2982_v44 = vrot.slane %v5551_v32, 1  ;;  %v4521_v7 = vld [vmem:[#allocation6 + $0x88] sm:$0xff]   ;;  %v4528_v61 = vld [vmem:[#allocation6 + $0x120] sm:$0xff]   ;;  %v4533_v16 = vld [vmem:[#allocation8 + $0x38] ss:$0 sps:$4 sm:$0xff]  }
 0x30e   :  { %4196 = vmatpush3.bf16.msra.mxu0 %v4509_v39  ;;  %4211 = vmatprep.mubr.msk.bf16.mxu0 %vm4645_vm11, %v5692_v21  ;;  %v3038_v6 = vrot.slane %v3037_v2, 1  ;;  %v3045_v55 = vrot.slane %v3044_v49, 1  ;;  %v3051_v5 = vmax.f32 %v3049_v8, %v3050_v35  ;;  %v3032_v20 = vmax.f32 %v3030_v31, %v3031_v38  ;;  %v4527_v31 = vld [vmem:[#allocation6 + $0x128] sm:$0xff]   ;;  %v4530_v8 = vld [vmem:[#allocation6 + $0x110] sm:$0xff]   ;;  %v4532_v46 = vld [vmem:[#allocation6 + $0x100] sm:$0xff]  }
 0x30f   :  { %4197 = vmatprep.subr.bf16.mxu0 %v5692_v21  ;;  %v3313_v48 = vunpack.c.l.b16 %v3292_v27  ;;  %v2969_v17 = vmax.f32 %v2967_v25, %v2968_v59  ;;  %v2976_v42 = vmax.f32 %v5546_v1, %v2975_v0  ;;  %v2983_v11 = vmax.f32 %v5551_v32, %v2982_v44  ;;  %v4531_v39 = vld [vmem:[#allocation6 + $0x108] sm:$0xff]   ;;  %v4534_v38 = vld [vmem:[#allocation8 + $0x30] sm:$0xff]   ;;  %v4537_v35 = vld [vmem:[#allocation8 + $0x18] sm:$0xff]  }
 0x310   :  { %4218 = vmatpush3.bf16.msra.mxu1 %v4512_v12  ;;  %v3039_v29 = vmax.f32 %v3037_v2, %v3038_v6  ;;  %v3052_v9 = vrot.slane %v3051_v5, 1  ;;  %v3046_v56 = vmax.f32 %v3044_v49, %v3045_v55  ;;  %v3719_v25 = vsel %vm3717_vm12, %v4533_v16, 0  ;;  %v4535_v2 = vld [vmem:[#allocation8 + $0x28] sm:$0xff]   ;;  %v4536_v49 = vld [vmem:[#allocation8 + $0x20] sm:$0xff]   ;;  %v4538_v12 = vld [vmem:[#allocation8 + $0x10] sm:$0xff]  }
 0x311   :  { %4219 = vmatprep.subr.bf16.mxu1 %v5692_v21  ;;  %v3314_v19 = vsel %vm1881_vm4, %v3313_v48, %v3312_v63  ;;  %v3057_v28 = vmax.f32 %v2962_v13, %v2969_v17  ;;  %v3058_v60 = vmax.f32 %v2976_v42, %v2983_v11  ;;  %v4539_v27 = vld [vmem:[#allocation8 + $0x8] sm:$0xff]   ;;  %v4540_v59 = vld [vmem:[#allocation8] sm:$0xff]   ;;  %v4543_v13 = vld [vmem:[%s5673_s9 + $0x28] sm:$0xff]  }
 0x312   :  { %4198 = vmatpush3.bf16.msra.mxu0 %v4511_v57  ;;  %v3062_v3 = vmax.f32 %v3032_v20, %v3039_v29  ;;  %v3053_v40 = vmax.f32 %v3051_v5, %v3052_v9  ;;  %v3315_v47 = vpack.c.b16 %v3314_v19, %v3314_v19  ;;  %v4541_v57 = vld [vmem:[%s5673_s9 + $0x38] sm:$0xff]   ;;  %v4542_v63 = vld [vmem:[%s5673_s9 + $0x30] sm:$0xff]   ;;  %v4544_v6 = vld [vmem:[%s5673_s9 + $0x20] sm:$0xff]  }
 0x313   :  { %4199 = vmatprep.subr.bf16.mxu0 %v5692_v21  ;;  %v3406_v15 = vpack.c.bf16 %v3057_v28, %v3057_v28  ;;  %v3521_v32 = vpack.c.bf16 %v3058_v60, %v3058_v60  ;;  %v4545_v44 = vld [vmem:[%s5673_s9 + $0x18] sm:$0xff]   ;;  %v4546_v48 = vld [vmem:[%s5673_s9 + $0x10] sm:$0xff]  }
 0x314   :  { %4220 = vmatpush3.bf16.msra.mxu1 %v4514_v54  ;;  %v3407_v1 = vpack.c.bf16 %v3062_v3, %v3062_v3  ;;  %v3063_v0 = vmax.f32 %v3046_v56, %v3053_v40 }
 0x315   :  { %4221 = vmatprep.subr.bf16.mxu1 %v5692_v21  ;;  %v3427_v4 = vunpack.c.l.b16 %v3406_v15  ;;  %v3542_v10 = vunpack.c.l.b16 %v3521_v32  ;;  %v4072_v32 = vld [vmem:[%s5670_s6] ss:$0 sm:$0xff] }
 0x316   :  { %4200 = vmatpush3.bf16.msra.mxu0 %v4513_v52  ;;  %v3428_v41 = vunpack.c.l.b16 %v3407_v1  ;;  %v3522_v58 = vpack.c.bf16 %v3063_v0, %v3063_v0 }
 0x317   :  { %4201 = vmatprep.subr.bf16.mxu0 %v5692_v21 }
 0x318   :  { %4222 = vmatpush3.bf16.msra.mxu1 %v4516_v37  ;;  %v3429_v50 = vsel %vm1881_vm4, %v3428_v41, %v3427_v4  ;;  %v3543_v24 = vunpack.c.l.b16 %v3522_v58 }
 0x319   :  { %4223 = vmatprep.subr.bf16.mxu1 %v5692_v21  ;;  %v3430_v33 = vpack.c.b16 %v3429_v50, %v3429_v50 }
 0x31a   :  { %4202 = vmatpush3.bf16.msra.mxu0 %v4515_v36  ;;  %v3544_v18 = vsel %vm1881_vm4, %v3543_v24, %v3542_v10  ;;  %v4547_v24 = vld [vmem:[%s5673_s9 + $0x8] sm:$0xff]  }
 0x31b   :  { %4203 = vmatprep.subr.bf16.mxu0 %v5692_v21  ;;  %v3545_v22 = vpack.c.b16 %v3544_v18, %v3544_v18  ;;  %v4073_v18 = vld [vmem:[%s5672_s8] ss:$0 sm:$0xff] }
 0x31c   :  { %4224 = vmatpush3.bf16.msra.mxu1 %v4518_v53 }
 0x31d   :  { %4225 = vmatprep.subr.bf16.mxu1 %v5692_v21 }
 0x31e   :  { %4204 = vmatpush3.bf16.msra.mxu0 %v4517_v23  ;;  %v4548_v23 = vld [vmem:[%s5673_s9] sm:$0xff]   ;;  %s4646_s9 = smov [#allocation9]  }
 0x31f   :  { %4205 = vmatprep.subr.bf16.mxu0 %v5692_v21  ;;  %s3881_s25 = sshll.u32 %s4646_s9, 4  ;;  %s3882_s25 = int_to_ptr.vmem [resolvable:$true] %s3881_s25 }
 0x320   :  { %4226 = vmatpush3.bf16.msra.mxu1 %v4520_v45  ;;  %s4609_s8 = scalar_lea.vmem %s3882_s25, 32  ;;  %p4614_p2 = scmp.lt.s32.totalorder %s3882_s25, %s3882_s25 }
 0x321   :  { %4227 = vmatprep.subr.bf16.mxu1 %v5692_v21  ;;  %p4610_p1 = scmp.ne.s32.totalorder %s3882_s25, %s4609_s8  ;;  %p4615_p3 = scmp.lt.s32.totalorder %s4609_s8, %s4609_s8 }
 0x322   :  { %4206 = vmatpush3.bf16.msra.mxu0 %v4519_v43 }
 0x323   :  { %4207 = vmatprep.subr.bf16.mxu0 %v5692_v21  ;;  %p4616_p4 = por %p4615_p3, %p4614_p2 }
 0x324   :  { %4228 = vmatpush3.bf16.msra.mxu1 %v4522_v30 }
 0x325   :  { %4229 = vmatprep.subr.bf16.mxu1 %v5692_v21  ;;  %p4617_p5 = pnand %p4616_p4, %p4610_p1 }
 0x326   :  { %4208 = vmatpush3.bf16.msra.mxu0 %v4521_v7 }
 0x327   :  { %4209 = vmatprep.subr.bf16.mxu0 %v5692_v21 }
 0x328   :  { %4230 = vmatpush3.bf16.msra.mxu1 %v4524_v14 }
 0x329   :  { %4255 = vmatprep.subr.bf16.mxu1 %v5692_v21 }
 0x32a   :  { %4210 = vmatpush3.bf16.msra.mxu0 %v4523_v26 }
 0x32b   :  { %4235 = vmatprep.subr.bf16.mxu0 %v5692_v21  ;;  %4232 = vmatmul.mubr.bf16.vlgmr.msra.gmra.mxu1 %v3430_v33 }
 0x32c   :  { %4271 = vmatprep.mubr.msk.bf16.mxu1 %vm4645_vm11, %v5692_v21  ;;  %4256 = vmatpush3.bf16.msra.mxu1 %v3719_v25 }
 0x32d   :  { %4212 = vmatmul.mubr.bf16.vlgmr.msra.gmra.mxu0 %v3315_v47  ;;  %4257 = vmatprep.subr.bf16.mxu1 %v5692_v21 }
 0x32e   :  { %4236 = vmatpush3.bf16.msra.mxu0 %v4525_v51  ;;  %4251 = vmatprep.mubr.msk.bf16.mxu0 %vm4645_vm11, %v5692_v21  ;;  %v4083_v51 = vld [vmem:[%s5674_s10] ss:$0 sm:$0xff] }
 0x32f   :  { %4237 = vmatprep.subr.bf16.mxu0 %v5692_v21 }
 0x330   :  { %4258 = vmatpush3.bf16.msra.mxu1 %v4534_v38 }
 0x331   :  { %4259 = vmatprep.subr.bf16.mxu1 %v5692_v21 }
 0x332   :  { %4238 = vmatpush3.bf16.msra.mxu0 %v4526_v62 }
 0x333   :  { %4239 = vmatprep.subr.bf16.mxu0 %v5692_v21 }
 0x334   :  { %4260 = vmatpush3.bf16.msra.mxu1 %v4535_v2 }
 0x335   :  { %4261 = vmatprep.subr.bf16.mxu1 %v5692_v21 }
 0x336   :  { %4240 = vmatpush3.bf16.msra.mxu0 %v4527_v31 }
 0x337   :  { %4241 = vmatprep.subr.bf16.mxu0 %v5692_v21 }
 0x338   :  { %4262 = vmatpush3.bf16.msra.mxu1 %v4536_v49 }
 0x339   :  { %4263 = vmatprep.subr.bf16.mxu1 %v5692_v21 }
 0x33a   :  { %4242 = vmatpush3.bf16.msra.mxu0 %v4528_v61 }
 0x33b   :  { %4243 = vmatprep.subr.bf16.mxu0 %v5692_v21 }
 0x33c   :  { %4264 = vmatpush3.bf16.msra.mxu1 %v4537_v35 }
 0x33d   :  { %4265 = vmatprep.subr.bf16.mxu1 %v5692_v21 }
 0x33e   :  { %4244 = vmatpush3.bf16.msra.mxu0 %v4529_v34 }
 0x33f   :  { %4245 = vmatprep.subr.bf16.mxu0 %v5692_v21 }
 0x340   :  { %4266 = vmatpush3.bf16.msra.mxu1 %v4538_v12 }
 0x341   :  { %4267 = vmatprep.subr.bf16.mxu1 %v5692_v21 }
 0x342   :  { %4246 = vmatpush3.bf16.msra.mxu0 %v4530_v8 }
 0x343   :  { %4247 = vmatprep.subr.bf16.mxu0 %v5692_v21 }
 0x344   :  { %4268 = vmatpush3.bf16.msra.mxu1 %v4539_v27 }
 0x345   :  { %4269 = vmatprep.subr.bf16.mxu1 %v5692_v21 }
 0x346   :  { %4248 = vmatpush3.bf16.msra.mxu0 %v4531_v39 }
 0x347   :  { %4249 = vmatprep.subr.bf16.mxu0 %v5692_v21 }
 0x348   :  { %4270 = vmatpush3.bf16.msra.mxu1 %v4540_v59 }
 0x34a   :  { %4250 = vmatpush3.bf16.msra.mxu0 %v4532_v46 }
 0x34b   :  { %4275 = vmatprep.subr.bf16.mxu0 %v5692_v21 }
 0x34d   :  { %4252 = vmatmul.mubr.bf16.vlgmr.msra.gmra.mxu0 %v3545_v22 }
 0x34e   :  { %4291 = vmatprep.mubr.msk.bf16.mxu0 %vm4645_vm11, %v5692_v21  ;;  %4276 = vmatpush3.bf16.msra.mxu0 %v4541_v57 }
 0x34f   :  { %4277 = vmatprep.subr.bf16.mxu0 %v5692_v21 }
 0x352   :  { %4278 = vmatpush3.bf16.msra.mxu0 %v4542_v63 }
 0x353   :  { %4279 = vmatprep.subr.bf16.mxu0 %v5692_v21 }
 0x356   :  { %4280 = vmatpush3.bf16.msra.mxu0 %v4543_v13 }
 0x357   :  { %4281 = vmatprep.subr.bf16.mxu0 %v5692_v21 }
 0x35a   :  { %4282 = vmatpush3.bf16.msra.mxu0 %v4544_v6 }
 0x35b   :  { %4283 = vmatprep.subr.bf16.mxu0 %v5692_v21 }
 0x35e   :  { %4284 = vmatpush3.bf16.msra.mxu0 %v4545_v44 }
 0x35f   :  { %4285 = vmatprep.subr.bf16.mxu0 %v5692_v21 }
 0x362   :  { %4286 = vmatpush3.bf16.msra.mxu0 %v4546_v48 }
 0x363   :  { %4287 = vmatprep.subr.bf16.mxu0 %v5692_v21 }
 0x366   :  { %4288 = vmatpush3.bf16.msra.mxu0 %v4547_v24 }
 0x367   :  { %4289 = vmatprep.subr.bf16.mxu0 %v5692_v21 }
 0x36a   :  { %4290 = vmatpush3.bf16.msra.mxu0 %v4548_v23 }
 0x3cb   :  { %v3285_v17 = vpop.f32.mrf.mxu1 }
 0x3cd   :  { %v3190_v55 = vpop.f32.mrf.mxu0  ;;  %v4193_v5 = vpop.f32.mrf.mxu1 }
 0x3ce   :  { %v3286_v40 = vadd.f32 %v3285_v17, %v3190_v55 }
 0x3cf   :  { %v4173_v54 = vpop.f32.mrf.mxu0  ;;  %v3288_v20 = vpop.f32.mrf.mxu1 }
 0x3d1   :  { %v3193_v29 = vpop.f32.mrf.mxu0  ;;  %v4194_v42 = vpop.f32.mrf.mxu1 }
 0x3d3   :  { %v4174_v11 = vpop.f32.mrf.mxu0 }
 0x3eb   :  { %v3514_v19 = vpop.f32.mrf.mxu1 }
 0x3ed   :  { %v3399_v28 = vpop.f32.mrf.mxu0  ;;  %v4233_v9 = vpop.f32.mrf.mxu1 }
 0x3ee   :  { %v3405_v37 = vadd.f32 %v3399_v28, %v3286_v40 }
 0x3ef   :  { %v4213_v52 = vpop.f32.mrf.mxu0  ;;  %v3517_v3 = vpop.f32.mrf.mxu1 }
 0x3f0   :  { %v3520_v1 = vadd.f32 %v3514_v19, %v3405_v37 }
 0x3f1   :  { %v3402_v60 = vpop.f32.mrf.mxu0  ;;  %v4234_v15 = vpop.f32.mrf.mxu1 }
 0x3f3   :  { %v4214_v56 = vpop.f32.mrf.mxu0 }
 0x40d   :  { %v3629_v0 = vpop.f32.mrf.mxu0 }
 0x40e   :  { %v3635_v36 = vadd.f32 %v3629_v0, %v3520_v1 }
 0x40f   :  { %v4253_v4 = vpop.f32.mrf.mxu0 }
 0x410   :  { %v3643_v41 = vadd.f32 %v4072_v32, %v3635_v36 }
 0x411   :  { %v3632_v58 = vpop.f32.mrf.mxu0 }
 0x412   :  { %v3644_v53 = vmax.f32 %v3643_v41, 0.0 }
 0x413   :  { %v4254_v50 = vpop.f32.mrf.mxu0 }
 0x414   :  { %v3645_v10 = vpack.c.bf16 %v3644_v53, %v3644_v53 }
 0x416   :  { %4272 = vmatmul.mubr.msk.bf16.vlgmr.msra.gmra.mxu1 %vm3713_vm13, %v3645_v10 }
 0x4d6   :  { %v3755_v45 = vpop.f32.mrf.mxu1 }
 0x4d7   :  { %v3756_v43 = vadd.f32 %v4073_v18, %v3755_v45 }
 0x4d8   :  { %v4273_v30 = vpop.f32.mrf.mxu1 }
 0x4d9   :  { %v3761_v7 = vmax.f32 %v3756_v43, 0.0 }
 0x4da   :  { %v3758_v14 = vpop.f32.mrf.mxu1 }
 0x4db   :  { %v3762_v26 = vpack.c.bf16 %v3761_v7, %v3761_v7 }
 0x4dc   :  { %v4274_v33 = vpop.f32.mrf.mxu1 }
 0x4dd   :  { %4292 = vmatmul.mubr.bf16.vlgmr.msra.gmra.mxu0 %v3762_v26 }
 0x59d   :  { %v3868_v21 = vpop.f32.mrf.mxu0 }
 0x59e   :  { %v3869_v47 = vadd.f32 %v4083_v51, %v3868_v21 }
 0x59f   :  { %v4293_v62 = vpop.f32.mrf.mxu0 }
 0x5a0   :  { %3874 = vst [vmem:[#allocation9] sm:$0x3] %v3869_v47 }
 0x5a1   :  { %v3871_v31 = vpop.f32.mrf.mxu0 }
 0x5a2   :  { %4620 = shalt.err (!%p4617_p5)
}
 0x5a3   :  { %3884 = dma.vmem_to_hbm [thread:$0]  %s3882_s25, 32, %s5675_s11, [#allocation5]   ;;  %v4294_v61 = vpop.f32.mrf.mxu0 }
 0x5a4   :  { %4633 = dma.done.wait [#allocation5], 32  }
 0x5a5   :  { %4634 = vsyncadd [#allocation5], 4294967264 }
 0x5a6   :  { %3888 = vsyncpa [#allocation4], 1 }
 0x5a7   :  { %3889 = vsyncpa [#allocation7], 1 }
 0x5a8   :  { %3890 = vsyncpa [#allocation5], 1 }

</bundles_post_ra>
